<compile_context>
chip_gen: v5e
topology: v5e:2x2
jax: 0.10.0
libtpu: 0.0.40
codegen_flags: <defaults>
</compile_context>

<pallas_src>
import functools

import jax
import jax.numpy as jnp
import numpy as np
from jax.experimental import pallas as pl
from jax.experimental.pallas import tpu as pltpu

IN_CH = 4
NUM_CLASSES = 100
BN_EPS = 1e-5


# ----------------------------------------------------------------------------
# Fused Pallas kernel: conv1+BN+ReLU+pool -> conv2+BN+ReLU+pool -> conv3+BN+ReLU+GAP+FC
# ----------------------------------------------------------------------------
def _standard_cnn_kernel(x_ref, w1_ref, sc1_ref, sh1_ref,
                         w2_ref, sc2_ref, sh2_ref,
                         w3_ref, sc3_ref, sh3_ref,
                         fw_ref, fb_ref,
                         o_ref,
                         pad2_ref, pad3_ref, *, bt, h, w):
    c1 = w1_ref.shape[1]
    c2 = w2_ref.shape[1]
    c3 = w3_ref.shape[1]
    n_cls = fw_ref.shape[1]

    # Zero the padded scratch buffers (borders must be zero; interiors overwritten below).
    # Zeroed every step: with "parallel" semantics a core may never see program_id == 0.
    pad2_ref[...] = jnp.zeros_like(pad2_ref)
    pad3_ref[...] = jnp.zeros_like(pad3_ref)

    def affine_relu(acc, sc_ref, sh_ref):
        # conv bias is already folded into sh (see _fold_conv_bn).
        return jnp.maximum(acc * sc_ref[...] + sh_ref[...], 0.0)

    def maxpool2(acc, hh, ww, c):
        # acc: (bt*hh*ww, c) f32, rows ordered (b, h, w)  ->  (bt, hh//2, ww//2, c)
        r = jnp.max(acc.reshape(bt * hh * ww // 2, 2, c), axis=1)        # pool W pairs
        r = jnp.max(r.reshape(bt * hh // 2, 2, ww // 2, c), axis=1)      # pool H pairs
        return r.reshape(bt, hh // 2, ww // 2, c)

    def im2col(pad_ref, hh, ww, c):
        # (bt, hh+2, ww+2, c) padded ref -> (bt*hh*ww, 9*c), tap-major (kh, kw, cin).
        wins = [pad_ref[:, kh:kh + hh, kw:kw + ww, :]
                for kh in range(3) for kw in range(3)]
        cols = jnp.concatenate(wins, axis=-1)                            # (bt, hh, ww, 9c)
        return cols.reshape(bt * hh * ww, 9 * c)

    # ---- stage 1: conv1 (K=9*Cin im2col precomputed in wrapper) + BN + ReLU + pool ----
    x1 = x_ref[...].reshape(bt * h * w, w1_ref.shape[0])                 # bf16 (M, 9*Cin)
    a1 = jnp.dot(x1, w1_ref[...], preferred_element_type=jnp.float32)
    a1 = affine_relu(a1, sc1_ref, sh1_ref)
    h2, w2s = h // 2, w // 2
    p1 = maxpool2(a1, h, w, c1)                                          # (bt, h/2, w/2, c1)
    pad2_ref[:, 1:h2 + 1, 1:w2s + 1, :] = p1.astype(pad2_ref.dtype)

    # ---- stage 2: conv2 + BN + ReLU + pool (im2col built in VMEM, K = 9*c1) ----
    x2 = im2col(pad2_ref, h2, w2s, c1)
    a2 = jnp.dot(x2, w2_ref[...], preferred_element_type=jnp.float32)
    a2 = affine_relu(a2, sc2_ref, sh2_ref)
    h3, w3s = h2 // 2, w2s // 2
    p2 = maxpool2(a2, h2, w2s, c2)                                       # (bt, h/4, w/4, c2)
    pad3_ref[:, 1:h3 + 1, 1:w3s + 1, :] = p2.astype(pad3_ref.dtype)

    # ---- stage 3: conv3 + BN + ReLU + GAP + FC (K = 9*c2) ----
    x3 = im2col(pad3_ref, h3, w3s, c2)
    a3 = jnp.dot(x3, w3_ref[...], preferred_element_type=jnp.float32)
    a3 = affine_relu(a3, sc3_ref, sh3_ref)
    feat = jnp.mean(a3.reshape(bt, h3 * w3s, c3), axis=1)                # GAP -> (bt, c3)
    # Dropout(0.5) is identity in eval mode.
    logits = jnp.dot(feat.astype(jnp.bfloat16), fw_ref[...],
                     preferred_element_type=jnp.float32) + fb_ref[...]   # (bt, n_cls)
    o_ref[...] = logits.reshape(bt, 1, n_cls).astype(o_ref.dtype)


# ----------------------------------------------------------------------------
# Wrapper glue: layouts, im2col for stage 1, BN/bias folding, batch blocking
# ----------------------------------------------------------------------------
def _fold_conv_bn(w_oihw, bias, bn):
    """OIHW conv weight -> (9*Cin, Cout) tap-major bf16; fold conv bias into BN shift."""
    cout, cin = w_oihw.shape[0], w_oihw.shape[1]
    w = jnp.transpose(w_oihw, (2, 3, 1, 0)).reshape(9 * cin, cout).astype(jnp.bfloat16)
    scale = bn['gamma'] / jnp.sqrt(bn['var'] + BN_EPS)
    shift = bn['beta'] + (bias - bn['mean']) * scale
    return (w,
            scale.reshape(1, cout).astype(jnp.float32),
            shift.reshape(1, cout).astype(jnp.float32))


def _im2col_nhwc(x):
    """(B, H, W, C) -> (B, H*W, 9*C), tap-major (kh, kw, cin) to match _fold_conv_bn."""
    B, H, W, C = x.shape
    xp = jnp.pad(x, ((0, 0), (1, 1), (1, 1), (0, 0)))
    cols = jnp.concatenate(
        [xp[:, kh:kh + H, kw:kw + W, :] for kh in range(3) for kw in range(3)],
        axis=-1)
    return cols.reshape(B, H * W, 9 * C)


def _pick_batch_block(B):
    """Largest block in {8,4,2,1} that divides B while keeping >=2 grid steps (v7x: 2 TCs)."""
    for bt in (8, 4, 2, 1):
        if B % bt == 0 and B // bt >= 2:
            return bt
    return B


def _full_spec(shape):
    n = len(shape)
    return pl.BlockSpec(shape, lambda i, n=n: (0,) * n)


def standard_cnn_forward(x_nchw, p, *, batch_block=None):
    x = jnp.transpose(x_nchw, (0, 2, 3, 1))                     # NCHW -> NHWC
    B, H, W, _ = x.shape
    assert H % 4 == 0 and W % 4 == 0, "two 2x2 maxpools need H, W divisible by 4"
    bt = batch_block or _pick_batch_block(B)
    assert B % bt == 0

    x_cols = _im2col_nhwc(x.astype(jnp.bfloat16))               # (B, H*W, 9*Cin) bf16

    w1, sc1, sh1 = _fold_conv_bn(p['conv1_w'], p['conv1_b'], p['bn1'])
    w2, sc2, sh2 = _fold_conv_bn(p['conv2_w'], p['conv2_b'], p['bn2'])
    w3, sc3, sh3 = _fold_conv_bn(p['conv3_w'], p['conv3_b'], p['bn3'])
    fw = p['fc_w'].astype(jnp.bfloat16)
    n_cls = fw.shape[1]
    fb = p['fc_b'].reshape(1, n_cls).astype(jnp.float32)

    c1, c2 = w1.shape[1], w2.shape[1]
    k1 = w1.shape[0]

    out = pl.pallas_call(
        functools.partial(_standard_cnn_kernel, bt=bt, h=H, w=W),
        out_shape=jax.ShapeDtypeStruct((B, 1, n_cls), jnp.float32),
        grid=(B // bt,),
        in_specs=[
            pl.BlockSpec((bt, H * W, k1), lambda i: (i, 0, 0)),
            _full_spec(w1.shape), _full_spec(sc1.shape), _full_spec(sh1.shape),
            _full_spec(w2.shape), _full_spec(sc2.shape), _full_spec(sh2.shape),
            _full_spec(w3.shape), _full_spec(sc3.shape), _full_spec(sh3.shape),
            _full_spec(fw.shape), _full_spec(fb.shape),
        ],
        out_specs=pl.BlockSpec((bt, 1, n_cls), lambda i: (i, 0, 0)),
        scratch_shapes=[
            pltpu.VMEM((bt, H // 2 + 2, W // 2 + 2, c1), jnp.bfloat16),   # padded stage-1 out
            pltpu.VMEM((bt, H // 4 + 2, W // 4 + 2, c2), jnp.bfloat16),   # padded stage-2 out
        ],
        compiler_params=pltpu.CompilerParams(dimension_semantics=("parallel",)),
    )(x_cols, w1, sc1, sh1, w2, sc2, sh2, w3, sc3, sh3, fw, fb)
    return out.reshape(B, n_cls)


# ----------------------------------------------------------------------------
# Parameters (deterministic; shapes from StandardCNN.__init__, BN uses running stats)
# ----------------------------------------------------------------------------
def init_params(key):
    ks = jax.random.split(key, 11)

    def w_init(k, shape, fan_in):
        return jax.random.normal(k, shape, jnp.float32) / jnp.sqrt(float(fan_in))

    def bn_init(k, c):
        k1, k2, k3, k4 = jax.random.split(k, 4)
        return dict(gamma=1.0 + 0.1 * jax.random.normal(k1, (c,), jnp.float32),
                    beta=0.1 * jax.random.normal(k2, (c,), jnp.float32),
                    mean=0.1 * jax.random.normal(k3, (c,), jnp.float32),
                    var=1.0 + 0.1 * jnp.abs(jax.random.normal(k4, (c,), jnp.float32)))

    return {
        'conv1_w': w_init(ks[0], (32, IN_CH, 3, 3), IN_CH * 9),
        'conv1_b': 0.1 * jax.random.normal(ks[1], (32,), jnp.float32),
        'conv2_w': w_init(ks[2], (64, 32, 3, 3), 32 * 9),
        'conv2_b': 0.1 * jax.random.normal(ks[3], (64,), jnp.float32),
        'conv3_w': w_init(ks[4], (128, 64, 3, 3), 64 * 9),
        'conv3_b': 0.1 * jax.random.normal(ks[5], (128,), jnp.float32),
        'bn1': bn_init(ks[6], 32),
        'bn2': bn_init(ks[7], 64),
        'bn3': bn_init(ks[8], 128),
        'fc_w': w_init(ks[9], (128, NUM_CLASSES), 128),
        'fc_b': 0.1 * jax.random.normal(ks[10], (NUM_CLASSES,), jnp.float32),
    }


# ----------------------------------------------------------------------------
# Pure-JAX reference (self-check; bf16 matmul operands / f32 accumulate, like the kernel)
# ----------------------------------------------------------------------------
def reference_forward(x_nchw, p):
    x = jnp.transpose(x_nchw, (0, 2, 3, 1)).astype(jnp.float32)

    def conv(x, w_oihw, b):
        w = jnp.transpose(w_oihw, (2, 3, 1, 0))                 # OIHW -> HWIO
        y = jax.lax.conv_general_dilated(
            x.astype(jnp.bfloat16), w.astype(jnp.bfloat16),
            window_strides=(1, 1), padding=((1, 1), (1, 1)),
            dimension_numbers=('NHWC', 'HWIO', 'NHWC'),
            preferred_element_type=jnp.float32)
        return y + b[None, None, None, :]

    def bn(x, d):
        s = d['gamma'] / jnp.sqrt(d['var'] + BN_EPS)
        return (x - d['mean']) * s + d['beta']

    def mp(x):
        B, H, W, C = x.shape
        return x.reshape(B, H // 2, 2, W // 2, 2, C).max(axis=(2, 4))

    x = mp(jax.nn.relu(bn(conv(x, p['conv1_w'], p['conv1_b']), p['bn1'])))
    x = mp(jax.nn.relu(bn(conv(x, p['conv2_w'], p['conv2_b']), p['bn2'])))
    x = jax.nn.relu(bn(conv(x, p['conv3_w'], p['conv3_b']), p['bn3']))
    feat = x.mean(axis=(1, 2))                                   # AdaptiveAvgPool2d((1,1))
    # Dropout = identity (eval); FC with bf16 operands like the kernel.
    return jnp.dot(feat.astype(jnp.bfloat16), p['fc_w'].astype(jnp.bfloat16),
                   preferred_element_type=jnp.float32) + p['fc_b']


if __name__ == "__main__":
    key = jax.random.PRNGKey(0)
    kx, kp = jax.random.split(key)
    x = jax.random.normal(kx, (2, IN_CH, 16, 16), jnp.float32)   # NCHW, like PyTorch

    params = init_params(kp)
    fwd = jax.jit(standard_cnn_forward)
    out = jax.block_until_ready(fwd(x, params))
    assert out.shape == (2, NUM_CLASSES), out.shape

    ref = jax.block_until_ready(reference_forward(x, params))
    # bf16 MXU operands in both paths; tolerance covers bf16-level accumulation-order noise.
    np.testing.assert_allclose(np.asarray(out), np.asarray(ref), rtol=1e-2, atol=1e-2)

    print("KERNEL_OK")
</pallas_src>

<mosaic_0001>
module attributes {stable_mosaic.version = 11 : i64} {
  func.func @_standard_cnn_kernel(%arg0: i32, %arg1: memref<1x256x36xbf16, #tpu.memory_space<vmem>>, %arg2: memref<36x32xbf16, #tpu.memory_space<vmem>>, %arg3: memref<1x32xf32, #tpu.memory_space<vmem>>, %arg4: memref<1x32xf32, #tpu.memory_space<vmem>>, %arg5: memref<288x64xbf16, #tpu.memory_space<vmem>>, %arg6: memref<1x64xf32, #tpu.memory_space<vmem>>, %arg7: memref<1x64xf32, #tpu.memory_space<vmem>>, %arg8: memref<576x128xbf16, #tpu.memory_space<vmem>>, %arg9: memref<1x128xf32, #tpu.memory_space<vmem>>, %arg10: memref<1x128xf32, #tpu.memory_space<vmem>>, %arg11: memref<128x100xbf16, #tpu.memory_space<vmem>>, %arg12: memref<1x100xf32, #tpu.memory_space<vmem>>, %arg13: memref<1x1x100xf32, #tpu.memory_space<vmem>>, %arg14: memref<1x10x10x32xbf16, #tpu.memory_space<vmem>>, %arg15: memref<1x6x6x64xbf16, #tpu.memory_space<vmem>>) attributes {dimension_semantics = [#tpu.dimension_semantics<parallel>], iteration_bounds = array<i64: 2>, scalar_prefetch = 0 : i64, scratch_operands = 2 : i64, tpu.core_type = #tpu.core_type<tc>, window_params = [{transform_indices = @transform_0, window_bounds = array<i64: 1, 256, 36>}, {pipeline_mode = #tpu.pipeline_mode<synchronous>, transform_indices = @transform_1, window_bounds = array<i64: 36, 32>}, {pipeline_mode = #tpu.pipeline_mode<synchronous>, transform_indices = @transform_2, window_bounds = array<i64: 1, 32>}, {pipeline_mode = #tpu.pipeline_mode<synchronous>, transform_indices = @transform_3, window_bounds = array<i64: 1, 32>}, {pipeline_mode = #tpu.pipeline_mode<synchronous>, transform_indices = @transform_4, window_bounds = array<i64: 288, 64>}, {pipeline_mode = #tpu.pipeline_mode<synchronous>, transform_indices = @transform_5, window_bounds = array<i64: 1, 64>}, {pipeline_mode = #tpu.pipeline_mode<synchronous>, transform_indices = @transform_6, window_bounds = array<i64: 1, 64>}, {pipeline_mode = #tpu.pipeline_mode<synchronous>, transform_indices = @transform_7, window_bounds = array<i64: 576, 128>}, {pipeline_mode = #tpu.pipeline_mode<synchronous>, transform_indices = @transform_8, window_bounds = array<i64: 1, 128>}, {pipeline_mode = #tpu.pipeline_mode<synchronous>, transform_indices = @transform_9, window_bounds = array<i64: 1, 128>}, {pipeline_mode = #tpu.pipeline_mode<synchronous>, transform_indices = @transform_10, window_bounds = array<i64: 128, 100>}, {pipeline_mode = #tpu.pipeline_mode<synchronous>, transform_indices = @transform_11, window_bounds = array<i64: 1, 100>}, {transform_indices = @transform_12, window_bounds = array<i64: 1, 1, 100>}]} {
    %cst = arith.constant 0.000000e+00 : bf16
    %0 = vector.broadcast %cst : bf16 to vector<1x10x10x32xbf16>
    %c0 = arith.constant 0 : index
    %c0_0 = arith.constant 0 : index
    %c0_1 = arith.constant 0 : index
    %c0_2 = arith.constant 0 : index
    %1 = vector.load %arg14[%c0, %c0_0, %c0_1, %c0_2] : memref<1x10x10x32xbf16, #tpu.memory_space<vmem>>, vector<1x10x10x32xbf16>
    tpu.vector_store %arg14[%c0, %c0_0, %c0_1, %c0_2], %0 {strides = array<i32>} : memref<1x10x10x32xbf16, #tpu.memory_space<vmem>>, vector<1x10x10x32xbf16>,
    %cst_3 = arith.constant 0.000000e+00 : bf16
    %2 = vector.broadcast %cst_3 : bf16 to vector<1x6x6x64xbf16>
    %c0_4 = arith.constant 0 : index
    %c0_5 = arith.constant 0 : index
    %c0_6 = arith.constant 0 : index
    %c0_7 = arith.constant 0 : index
    %3 = vector.load %arg15[%c0_4, %c0_5, %c0_6, %c0_7] : memref<1x6x6x64xbf16, #tpu.memory_space<vmem>>, vector<1x6x6x64xbf16>
    tpu.vector_store %arg15[%c0_4, %c0_5, %c0_6, %c0_7], %2 {strides = array<i32>} : memref<1x6x6x64xbf16, #tpu.memory_space<vmem>>, vector<1x6x6x64xbf16>,
    %c0_8 = arith.constant 0 : index
    %c0_9 = arith.constant 0 : index
    %c0_10 = arith.constant 0 : index
    %4 = vector.load %arg1[%c0_8, %c0_9, %c0_10] : memref<1x256x36xbf16, #tpu.memory_space<vmem>>, vector<1x256x36xbf16>
    %5 = vector.shape_cast %4 : vector<1x256x36xbf16> to vector<256x36xbf16>
    %c0_11 = arith.constant 0 : index
    %c0_12 = arith.constant 0 : index
    %6 = vector.load %arg2[%c0_11, %c0_12] : memref<36x32xbf16, #tpu.memory_space<vmem>>, vector<36x32xbf16>
    %cst_13 = arith.constant dense<0.000000e+00> : vector<256x32xf32>
    %7 = tpu.matmul %5, %6, %cst_13 {dimension_numbers = #tpu.dot_dimension_numbers<[1], [0], [0], [1], [0, 0, 1, 1], [], []>} : vector<256x36xbf16>, vector<36x32xbf16>, vector<256x32xf32> -> vector<256x32xf32>
    %c0_14 = arith.constant 0 : index
    %c0_15 = arith.constant 0 : index
    %8 = vector.load %arg3[%c0_14, %c0_15] : memref<1x32xf32, #tpu.memory_space<vmem>>, vector<1x32xf32>
    %9 = vector.broadcast %8 : vector<1x32xf32> to vector<256x32xf32>
    %10 = arith.mulf %7, %9 : vector<256x32xf32>
    %c0_16 = arith.constant 0 : index
    %c0_17 = arith.constant 0 : index
    %11 = vector.load %arg4[%c0_16, %c0_17] : memref<1x32xf32, #tpu.memory_space<vmem>>, vector<1x32xf32>
    %12 = vector.broadcast %11 : vector<1x32xf32> to vector<256x32xf32>
    %13 = arith.addf %10, %12 : vector<256x32xf32>
    %cst_18 = arith.constant 0.000000e+00 : f32
    %14 = vector.broadcast %cst_18 : f32 to vector<256x32xf32>
    %15 = arith.maximumf %13, %14 : vector<256x32xf32>
    %16 = vector.shape_cast %15 : vector<256x32xf32> to vector<128x2x32xf32>
    %cst_19 = arith.constant dense<0xFF800000> : vector<128x32xf32>
    %17 = vector.multi_reduction <maximumf>, %16, %cst_19 [1] : vector<128x2x32xf32> to vector<128x32xf32>
    %18 = vector.shape_cast %17 : vector<128x32xf32> to vector<8x2x8x32xf32>
    %cst_20 = arith.constant dense<0xFF800000> : vector<8x8x32xf32>
    %19 = vector.multi_reduction <maximumf>, %18, %cst_20 [1] : vector<8x2x8x32xf32> to vector<8x8x32xf32>
    %20 = vector.shape_cast %19 : vector<8x8x32xf32> to vector<1x8x8x32xf32>
    %21 = arith.truncf %20 : vector<1x8x8x32xf32> to vector<1x8x8x32xbf16>
    %c0_21 = arith.constant 0 : index
    %c1 = arith.constant 1 : index
    %c1_22 = arith.constant 1 : index
    %c0_23 = arith.constant 0 : index
    %22 = vector.load %arg14[%c0_21, %c1, %c1_22, %c0_23] : memref<1x10x10x32xbf16, #tpu.memory_space<vmem>>, vector<1x8x8x32xbf16>
    tpu.vector_store %arg14[%c0_21, %c1, %c1_22, %c0_23], %21 {strides = array<i32>} : memref<1x10x10x32xbf16, #tpu.memory_space<vmem>>, vector<1x8x8x32xbf16>,
    %c0_24 = arith.constant 0 : index
    %c0_25 = arith.constant 0 : index
    %c0_26 = arith.constant 0 : index
    %c0_27 = arith.constant 0 : index
    %23 = vector.load %arg14[%c0_24, %c0_25, %c0_26, %c0_27] : memref<1x10x10x32xbf16, #tpu.memory_space<vmem>>, vector<1x8x8x32xbf16>
    %c0_28 = arith.constant 0 : index
    %c0_29 = arith.constant 0 : index
    %c1_30 = arith.constant 1 : index
    %c0_31 = arith.constant 0 : index
    %24 = vector.load %arg14[%c0_28, %c0_29, %c1_30, %c0_31] : memref<1x10x10x32xbf16, #tpu.memory_space<vmem>>, vector<1x8x8x32xbf16>
    %c0_32 = arith.constant 0 : index
    %c0_33 = arith.constant 0 : index
    %c2 = arith.constant 2 : index
    %c0_34 = arith.constant 0 : index
    %25 = vector.load %arg14[%c0_32, %c0_33, %c2, %c0_34] : memref<1x10x10x32xbf16, #tpu.memory_space<vmem>>, vector<1x8x8x32xbf16>
    %c0_35 = arith.constant 0 : index
    %c1_36 = arith.constant 1 : index
    %c0_37 = arith.constant 0 : index
    %c0_38 = arith.constant 0 : index
    %26 = vector.load %arg14[%c0_35, %c1_36, %c0_37, %c0_38] : memref<1x10x10x32xbf16, #tpu.memory_space<vmem>>, vector<1x8x8x32xbf16>
    %c0_39 = arith.constant 0 : index
    %c1_40 = arith.constant 1 : index
    %c1_41 = arith.constant 1 : index
    %c0_42 = arith.constant 0 : index
    %27 = vector.load %arg14[%c0_39, %c1_40, %c1_41, %c0_42] : memref<1x10x10x32xbf16, #tpu.memory_space<vmem>>, vector<1x8x8x32xbf16>
    %c0_43 = arith.constant 0 : index
    %c1_44 = arith.constant 1 : index
    %c2_45 = arith.constant 2 : index
    %c0_46 = arith.constant 0 : index
    %28 = vector.load %arg14[%c0_43, %c1_44, %c2_45, %c0_46] : memref<1x10x10x32xbf16, #tpu.memory_space<vmem>>, vector<1x8x8x32xbf16>
    %c0_47 = arith.constant 0 : index
    %c2_48 = arith.constant 2 : index
    %c0_49 = arith.constant 0 : index
    %c0_50 = arith.constant 0 : index
    %29 = vector.load %arg14[%c0_47, %c2_48, %c0_49, %c0_50] : memref<1x10x10x32xbf16, #tpu.memory_space<vmem>>, vector<1x8x8x32xbf16>
    %c0_51 = arith.constant 0 : index
    %c2_52 = arith.constant 2 : index
    %c1_53 = arith.constant 1 : index
    %c0_54 = arith.constant 0 : index
    %30 = vector.load %arg14[%c0_51, %c2_52, %c1_53, %c0_54] : memref<1x10x10x32xbf16, #tpu.memory_space<vmem>>, vector<1x8x8x32xbf16>
    %c0_55 = arith.constant 0 : index
    %c2_56 = arith.constant 2 : index
    %c2_57 = arith.constant 2 : index
    %c0_58 = arith.constant 0 : index
    %31 = vector.load %arg14[%c0_55, %c2_56, %c2_57, %c0_58] : memref<1x10x10x32xbf16, #tpu.memory_space<vmem>>, vector<1x8x8x32xbf16>
    %32 = tpu.concatenate %23, %24, %25, %26, %27, %28, %29, %30, %31 in 3 : vector<1x8x8x32xbf16>, vector<1x8x8x32xbf16>, vector<1x8x8x32xbf16>, vector<1x8x8x32xbf16>, vector<1x8x8x32xbf16>, vector<1x8x8x32xbf16>, vector<1x8x8x32xbf16>, vector<1x8x8x32xbf16>, vector<1x8x8x32xbf16> -> vector<1x8x8x288xbf16>
    %33 = vector.shape_cast %32 : vector<1x8x8x288xbf16> to vector<64x288xbf16>
    %c0_59 = arith.constant 0 : index
    %c0_60 = arith.constant 0 : index
    %34 = vector.load %arg5[%c0_59, %c0_60] : memref<288x64xbf16, #tpu.memory_space<vmem>>, vector<288x64xbf16>
    %cst_61 = arith.constant dense<0.000000e+00> : vector<64x64xf32>
    %35 = tpu.matmul %33, %34, %cst_61 {dimension_numbers = #tpu.dot_dimension_numbers<[1], [0], [0], [1], [0, 0, 1, 1], [], []>} : vector<64x288xbf16>, vector<288x64xbf16>, vector<64x64xf32> -> vector<64x64xf32>
    %c0_62 = arith.constant 0 : index
    %c0_63 = arith.constant 0 : index
    %36 = vector.load %arg6[%c0_62, %c0_63] : memref<1x64xf32, #tpu.memory_space<vmem>>, vector<1x64xf32>
    %37 = vector.broadcast %36 : vector<1x64xf32> to vector<64x64xf32>
    %38 = arith.mulf %35, %37 : vector<64x64xf32>
    %c0_64 = arith.constant 0 : index
    %c0_65 = arith.constant 0 : index
    %39 = vector.load %arg7[%c0_64, %c0_65] : memref<1x64xf32, #tpu.memory_space<vmem>>, vector<1x64xf32>
    %40 = vector.broadcast %39 : vector<1x64xf32> to vector<64x64xf32>
    %41 = arith.addf %38, %40 : vector<64x64xf32>
    %cst_66 = arith.constant 0.000000e+00 : f32
    %42 = vector.broadcast %cst_66 : f32 to vector<64x64xf32>
    %43 = arith.maximumf %41, %42 : vector<64x64xf32>
    %44 = vector.shape_cast %43 : vector<64x64xf32> to vector<32x2x64xf32>
    %cst_67 = arith.constant dense<0xFF800000> : vector<32x64xf32>
    %45 = vector.multi_reduction <maximumf>, %44, %cst_67 [1] : vector<32x2x64xf32> to vector<32x64xf32>
    %46 = vector.shape_cast %45 : vector<32x64xf32> to vector<4x2x4x64xf32>
    %cst_68 = arith.constant dense<0xFF800000> : vector<4x4x64xf32>
    %47 = vector.multi_reduction <maximumf>, %46, %cst_68 [1] : vector<4x2x4x64xf32> to vector<4x4x64xf32>
    %48 = vector.shape_cast %47 : vector<4x4x64xf32> to vector<1x4x4x64xf32>
    %49 = arith.truncf %48 : vector<1x4x4x64xf32> to vector<1x4x4x64xbf16>
    %c0_69 = arith.constant 0 : index
    %c1_70 = arith.constant 1 : index
    %c1_71 = arith.constant 1 : index
    %c0_72 = arith.constant 0 : index
    %50 = vector.load %arg15[%c0_69, %c1_70, %c1_71, %c0_72] : memref<1x6x6x64xbf16, #tpu.memory_space<vmem>>, vector<1x4x4x64xbf16>
    tpu.vector_store %arg15[%c0_69, %c1_70, %c1_71, %c0_72], %49 {strides = array<i32>} : memref<1x6x6x64xbf16, #tpu.memory_space<vmem>>, vector<1x4x4x64xbf16>,
    %c0_73 = arith.constant 0 : index
    %c0_74 = arith.constant 0 : index
    %c0_75 = arith.constant 0 : index
    %c0_76 = arith.constant 0 : index
    %51 = vector.load %arg15[%c0_73, %c0_74, %c0_75, %c0_76] : memref<1x6x6x64xbf16, #tpu.memory_space<vmem>>, vector<1x4x4x64xbf16>
    %c0_77 = arith.constant 0 : index
    %c0_78 = arith.constant 0 : index
    %c1_79 = arith.constant 1 : index
    %c0_80 = arith.constant 0 : index
    %52 = vector.load %arg15[%c0_77, %c0_78, %c1_79, %c0_80] : memref<1x6x6x64xbf16, #tpu.memory_space<vmem>>, vector<1x4x4x64xbf16>
    %c0_81 = arith.constant 0 : index
    %c0_82 = arith.constant 0 : index
    %c2_83 = arith.constant 2 : index
    %c0_84 = arith.constant 0 : index
    %53 = vector.load %arg15[%c0_81, %c0_82, %c2_83, %c0_84] : memref<1x6x6x64xbf16, #tpu.memory_space<vmem>>, vector<1x4x4x64xbf16>
    %c0_85 = arith.constant 0 : index
    %c1_86 = arith.constant 1 : index
    %c0_87 = arith.constant 0 : index
    %c0_88 = arith.constant 0 : index
    %54 = vector.load %arg15[%c0_85, %c1_86, %c0_87, %c0_88] : memref<1x6x6x64xbf16, #tpu.memory_space<vmem>>, vector<1x4x4x64xbf16>
    %c0_89 = arith.constant 0 : index
    %c1_90 = arith.constant 1 : index
    %c1_91 = arith.constant 1 : index
    %c0_92 = arith.constant 0 : index
    %55 = vector.load %arg15[%c0_89, %c1_90, %c1_91, %c0_92] : memref<1x6x6x64xbf16, #tpu.memory_space<vmem>>, vector<1x4x4x64xbf16>
    %c0_93 = arith.constant 0 : index
    %c1_94 = arith.constant 1 : index
    %c2_95 = arith.constant 2 : index
    %c0_96 = arith.constant 0 : index
    %56 = vector.load %arg15[%c0_93, %c1_94, %c2_95, %c0_96] : memref<1x6x6x64xbf16, #tpu.memory_space<vmem>>, vector<1x4x4x64xbf16>
    %c0_97 = arith.constant 0 : index
    %c2_98 = arith.constant 2 : index
    %c0_99 = arith.constant 0 : index
    %c0_100 = arith.constant 0 : index
    %57 = vector.load %arg15[%c0_97, %c2_98, %c0_99, %c0_100] : memref<1x6x6x64xbf16, #tpu.memory_space<vmem>>, vector<1x4x4x64xbf16>
    %c0_101 = arith.constant 0 : index
    %c2_102 = arith.constant 2 : index
    %c1_103 = arith.constant 1 : index
    %c0_104 = arith.constant 0 : index
    %58 = vector.load %arg15[%c0_101, %c2_102, %c1_103, %c0_104] : memref<1x6x6x64xbf16, #tpu.memory_space<vmem>>, vector<1x4x4x64xbf16>
    %c0_105 = arith.constant 0 : index
    %c2_106 = arith.constant 2 : index
    %c2_107 = arith.constant 2 : index
    %c0_108 = arith.constant 0 : index
    %59 = vector.load %arg15[%c0_105, %c2_106, %c2_107, %c0_108] : memref<1x6x6x64xbf16, #tpu.memory_space<vmem>>, vector<1x4x4x64xbf16>
    %60 = tpu.concatenate %51, %52, %53, %54, %55, %56, %57, %58, %59 in 3 : vector<1x4x4x64xbf16>, vector<1x4x4x64xbf16>, vector<1x4x4x64xbf16>, vector<1x4x4x64xbf16>, vector<1x4x4x64xbf16>, vector<1x4x4x64xbf16>, vector<1x4x4x64xbf16>, vector<1x4x4x64xbf16>, vector<1x4x4x64xbf16> -> vector<1x4x4x576xbf16>
    %61 = vector.shape_cast %60 : vector<1x4x4x576xbf16> to vector<16x576xbf16>
    %c0_109 = arith.constant 0 : index
    %c0_110 = arith.constant 0 : index
    %62 = vector.load %arg8[%c0_109, %c0_110] : memref<576x128xbf16, #tpu.memory_space<vmem>>, vector<576x128xbf16>
    %cst_111 = arith.constant dense<0.000000e+00> : vector<16x128xf32>
    %63 = tpu.matmul %61, %62, %cst_111 {dimension_numbers = #tpu.dot_dimension_numbers<[1], [0], [0], [1], [0, 0, 1, 1], [], []>} : vector<16x576xbf16>, vector<576x128xbf16>, vector<16x128xf32> -> vector<16x128xf32>
    %c0_112 = arith.constant 0 : index
    %c0_113 = arith.constant 0 : index
    %64 = vector.load %arg9[%c0_112, %c0_113] : memref<1x128xf32, #tpu.memory_space<vmem>>, vector<1x128xf32>
    %65 = vector.broadcast %64 : vector<1x128xf32> to vector<16x128xf32>
    %66 = arith.mulf %63, %65 : vector<16x128xf32>
    %c0_114 = arith.constant 0 : index
    %c0_115 = arith.constant 0 : index
    %67 = vector.load %arg10[%c0_114, %c0_115] : memref<1x128xf32, #tpu.memory_space<vmem>>, vector<1x128xf32>
    %68 = vector.broadcast %67 : vector<1x128xf32> to vector<16x128xf32>
    %69 = arith.addf %66, %68 : vector<16x128xf32>
    %cst_116 = arith.constant 0.000000e+00 : f32
    %70 = vector.broadcast %cst_116 : f32 to vector<16x128xf32>
    %71 = arith.maximumf %69, %70 : vector<16x128xf32>
    %72 = vector.shape_cast %71 : vector<16x128xf32> to vector<1x16x128xf32>
    %cst_117 = arith.constant dense<0.000000e+00> : vector<1x128xf32>
    %73 = vector.multi_reduction <add>, %72, %cst_117 [1] : vector<1x16x128xf32> to vector<1x128xf32>
    %cst_118 = arith.constant 1.600000e+01 : f32
    %74 = vector.broadcast %cst_118 : f32 to vector<1x128xf32>
    %75 = arith.divf %73, %74 : vector<1x128xf32>
    %76 = arith.truncf %75 : vector<1x128xf32> to vector<1x128xbf16>
    %c0_119 = arith.constant 0 : index
    %c0_120 = arith.constant 0 : index
    %77 = vector.load %arg11[%c0_119, %c0_120] : memref<128x100xbf16, #tpu.memory_space<vmem>>, vector<128x100xbf16>
    %cst_121 = arith.constant dense<0.000000e+00> : vector<1x100xf32>
    %78 = tpu.matmul %76, %77, %cst_121 {dimension_numbers = #tpu.dot_dimension_numbers<[1], [0], [0], [1], [0, 0, 1, 1], [], []>} : vector<1x128xbf16>, vector<128x100xbf16>, vector<1x100xf32> -> vector<1x100xf32>
    %c0_122 = arith.constant 0 : index
    %c0_123 = arith.constant 0 : index
    %79 = vector.load %arg12[%c0_122, %c0_123] : memref<1x100xf32, #tpu.memory_space<vmem>>, vector<1x100xf32>
    %80 = arith.addf %78, %79 : vector<1x100xf32>
    %81 = vector.shape_cast %80 : vector<1x100xf32> to vector<1x1x100xf32>
    %c0_124 = arith.constant 0 : index
    %c0_125 = arith.constant 0 : index
    %c0_126 = arith.constant 0 : index
    %82 = vector.load %arg13[%c0_124, %c0_125, %c0_126] : memref<1x1x100xf32, #tpu.memory_space<vmem>>, vector<1x1x100xf32>
    tpu.vector_store %arg13[%c0_124, %c0_125, %c0_126], %81 {strides = array<i32>} : memref<1x1x100xf32, #tpu.memory_space<vmem>>, vector<1x1x100xf32>,
    return
  }
  func.func @transform_0(%arg0: i32) -> (i32, i32, i32) {
    %c0_i32 = arith.constant 0 : i32
    %c0_i32_0 = arith.constant 0 : i32
    %c0_i32_1 = arith.constant 0 : i32
    return %arg0, %c0_i32, %c0_i32_0 : i32, i32, i32
  }
  func.func @transform_1(%arg0: i32) -> (i32, i32) {
    %c0_i32 = arith.constant 0 : i32
    %c0_i32_0 = arith.constant 0 : i32
    %c0_i32_1 = arith.constant 0 : i32
    return %c0_i32, %c0_i32_0 : i32, i32
  }
  func.func @transform_2(%arg0: i32) -> (i32, i32) {
    %c0_i32 = arith.constant 0 : i32
    %c0_i32_0 = arith.constant 0 : i32
    %c0_i32_1 = arith.constant 0 : i32
    return %c0_i32, %c0_i32_0 : i32, i32
  }
  func.func @transform_3(%arg0: i32) -> (i32, i32) {
    %c0_i32 = arith.constant 0 : i32
    %c0_i32_0 = arith.constant 0 : i32
    %c0_i32_1 = arith.constant 0 : i32
    return %c0_i32, %c0_i32_0 : i32, i32
  }
  func.func @transform_4(%arg0: i32) -> (i32, i32) {
    %c0_i32 = arith.constant 0 : i32
    %c0_i32_0 = arith.constant 0 : i32
    %c0_i32_1 = arith.constant 0 : i32
    return %c0_i32, %c0_i32_0 : i32, i32
  }
  func.func @transform_5(%arg0: i32) -> (i32, i32) {
    %c0_i32 = arith.constant 0 : i32
    %c0_i32_0 = arith.constant 0 : i32
    %c0_i32_1 = arith.constant 0 : i32
    return %c0_i32, %c0_i32_0 : i32, i32
  }
  func.func @transform_6(%arg0: i32) -> (i32, i32) {
    %c0_i32 = arith.constant 0 : i32
    %c0_i32_0 = arith.constant 0 : i32
    %c0_i32_1 = arith.constant 0 : i32
    return %c0_i32, %c0_i32_0 : i32, i32
  }
  func.func @transform_7(%arg0: i32) -> (i32, i32) {
    %c0_i32 = arith.constant 0 : i32
    %c0_i32_0 = arith.constant 0 : i32
    %c0_i32_1 = arith.constant 0 : i32
    return %c0_i32, %c0_i32_0 : i32, i32
  }
  func.func @transform_8(%arg0: i32) -> (i32, i32) {
    %c0_i32 = arith.constant 0 : i32
    %c0_i32_0 = arith.constant 0 : i32
    %c0_i32_1 = arith.constant 0 : i32
    return %c0_i32, %c0_i32_0 : i32, i32
  }
  func.func @transform_9(%arg0: i32) -> (i32, i32) {
    %c0_i32 = arith.constant 0 : i32
    %c0_i32_0 = arith.constant 0 : i32
    %c0_i32_1 = arith.constant 0 : i32
    return %c0_i32, %c0_i32_0 : i32, i32
  }
  func.func @transform_10(%arg0: i32) -> (i32, i32) {
    %c0_i32 = arith.constant 0 : i32
    %c0_i32_0 = arith.constant 0 : i32
    %c0_i32_1 = arith.constant 0 : i32
    return %c0_i32, %c0_i32_0 : i32, i32
  }
  func.func @transform_11(%arg0: i32) -> (i32, i32) {
    %c0_i32 = arith.constant 0 : i32
    %c0_i32_0 = arith.constant 0 : i32
    %c0_i32_1 = arith.constant 0 : i32
    return %c0_i32, %c0_i32_0 : i32, i32
  }
  func.func @transform_12(%arg0: i32) -> (i32, i32, i32) {
    %c0_i32 = arith.constant 0 : i32
    %c0_i32_0 = arith.constant 0 : i32
    %c0_i32_1 = arith.constant 0 : i32
    return %arg0, %c0_i32, %c0_i32_0 : i32, i32, i32
  }
}

</mosaic_0001>

<bundles_post_ra>
// kernel: standard_cnn_forward.1
= control target key start
LH: loop header
LB: loop body
LE: loop exit
PB: predicated region body
PF: predicated region fallthrough
CT: control target
= control target key end

     0   :  { %s7026_s0 = inlined_call_operand.vmem [shape: bf16[2,256,36], index: 0, kind: input, shape index: {}]   ;;  %s7027_s1 = inlined_call_operand.vmem [shape: bf16[36,32], index: 1, kind: input, shape index: {}]   ;;  %s7028_s2 = inlined_call_operand.vmem [shape: f32[1,32], index: 2, kind: input, shape index: {}]   ;;  %s7029_s3 = inlined_call_operand.vmem [shape: f32[1,32], index: 3, kind: input, shape index: {}]   ;;  %s7030_s4 = inlined_call_operand.vmem [shape: bf16[288,64], index: 4, kind: input, shape index: {}]   ;;  %s7031_s5 = inlined_call_operand.vmem [shape: f32[1,64], index: 5, kind: input, shape index: {}]   ;;  %s7032_s6 = inlined_call_operand.vmem [shape: f32[1,64], index: 6, kind: input, shape index: {}]   ;;  %s7033_s7 = inlined_call_operand.vmem [shape: bf16[576,128], index: 7, kind: input, shape index: {}]   ;;  %s7034_s8 = inlined_call_operand.vmem [shape: f32[1,128], index: 8, kind: input, shape index: {}]   ;;  %s7035_s9 = inlined_call_operand.vmem [shape: f32[1,128], index: 9, kind: input, shape index: {}]   ;;  %s7036_s10 = inlined_call_operand.vmem [shape: bf16[128,100], index: 10, kind: input, shape index: {}]   ;;  %s7037_s11 = inlined_call_operand.vmem [shape: f32[1,100], index: 11, kind: input, shape index: {}]   ;;  %s7038_s12 = inlined_call_operand.hbm [shape: f32[2,1,100], index: 12, kind: output, shape index: {}]  }
   0x1   :  { %7039 = sst [smem:[#allocation7_spill]] %s7026_s0 }
   0x2   :  { %7040 = sst [smem:[#allocation8_spill]] %s7027_s1 }
   0x3   :  { %7041 = sst [smem:[#allocation9_spill]] %s7028_s2 }
   0x4   :  { %17 = vsyncpa [#allocation5], 0 }
   0x5   :  { %19 = vsyncpa [#allocation5 + $0x1], 0  ;;  %s5439_s21 = smov 0   ;;  %s5441_s22 = smov 0  }
   0x6   :  { %s5443_s23 = smov 0   ;;  %s5445_s24 = smov 0  }
   0x7 LB: > { %s5460_s25 = sadd.s32 4294967295, %s5367_s24   ;;  %s4810_s26 = sadd.s32 4294967294, %s5367_s24   ;;  %s5367_s24 = sphi %s5445_s24, %s7056_s24   ;;  %s5363_s23 = sphi %s5443_s23, %s7055_s23   ;;  %s5359_s22 = sphi %s5441_s22, %s7054_s22   ;;  %s5355_s21 = sphi %s5439_s21, %s7053_s21  }
   0x8   : > { %s5464_s27 = sadd.s32 1, %s5367_s24   ;;  %s289_s28 = sadd.s32 1, %s5363_s23 }
   0x9   : > { %s286_s29 = ssub.s32 %s5367_s24, %s5464_s27  ;;  %p299_p0 = scmp.ne.s32.totalorder %s5363_s23, %s5359_s22 }
   0xa   : > { %p287_p1 = scmp.eq.s32.totalorder %s286_s29, 0  ;;  %p300_p2 = scmp.eq.s32.totalorder %s5460_s25, 1 }
   0xb   : > { %p305_p3 = scmp.ne.s32.totalorder %s5359_s22, %s5355_s21  ;;  %p306_p4 = scmp.eq.s32.totalorder %s4810_s26, 1 }
   0xc   : > { %s5475_s30 = scalar_select %p287_p1, %s5363_s23, %s289_s28  }
   0xd   : > { %p5477_p5 = por %p300_p2, %p299_p0  ;;  %p5481_p6 = por %p306_p4, %p305_p3 }
   0xe   : > { %p4813_p7 = scmp.ge.s32.totalorder %s5367_s24, 1  ;;  %p365_p8 = scmp.lt.s32.totalorder %s5367_s24, 3 }
  0x10   : > { %p366_p9 = pnand %p4813_p7, %p365_p8 }
  0x11   : > { %s7044_s1 = sld [smem:[#allocation8_spill]] (!%p366_p9)  ;;  %p406_p10 = scmp.lt.s32.totalorder (!%p366_p9), %s5460_s25, 1 }
  0x12   : > { %369 = sbr.rel (%p366_p9) target bundleno = 1419 (0x58b), region = 68  ;;  %s7045_s0 = sld [smem:[#allocation7_spill]] (!%p366_p9) }
  0x13   : > { %s7046_s2 = sld [smem:[#allocation9_spill]] (!%p366_p9)  ;;  %s5372_s18 = smov (!%p366_p9), 64  }
  0x14   : > { %s4751_s28 = scalar_lea.hbm (!%p366_p9), %s7038_s12, %s5460_s25  ;;  %s5325_s26 = scalar_lea.hbm (!%p366_p9), %s7038_s12, 2 }
  0x15   : > { %s4755_s19 = sshll.u32 (!%p366_p9), %s4751_s28, 4  ;;  %s4756_s19 = int_to_ptr.hbm [resolvable:$true] %s4755_s19 }
  0x17   : > { %v477_v0 = vld [vmem:[%s7044_s1 + $0x10] sm:$0x3]  ;;  %vm622_vm0 = vcmask 1041408   ;;  %s407_s17 = scalar_select %p406_p10, %s5460_s25, 1  ;;  %v5177_v4 = vld [vmem:[%s7044_s1 + $0x8] sm:$0xff]  ;;  %v5176_v5 = vld [vmem:[%s7044_s1] sm:$0xff] }
  0x18   : > { %v567_v1 = vunpack.c.l.b16 %v477_v0  ;;  %vm573_vm1 = vcmask 293888   ;;  %v5540_v21 = vld [vmem:[%s7029_s3] ss:$0 sm:$0xff]  ;;  %vm1043_vm2 = vcmask 254976   ;;  %vm1940_vm3 = vcmask 261120   ;;  %s5319_s1 = sshra.s32 %s4756_s19, 4  ;;  %s5320_s1 = int_to_ptr.hbm [resolvable:$true] %s5319_s1 }
  0x19   : > { %s5159_s20 = sshll.u32 %s407_s17, 7  ;;  %v5535_v20 = vld [vmem:[%s7046_s2] ss:$0 sm:$0xff]  ;;  %vm2325_vm4 = vcmask 1042434   ;;  %vm2327_vm5 = vcmask 1043459   ;;  %vm2329_vm6 = vcmask 1044484   ;;  %p5326_p0 = scmp.lt.s32.totalorder %s5320_s1, %s7038_s12 }
  0x1a   : > { %v570_v2 = vpack.c.b16 %v567_v1, %v567_v1  ;;  %s5502_s16 = scalar_lea.vmem %s7045_s0, %s5159_s20  ;;  %vm412_vm7 = vcmask 257024   ;;  %vm414_vm8 = vcmask 253952   ;;  %vm2331_vm9 = vcmask 1045509   ;;  %s5371_s17 = smov 96  }
  0x1b   : > { %v5160_v6 = vld [vmem:[%s5502_s16] sm:$0xff]  ;;  %v5170_v7 = vld [vmem:[%s5502_s16 + $0x50] sm:$0xff]  ;;  %v5173_v8 = vld [vmem:[%s5502_s16 + $0x68] sm:$0xff]  ;;  %vm2333_vm10 = vcmask 1046534   ;;  %vm2413_vm11 = vsmask.f32 7938 }
  0x1c   : > { %v624_v3 = vsel %vm622_vm0, %v570_v2, 0  ;;  %v5161_v9 = vld [vmem:[%s5502_s16 + $0x8] sm:$0xff]  ;;  %v5171_v10 = vld [vmem:[%s5502_s16 + $0x58] sm:$0xff]  ;;  %v5162_v11 = vld [vmem:[%s5502_s16 + $0x10] sm:$0xff]  ;;  %vm2335_vm12 = vcmask 1047559   ;;  %s404_s0 = sand.u32 1, %s5359_s22  }
  0x1d   : > { %631 = vmatpush.bf16.msra.mxu0 %v624_v3  ;;  %5240 = vmatpush.bf16.msra.mxu1 %v624_v3  ;;  %v5172_v12 = vld [vmem:[%s5502_s16 + $0x60] sm:$0xff]  ;;  %v5163_v13 = vld [vmem:[%s5502_s16 + $0x18] sm:$0xff]  ;;  %v5174_v15 = vld [vmem:[%s5502_s16 + $0x70] sm:$0xff]  ;;  %vm2419_vm13 = vsmask.f32 256  ;;  %s405_s29 = scalar_lea.vmem [#allocation4], %s404_s0 }
  0x1e   : > { %5241 = vmatpush.bf16.msra.mxu3 %v624_v3  ;;  %v5164_v14 = vld [vmem:[%s5502_s16 + $0x20] sm:$0xff]  ;;  %v5165_v16 = vld [vmem:[%s5502_s16 + $0x28] sm:$0xff]  ;;  %v5175_v17 = vld [vmem:[%s5502_s16 + $0x78] sm:$0xff]  ;;  %s4753_s15 = sshll.u32 %s405_s29, 4  ;;  %s4754_s15 = int_to_ptr.vmem [resolvable:$true] %s4753_s15 }
  0x1f   : > { %v5166_v18 = vld [vmem:[%s5502_s16 + $0x30] sm:$0xff]  ;;  %v5167_v19 = vld [vmem:[%s5502_s16 + $0x38] sm:$0xff]  ;;  %v5168_v22 = vld [vmem:[%s5502_s16 + $0x40] sm:$0xff] }
  0x20   : > { %vm5745_vm14 = vmand %vm412_vm7, %vm2413_vm11 }
  0x21   : > { %632 = vmatpush.bf16.msra.mxu0 %v5177_v4  ;;  %5242 = vmatpush.bf16.msra.mxu1 %v5177_v4  ;;  %vm5752_vm15 = vmand %vm414_vm8, %vm2419_vm13 }
  0x22   : > { %5243 = vmatpush.bf16.msra.mxu3 %v5177_v4 }
  0x25   : > { %633 = vmatpush.bf16.msra.mxu0 %v5176_v5  ;;  %5244 = vmatpush.bf16.msra.mxu1 %v5176_v5 }
  0x26   : > { %5245 = vmatpush.bf16.msra.mxu3 %v5176_v5  ;;  %v5169_v5 = vld [vmem:[%s5502_s16 + $0x48] sm:$0xff]  ;;  %s5370_s16 = smov 32  }
  0x28   : > { %4888 = vmatmul.msk.bf16.vlgmr.msra.gmra.mxu0 %vm573_vm1, %v5160_v6  ;;  %4898 = vmatmul.msk.bf16.vlgmr.msra.gmra.mxu1 %vm573_vm1, %v5170_v7 }
  0x29   : > { %4901 = vmatmul.msk.bf16.vlgmr.msra.gmra.mxu3 %vm573_vm1, %v5173_v8 }
  0x38   : > { %4889 = vmatmul.msk.bf16.gmra.mxu0 %vm573_vm1, %v5161_v9  ;;  %4899 = vmatmul.msk.bf16.gmra.mxu1 %vm573_vm1, %v5171_v10 }
  0x39   : > { %4902 = vmatmul.msk.bf16.gmra.mxu3 %vm573_vm1, %v5174_v15 }
  0x48   : > { %4890 = vmatmul.msk.bf16.gmra.mxu0 %vm573_vm1, %v5162_v11  ;;  %4900 = vmatmul.msk.bf16.gmra.mxu1 %vm573_vm1, %v5172_v12 }
  0x49   : > { %4903 = vmatmul.msk.bf16.gmra.mxu3 %vm573_vm1, %v5175_v17 }
  0x58   : > { %4891 = vmatmul.msk.bf16.gmra.mxu0 %vm573_vm1, %v5163_v13 }
  0x68   : > { %4892 = vmatmul.msk.bf16.gmra.mxu0 %vm573_vm1, %v5164_v14 }
  0x78   : > { %4893 = vmatmul.msk.bf16.gmra.mxu0 %vm573_vm1, %v5165_v16 }
  0x88   : > { %4894 = vmatmul.msk.bf16.gmra.mxu0 %vm573_vm1, %v5166_v18 }
  0x98   : > { %4895 = vmatmul.msk.bf16.gmra.mxu0 %vm573_vm1, %v5167_v19 }
  0xa5   : > { %v635_v23 = vpop.f32.mrf.mxu0  ;;  %v685_v24 = vpop.f32.mrf.mxu1 }
  0xa6   : > { %v719_v25 = vmul.f32 %v5535_v20, %v635_v23  ;;  %v739_v26 = vmul.f32 %v5535_v20, %v685_v24 }
  0xa8   : > { %v755_v27 = vadd.f32 %v5540_v21, %v719_v25  ;;  %v775_v28 = vadd.f32 %v5540_v21, %v739_v26  ;;  %4896 = vmatmul.msk.bf16.gmra.mxu0 %vm573_vm1, %v5168_v22 }
  0xaa   : > { %v787_v29 = vmax.f32 %v755_v27, 0.0  ;;  %v807_v30 = vmax.f32 %v775_v28, 0.0 }
  0xac   : > { %v851_v31 = vrot.slane %v787_v29, 2  ;;  %v852_v32 = vrot.slane %v787_v29, 4  ;;  %v853_v33 = vrot.slane %v787_v29, 6  ;;  %v1044_v34 = vsel %vm1043_vm2, %v787_v29, -inf }
  0xad   : > { %v1045_v35 = vrot.slane %v1044_v34, 4  ;;  %v911_v36 = vrot.slane %v807_v30, 2  ;;  %v912_v37 = vrot.slane %v807_v30, 4  ;;  %v913_v38 = vrot.slane %v807_v30, 6  ;;  %v637_v39 = vpop.f32.mrf.mxu0  ;;  %v687_v0 = vpop.f32.mrf.mxu1 }
  0xae   : > { %v1051_v40 = vsel %vm1043_vm2, %v851_v31, -inf  ;;  %v1058_v41 = vsel %vm1043_vm2, %v852_v32, -inf  ;;  %v1065_v42 = vsel %vm1043_vm2, %v853_v33, -inf  ;;  %v1604_v43 = vsel %vm1043_vm2, %v807_v30, -inf }
  0xaf   : > { %v1046_v44 = vmax.f32 %v1044_v34, %v1045_v35  ;;  %v1052_v45 = vrot.slane %v1051_v40, 4  ;;  %v1059_v46 = vrot.slane %v1058_v41, 4  ;;  %v1066_v47 = vrot.slane %v1065_v42, 4 }
  0xb0   : > { %v1605_v48 = vrot.slane %v1604_v43, 4  ;;  %v1611_v49 = vsel %vm1043_vm2, %v911_v36, -inf  ;;  %v1618_v50 = vsel %vm1043_vm2, %v912_v37, -inf  ;;  %v1625_v51 = vsel %vm1043_vm2, %v913_v38, -inf }
  0xb1   : > { %v1047_v52 = vrot.slane %v1046_v44, 2  ;;  %v1053_v53 = vmax.f32 %v1051_v40, %v1052_v45  ;;  %v1060_v54 = vmax.f32 %v1058_v41, %v1059_v46  ;;  %v1067_v55 = vmax.f32 %v1065_v42, %v1066_v47 }
  0xb2   : > { %v1606_v56 = vmax.f32 %v1604_v43, %v1605_v48  ;;  %v1612_v57 = vrot.slane %v1611_v49, 4  ;;  %v1619_v58 = vrot.slane %v1618_v50, 4  ;;  %v1626_v59 = vrot.slane %v1625_v51, 4 }
  0xb3   : > { %v1048_v60 = vmax.f32 %v1046_v44, %v1047_v52  ;;  %v1054_v61 = vrot.slane %v1053_v53, 2  ;;  %v1061_v62 = vrot.slane %v1060_v54, 2  ;;  %v1068_v63 = vrot.slane %v1067_v55, 2 }
  0xb4   : > { %v1607_v1 = vrot.slane %v1606_v56, 2  ;;  %v1613_v2 = vmax.f32 %v1611_v49, %v1612_v57  ;;  %v1620_v3 = vmax.f32 %v1618_v50, %v1619_v58  ;;  %v1627_v4 = vmax.f32 %v1625_v51, %v1626_v59 }
  0xb5   : > { %v1049_v6 = vrot.slane %v1048_v60, 1  ;;  %v1055_v7 = vmax.f32 %v1053_v53, %v1054_v61  ;;  %v1062_v8 = vmax.f32 %v1060_v54, %v1061_v62  ;;  %v1069_v9 = vmax.f32 %v1067_v55, %v1068_v63  ;;  %v640_v10 = vpop.f32.mrf.mxu0  ;;  %v690_v36 = vpop.f32.mrf.mxu1 }
  0xb6   : > { %v1608_v11 = vmax.f32 %v1606_v56, %v1607_v1  ;;  %v1614_v12 = vrot.slane %v1613_v2, 2  ;;  %v1621_v13 = vrot.slane %v1620_v3, 2  ;;  %v1628_v14 = vrot.slane %v1627_v4, 2 }
  0xb7   : > { %v1056_v15 = vrot.slane %v1055_v7, 1  ;;  %v1063_v16 = vrot.slane %v1062_v8, 1  ;;  %v1070_v17 = vrot.slane %v1069_v9, 1  ;;  %v1050_v24 = vmax.f32 %v1048_v60, %v1049_v6 }
  0xb8   : > { %v1609_v18 = vrot.slane %v1608_v11, 1  ;;  %v1615_v19 = vmax.f32 %v1613_v2, %v1614_v12  ;;  %v1622_v22 = vmax.f32 %v1620_v3, %v1621_v13  ;;  %v1629_v23 = vmax.f32 %v1627_v4, %v1628_v14  ;;  %4897 = vmatmul.msk.bf16.gmra.mxu0 %vm573_vm1, %v5169_v5 }
  0xb9   : > { %v1057_v25 = vmax.f32 %v1055_v7, %v1056_v15  ;;  %v1064_v26 = vmax.f32 %v1062_v8, %v1063_v16  ;;  %v1071_v27 = vmax.f32 %v1069_v9, %v1070_v17  ;;  %v720_v28 = vmul.f32 %v5535_v20, %v637_v39 }
  0xba   : > { %v1610_v29 = vmax.f32 %v1608_v11, %v1609_v18  ;;  %v1616_v30 = vrot.slane %v1615_v19, 1  ;;  %v1623_v31 = vrot.slane %v1622_v22, 1  ;;  %v1630_v32 = vrot.slane %v1629_v23, 1 }
  0xbb   : > { %v5560_v33 = vsel %vm1940_vm3, %v1050_v24, -inf  ;;  %v756_v34 = vadd.f32 %v5540_v21, %v720_v28  ;;  %v740_v35 = vmul.f32 %v5535_v20, %v687_v0  ;;  %v5565_v38 = vsel %vm1940_vm3, %v1057_v25, -inf }
  0xbc   : > { %v5568_v40 = vsel %vm1940_vm3, %v1064_v26, -inf  ;;  %v721_v39 = vmul.f32 %v5535_v20, %v640_v10  ;;  %v741_v41 = vmul.f32 %v5535_v20, %v690_v36  ;;  %v5573_v42 = vsel %vm1940_vm3, %v1071_v27, -inf }
  0xbd   : > { %v642_v37 = vpop.f32.mrf.mxu0  ;;  %v788_v43 = vmax.f32 %v756_v34, 0.0  ;;  %v776_v44 = vadd.f32 %v5540_v21, %v740_v35  ;;  %v1617_v46 = vmax.f32 %v1615_v19, %v1616_v30  ;;  %v1624_v47 = vmax.f32 %v1622_v22, %v1623_v31 }
  0xbe   : > { %v722_v45 = vmul.f32 %v5535_v20, %v642_v37  ;;  %v1631_v48 = vmax.f32 %v1629_v23, %v1630_v32  ;;  %v5578_v49 = vsel %vm1940_vm3, %v1610_v29, -inf  ;;  %v757_v56 = vadd.f32 %v5540_v21, %v721_v39 }
  0xbf   : > { %v854_v50 = vrot.slane %v788_v43, 2  ;;  %v855_v51 = vrot.slane %v788_v43, 4  ;;  %v856_v52 = vrot.slane %v788_v43, 6  ;;  %v1072_v53 = vsel %vm1043_vm2, %v788_v43, -inf }
  0xc0   : > { %v1073_v54 = vrot.slane %v1072_v53, 4  ;;  %v808_v55 = vmax.f32 %v776_v44, 0.0  ;;  %v777_v57 = vadd.f32 %v5540_v21, %v741_v41  ;;  %v758_v61 = vadd.f32 %v5540_v21, %v722_v45 }
  0xc1   : > { %v1079_v58 = vsel %vm1043_vm2, %v854_v50, -inf  ;;  %v1086_v59 = vsel %vm1043_vm2, %v855_v51, -inf  ;;  %v1093_v60 = vsel %vm1043_vm2, %v856_v52, -inf  ;;  %v789_v36 = vmax.f32 %v757_v56, 0.0 }
  0xc2   : > { %v1074_v62 = vmax.f32 %v1072_v53, %v1073_v54  ;;  %v1080_v63 = vrot.slane %v1079_v58, 4  ;;  %v1087_v0 = vrot.slane %v1086_v59, 4  ;;  %v1094_v1 = vrot.slane %v1093_v60, 4 }
  0xc3   : > { %v914_v2 = vrot.slane %v808_v55, 2  ;;  %v915_v3 = vrot.slane %v808_v55, 4  ;;  %v916_v4 = vrot.slane %v808_v55, 6  ;;  %v1632_v5 = vsel %vm1043_vm2, %v808_v55, -inf }
  0xc4   : > { %v1075_v6 = vrot.slane %v1074_v62, 2  ;;  %v1081_v7 = vmax.f32 %v1079_v58, %v1080_v63  ;;  %v1088_v8 = vmax.f32 %v1086_v59, %v1087_v0  ;;  %v1095_v9 = vmax.f32 %v1093_v60, %v1094_v1 }
  0xc5   : > { %v1633_v10 = vrot.slane %v1632_v5, 4  ;;  %v1639_v11 = vsel %vm1043_vm2, %v914_v2, -inf  ;;  %v1646_v12 = vsel %vm1043_vm2, %v915_v3, -inf  ;;  %v1653_v13 = vsel %vm1043_vm2, %v916_v4, -inf }
  0xc6   : > { %v1076_v14 = vmax.f32 %v1074_v62, %v1075_v6  ;;  %v1082_v15 = vrot.slane %v1081_v7, 2  ;;  %v1089_v16 = vrot.slane %v1088_v8, 2  ;;  %v1096_v17 = vrot.slane %v1095_v9, 2 }
  0xc7   : > { %v1634_v18 = vmax.f32 %v1632_v5, %v1633_v10  ;;  %v1640_v19 = vrot.slane %v1639_v11, 4  ;;  %v1647_v22 = vrot.slane %v1646_v12, 4  ;;  %v1654_v23 = vrot.slane %v1653_v13, 4 }
  0xc8   : > { %v1077_v24 = vrot.slane %v1076_v14, 1  ;;  %v1083_v25 = vmax.f32 %v1081_v7, %v1082_v15  ;;  %v1090_v26 = vmax.f32 %v1088_v8, %v1089_v16  ;;  %v1097_v27 = vmax.f32 %v1095_v9, %v1096_v17 }
  0xc9   : > { %v1635_v28 = vrot.slane %v1634_v18, 2  ;;  %v1641_v29 = vmax.f32 %v1639_v11, %v1640_v19  ;;  %v1648_v30 = vmax.f32 %v1646_v12, %v1647_v22  ;;  %v1655_v31 = vmax.f32 %v1653_v13, %v1654_v23 }
  0xca   : > { %v1084_v32 = vrot.slane %v1083_v25, 1  ;;  %v1091_v34 = vrot.slane %v1090_v26, 1  ;;  %v1098_v35 = vrot.slane %v1097_v27, 1  ;;  %v5592_v44 = vsel %vm1940_vm3, %v1617_v46, -inf }
  0xcb   : > { %v1636_v37 = vmax.f32 %v1634_v18, %v1635_v28  ;;  %v1642_v39 = vrot.slane %v1641_v29, 2  ;;  %v1649_v41 = vrot.slane %v1648_v30, 2  ;;  %v1656_v43 = vrot.slane %v1655_v31, 2 }
  0xcc   : > { %v5595_v45 = vsel %vm1940_vm3, %v1624_v47, -inf  ;;  %v1078_v50 = vmax.f32 %v1076_v14, %v1077_v24  ;;  %v1085_v51 = vmax.f32 %v1083_v25, %v1084_v32  ;;  %v5598_v58 = vsel %vm1940_vm3, %v1631_v48, -inf }
  0xcd   : > { %v1637_v52 = vrot.slane %v1636_v37, 1  ;;  %v1643_v53 = vmax.f32 %v1641_v29, %v1642_v39  ;;  %v1650_v54 = vmax.f32 %v1648_v30, %v1649_v41  ;;  %v1657_v55 = vmax.f32 %v1655_v31, %v1656_v43 }
  0xce   : > { %v857_v56 = vrot.slane %v789_v36, 2  ;;  %v809_v59 = vmax.f32 %v777_v57, 0.0  ;;  %v5600_v60 = vmax.f32 %v758_v61, 0.0  ;;  %v1092_v62 = vmax.f32 %v1090_v26, %v1091_v34 }
  0xcf   : > { %v1099_v63 = vmax.f32 %v1097_v27, %v1098_v35  ;;  %v1644_v46 = vrot.slane %v1643_v53, 1  ;;  %v1651_v0 = vrot.slane %v1650_v54, 1  ;;  %v858_v1 = vrot.slane %v789_v36, 4 }
  0xd0   : > { %v859_v47 = vrot.slane %v789_v36, 6  ;;  %v1100_v2 = vsel %vm1043_vm2, %v789_v36, -inf  ;;  %v1107_v3 = vsel %vm1043_vm2, %v857_v56, -inf  ;;  %v5605_v4 = vsel %vm1940_vm3, %v1078_v50, -inf }
  0xd1   : > { %v5608_v48 = vsel %vm1940_vm3, %v1085_v51, -inf  ;;  %v1638_v5 = vmax.f32 %v1636_v37, %v1637_v52  ;;  %v1658_v57 = vrot.slane %v1657_v55, 1  ;;  %v1101_v61 = vrot.slane %v1100_v2, 4 }
  0xd2   : > { %v1108_v6 = vrot.slane %v1107_v3, 4  ;;  %v1114_v7 = vsel %vm1043_vm2, %v858_v1, -inf  ;;  %v1121_v8 = vsel %vm1043_vm2, %v859_v47, -inf  ;;  %v5613_v9 = vsel %vm1940_vm3, %v1092_v62, -inf }
  0xd3   : > { %v5616_v10 = vsel %vm1940_vm3, %v1099_v63, -inf  ;;  %v1645_v11 = vmax.f32 %v1643_v53, %v1644_v46  ;;  %v1115_v12 = vrot.slane %v1114_v7, 4  ;;  %v5618_v13 = vmax.f32 %v1650_v54, %v1651_v0 }
  0xd4   : > { %v1102_v14 = vmax.f32 %v1100_v2, %v1101_v61  ;;  %v1109_v15 = vmax.f32 %v1107_v3, %v1108_v6  ;;  %v1122_v16 = vrot.slane %v1121_v8, 4  ;;  %v5620_v17 = vmax.f32 %v1657_v55, %v1658_v57 }
  0xd5   : > { %v5623_v18 = vsel %vm1940_vm3, %v1638_v5, -inf  ;;  %v1116_v19 = vmax.f32 %v1114_v7, %v1115_v12  ;;  %v917_v22 = vrot.slane %v809_v59, 2  ;;  %v918_v26 = vrot.slane %v809_v59, 4 }
  0xd6   : > { %v1103_v23 = vrot.slane %v1102_v14, 2  ;;  %v1110_v24 = vrot.slane %v1109_v15, 2  ;;  %v1123_v25 = vmax.f32 %v1121_v8, %v1122_v16  ;;  %v919_v28 = vrot.slane %v809_v59, 6 }
  0xd7   : > { %v1117_v27 = vrot.slane %v1116_v19, 2  ;;  %v1660_v29 = vsel %vm1043_vm2, %v809_v59, -inf  ;;  %v1667_v30 = vsel %vm1043_vm2, %v917_v22, -inf  ;;  %v1674_v39 = vsel %vm1043_vm2, %v918_v26, -inf }
  0xd8   : > { %v1104_v31 = vmax.f32 %v1102_v14, %v1103_v23  ;;  %v1111_v32 = vmax.f32 %v1109_v15, %v1110_v24  ;;  %v1124_v34 = vrot.slane %v1123_v25, 2  ;;  %v1661_v35 = vrot.slane %v1660_v29, 4 }
  0xd9   : > { %v1118_v36 = vmax.f32 %v1116_v19, %v1117_v27  ;;  %v1668_v37 = vrot.slane %v1667_v30, 4  ;;  %v1681_v41 = vsel %vm1043_vm2, %v919_v28, -inf  ;;  %v1675_v55 = vrot.slane %v1674_v39, 4 }
  0xda   : > { %v1105_v43 = vrot.slane %v1104_v31, 1  ;;  %v1112_v50 = vrot.slane %v1111_v32, 1  ;;  %v1125_v51 = vmax.f32 %v1123_v25, %v1124_v34  ;;  %v1662_v52 = vmax.f32 %v1660_v29, %v1661_v35 }
  0xdb   : > { %v1119_v53 = vrot.slane %v1118_v36, 1  ;;  %v1669_v54 = vmax.f32 %v1667_v30, %v1668_v37  ;;  %v1682_v56 = vrot.slane %v1681_v41, 4  ;;  %v1676_v47 = vmax.f32 %v1674_v39, %v1675_v55 }
  0xdc   : > { %v1106_v59 = vmax.f32 %v1104_v31, %v1105_v43  ;;  %v1113_v62 = vmax.f32 %v1111_v32, %v1112_v50  ;;  %v1126_v63 = vrot.slane %v1125_v51, 1  ;;  %v1663_v46 = vrot.slane %v1662_v52, 2 }
  0xdd   : > { %v1120_v0 = vmax.f32 %v1118_v36, %v1119_v53  ;;  %v1670_v1 = vrot.slane %v1669_v54, 2  ;;  %v1683_v2 = vmax.f32 %v1681_v41, %v1682_v56  ;;  %v1677_v19 = vrot.slane %v1676_v47, 2 }
  0xde   : > { %v1127_v3 = vmax.f32 %v1125_v51, %v1126_v63  ;;  %v1942_v5 = vsel %vm1940_vm3, %v1106_v59, -inf  ;;  %v1945_v57 = vsel %vm1940_vm3, %v1113_v62, -inf  ;;  %v1664_v61 = vmax.f32 %v1662_v52, %v1663_v46 }
  0xdf   : > { %v1943_v6 = vmax.f32 %v5560_v33, %v1942_v5  ;;  %v1946_v7 = vmax.f32 %v5565_v38, %v1945_v57  ;;  %v1948_v8 = vsel %vm1940_vm3, %v1120_v0, -inf  ;;  %v1671_v12 = vmax.f32 %v1669_v54, %v1670_v1 }
  0xe0   : > { %v1949_v14 = vmax.f32 %v5568_v40, %v1948_v8  ;;  %v1951_v15 = vsel %vm1940_vm3, %v1127_v3, -inf  ;;  %v1665_v16 = vrot.slane %v1664_v61, 1  ;;  %v1678_v28 = vmax.f32 %v1676_v47, %v1677_v19 }
  0xe1   : > { %v1952_v22 = vmax.f32 %v5573_v42, %v1951_v15  ;;  %v2133_v23 = vpack.c.bf16 %v1943_v6, %v1943_v6  ;;  %v2134_v24 = vpack.c.bf16 %v1946_v7, %v1946_v7  ;;  %v1672_v25 = vrot.slane %v1671_v12, 1 }
  0xe2   : > { %v2135_v26 = vpack.c.bf16 %v1949_v14, %v1949_v14  ;;  %v1666_v27 = vmax.f32 %v1664_v61, %v1665_v16  ;;  %v1684_v33 = vrot.slane %v1683_v2, 2  ;;  %v5638_v38 = vsel %vm1940_vm3, %v1645_v11, -inf }
  0xe3   : > { %v2262_v29 = vunpack.c.l.b16 %v2134_v24  ;;  %v1673_v30 = vmax.f32 %v1671_v12, %v1672_v25  ;;  %v1679_v40 = vrot.slane %v1678_v28, 1  ;;  %v2136_v34 = vpack.c.bf16 %v1952_v22, %v1952_v22  ;;  %v645_v24 = vpop.f32.mrf.mxu0 }
  0xe4   : > { %v1685_v31 = vmax.f32 %v1683_v2, %v1684_v33  ;;  %v2062_v32 = vsel %vm1940_vm3, %v1666_v27, -inf  ;;  %v2261_v42 = vunpack.c.l.b16 %v2133_v23  ;;  %v2263_v37 = vunpack.c.l.b16 %v2135_v26 }
  0xe5   : > { %v2063_v35 = vmax.f32 %v5578_v49, %v2062_v32  ;;  %v2065_v36 = vsel %vm1940_vm3, %v1673_v30, -inf  ;;  %v1680_v39 = vmax.f32 %v1678_v28, %v1679_v40  ;;  %v5369_v54 = vmov 0   ;;  %v692_v49 = vpop.f32.mrf.mxu1 }
  0xe6   : > { %v1686_v41 = vrot.slane %v1685_v31, 1  ;;  %v2066_v11 = vmax.f32 %v5592_v44, %v2065_v36  ;;  %v2326_v43 = vsel %vm2325_vm4, %v2262_v29, %v2261_v42  ;;  %416 = vst.msk [vmem:[#allocation2 + $0x8] sm:$0xf] %vm412_vm7, %v5369_v54  ;;  %v860_v44 = vrot.slane %v5600_v60, 2  ;;  %v700_v42 = vpop.f32.mrf.mxu3 }
  0xe7   : > { %v2173_v50 = vpack.c.bf16 %v2063_v35, %v2063_v35  ;;  %v2068_v52 = vsel %vm1940_vm3, %v1680_v39, -inf  ;;  %417 = vst.msk [vmem:[#allocation2 + $0xc] sm:$0x1] %vm414_vm8, %v5369_v54  ;;  %v861_v59 = vrot.slane %v5600_v60, 4  ;;  %v862_v46 = vrot.slane %v5600_v60, 6 }
  0xe8   : > { %v1687_v51 = vmax.f32 %v1685_v31, %v1686_v41  ;;  %v2174_v53 = vpack.c.bf16 %v2066_v11, %v2066_v11  ;;  %v2069_v55 = vmax.f32 %v5595_v45, %v2068_v52  ;;  %v1128_v0 = vsel %vm1043_vm2, %v5600_v60, -inf  ;;  %413 = vst.msk [vmem:[#allocation2] sm:$0xf] %vm412_vm7, %v5369_v54 }
  0xe9   : > { %v2301_v56 = vunpack.c.l.b16 %v2173_v50  ;;  %v1129_v47 = vrot.slane %v1128_v0, 4  ;;  %v1135_v2 = vsel %vm1043_vm2, %v860_v44, -inf  ;;  %415 = vst.msk [vmem:[#allocation2 + $0x4] sm:$0x1] %vm414_vm8, %v5369_v54  ;;  %v1142_v57 = vsel %vm1043_vm2, %v861_v59, -inf }
  0xea   : > { %v2071_v62 = vsel %vm1940_vm3, %v1687_v51, -inf  ;;  %v2302_v63 = vunpack.c.l.b16 %v2174_v53  ;;  %v2175_v1 = vpack.c.bf16 %v2069_v55, %v2069_v55  ;;  %v1136_v5 = vrot.slane %v1135_v2, 4  ;;  %418 = vst.msk [vmem:[#allocation2 + $0x10] sm:$0xf] %vm412_vm7, %v5369_v54 }
  0xeb   : > { %v2072_v45 = vmax.f32 %v5598_v58, %v2071_v62  ;;  %v1149_v61 = vsel %vm1043_vm2, %v862_v46, -inf  ;;  %v1130_v58 = vmax.f32 %v1128_v0, %v1129_v47  ;;  %v1143_v7 = vrot.slane %v1142_v57, 4  ;;  %419 = vst.msk [vmem:[#allocation2 + $0x14] sm:$0x1] %vm414_vm8, %v5369_v54 }
  0xec   : > { %v2361_v3 = vsel %vm2325_vm4, %v2302_v63, %v2301_v56  ;;  %v2303_v6 = vunpack.c.l.b16 %v2175_v1  ;;  %v2264_v8 = vunpack.c.l.b16 %v2136_v34  ;;  %v2328_v12 = vsel %vm2327_vm5, %v2263_v37, %v2326_v43  ;;  %420 = vst.msk [vmem:[#allocation2 + $0x18] sm:$0xf] %vm412_vm7, %v5369_v54 }
  0xed   : > { %v2176_v60 = vpack.c.bf16 %v2072_v45, %v2072_v45  ;;  %v1137_v14 = vmax.f32 %v1135_v2, %v1136_v5  ;;  %v1150_v15 = vrot.slane %v1149_v61, 4  ;;  %v1131_v22 = vrot.slane %v1130_v58, 2  ;;  %421 = vst.msk [vmem:[#allocation2 + $0x1c] sm:$0x1] %vm414_vm8, %v5369_v54  ;;  %v695_v34 = vpop.f32.mrf.mxu1 }
  0xee   : > { %v2362_v19 = vsel %vm2327_vm5, %v2303_v6, %v2361_v3  ;;  %v1144_v23 = vmax.f32 %v1142_v57, %v1143_v7  ;;  %v5678_v25 = vsel %vm1940_vm3, %v5618_v13, -inf  ;;  %v5682_v26 = vsel %vm1940_vm3, %v5620_v17, -inf  ;;  %422 = vst.msk [vmem:[#allocation2 + $0x20] sm:$0xf] %vm412_vm7, %v5369_v54 }
  0xef   : > { %v2304_v16 = vunpack.c.l.b16 %v2176_v60  ;;  %v1138_v27 = vrot.slane %v1137_v14, 2  ;;  %v1151_v28 = vmax.f32 %v1149_v61, %v1150_v15  ;;  %v5685_v33 = vsel %vm2329_vm6, %v2264_v8, %v2328_v12  ;;  %423 = vst.msk [vmem:[#allocation2 + $0x24] sm:$0x1] %vm414_vm8, %v5369_v54 }
  0xf0   : > { %v1132_v30 = vmax.f32 %v1130_v58, %v1131_v22  ;;  %v1145_v40 = vrot.slane %v1144_v23, 2  ;;  %v742_v17 = vmul.f32 %v5535_v20, %v692_v49  ;;  %v723_v32 = vmul.f32 %v5535_v20, %v645_v24  ;;  %424 = vst.msk [vmem:[#allocation2 + $0x28] sm:$0xf] %vm412_vm7, %v5369_v54 }
  0xf1   : > { %v5688_v29 = vsel %vm2329_vm6, %v2304_v16, %v2362_v19  ;;  %v1139_v31 = vmax.f32 %v1137_v14, %v1138_v27  ;;  %v1152_v13 = vrot.slane %v1151_v28, 2  ;;  %v743_v37 = vmul.f32 %v5535_v20, %v695_v34  ;;  %425 = vst.msk [vmem:[#allocation2 + $0x2c] sm:$0x1] %vm414_vm8, %v5369_v54  ;;  %v2421_v34 = vld [vmem:[#allocation2 + $0xc] sm:$0x1] }
  0xf2   : > { %v1133_v35 = vrot.slane %v1132_v30, 1  ;;  %v1146_v36 = vmax.f32 %v1144_v23, %v1145_v40  ;;  %v745_v39 = vmul.f32 %v5535_v20, %v700_v42  ;;  %v778_v43 = vadd.f32 %v5540_v21, %v742_v17  ;;  %426 = vst.msk [vmem:[#allocation2 + $0x30] sm:$0xf] %vm412_vm7, %v5369_v54  ;;  %v5178_v40 = vld [vmem:[%s7030_s4] sm:$0xff] }
  0xf3   : > { %v1140_v41 = vrot.slane %v1139_v31, 1  ;;  %v1153_v11 = vmax.f32 %v1151_v28, %v1152_v13  ;;  %v759_v50 = vadd.f32 %v5540_v21, %v723_v32  ;;  %v779_v20 = vadd.f32 %v5540_v21, %v743_v37  ;;  %427 = vst.msk [vmem:[#allocation2 + $0x34] sm:$0x1] %vm414_vm8, %v5369_v54 }
  0xf4   : > { %v1134_v51 = vmax.f32 %v1132_v30, %v1133_v35  ;;  %v1147_v52 = vrot.slane %v1146_v36, 1  ;;  %v781_v53 = vadd.f32 %v5540_v21, %v745_v39  ;;  %v810_v56 = vmax.f32 %v778_v43, 0.0  ;;  %428 = vst.msk [vmem:[#allocation2 + $0x38] sm:$0xf] %vm412_vm7, %v5369_v54 }
  0xf5   : > { %v1141_v49 = vmax.f32 %v1139_v31, %v1140_v41  ;;  %v1154_v55 = vrot.slane %v1153_v11, 1  ;;  %v5710_v44 = vmax.f32 %v759_v50, 0.0  ;;  %v5715_v63 = vmax.f32 %v779_v20, 0.0  ;;  %429 = vst.msk [vmem:[#allocation2 + $0x3c] sm:$0x1] %vm414_vm8, %v5369_v54 }
  0xf6   : > { %v1148_v59 = vmax.f32 %v1146_v36, %v1147_v52  ;;  %v1954_v62 = vsel %vm1940_vm3, %v1134_v51, -inf  ;;  %v5717_v46 = vmax.f32 %v781_v53, 0.0  ;;  %v920_v1 = vrot.slane %v810_v56, 2  ;;  %430 = vst.msk [vmem:[#allocation2 + $0x40] sm:$0xf] %vm412_vm7, %v5369_v54 }
  0xf7   : > { %v1155_v0 = vmax.f32 %v1153_v11, %v1154_v55  ;;  %v1955_v21 = vmax.f32 %v5605_v4, %v1954_v62  ;;  %v1957_v45 = vsel %vm1940_vm3, %v1141_v49, -inf  ;;  %v921_v3 = vrot.slane %v810_v56, 4  ;;  %431 = vst.msk [vmem:[#allocation2 + $0x44] sm:$0x1] %vm414_vm8, %v5369_v54  ;;  %v2415_v31 = vld [vmem:[#allocation2 + $0x8] sm:$0xf] }
  0xf8   : > { %v1958_v47 = vmax.f32 %v5608_v48, %v1957_v45  ;;  %v1960_v2 = vsel %vm1940_vm3, %v1148_v59, -inf  ;;  %v922_v5 = vrot.slane %v810_v56, 6  ;;  %v1688_v60 = vsel %vm1043_vm2, %v810_v56, -inf  ;;  %432 = vst.msk [vmem:[#allocation2 + $0x48] sm:$0xf] %vm412_vm7, %v5369_v54 }
  0xf9   : > { %v1961_v57 = vmax.f32 %v5613_v9, %v1960_v2  ;;  %v1963_v61 = vsel %vm1940_vm3, %v1155_v0, -inf  ;;  %v2137_v4 = vpack.c.bf16 %v1955_v21, %v1955_v21  ;;  %v1689_v58 = vrot.slane %v1688_v60, 4  ;;  %433 = vst.msk [vmem:[#allocation2 + $0x4c] sm:$0x1] %vm414_vm8, %v5369_v54 }
  0xfa   : > { %v1964_v6 = vmax.f32 %v5616_v10, %v1963_v61  ;;  %v2138_v48 = vpack.c.bf16 %v1958_v47, %v1958_v47  ;;  %v1695_v7 = vsel %vm1043_vm2, %v920_v1, -inf  ;;  %v1702_v14 = vsel %vm1043_vm2, %v921_v3, -inf }
  0xfb   : > { %v2139_v8 = vpack.c.bf16 %v1961_v57, %v1961_v57  ;;  %v2265_v12 = vunpack.c.l.b16 %v2137_v4  ;;  %v1696_v9 = vrot.slane %v1695_v7, 4  ;;  %v1690_v19 = vmax.f32 %v1688_v60, %v1689_v58 }
  0xfc   : > { %v2140_v15 = vpack.c.bf16 %v1964_v6, %v1964_v6  ;;  %v2266_v16 = vunpack.c.l.b16 %v2138_v48  ;;  %v1703_v22 = vrot.slane %v1702_v14, 4  ;;  %v1709_v27 = vsel %vm1043_vm2, %v922_v5, -inf }
  0xfd   : > { %v2267_v10 = vunpack.c.l.b16 %v2139_v8  ;;  %v2332_v23 = vsel %vm2331_vm9, %v2265_v12, %v5685_v33  ;;  %v1697_v24 = vmax.f32 %v1695_v7, %v1696_v9  ;;  %v1691_v13 = vrot.slane %v1690_v19, 2 }
  0xfe   : > { %v2268_v28 = vunpack.c.l.b16 %v2140_v15  ;;  %v2334_v30 = vsel %vm2333_vm10, %v2266_v16, %v2332_v23  ;;  %v1704_v17 = vmax.f32 %v1702_v14, %v1703_v22  ;;  %v1710_v35 = vrot.slane %v1709_v27, 4 }
  0xff   : > { %v2336_v32 = vsel %vm2335_vm12, %v2267_v10, %v2334_v30  ;;  %v1698_v42 = vrot.slane %v1697_v24, 2  ;;  %v863_v36 = vrot.slane %v5710_v44, 2  ;;  %v1692_v41 = vmax.f32 %v1690_v19, %v1691_v13 }
 0x100   : > { %v2379_v37 = vpack.c.b16 %v2336_v32, %v2336_v32  ;;  %v2380_v39 = vpack.c.b16 %v2268_v28, %v2268_v28  ;;  %v1705_v11 = vrot.slane %v1704_v17, 2  ;;  %v1711_v50 = vmax.f32 %v1709_v27, %v1710_v35 }
 0x101   : > { %v1699_v43 = vmax.f32 %v1697_v24, %v1698_v42  ;;  %v864_v51 = vrot.slane %v5710_v44, 4  ;;  %v865_v52 = vrot.slane %v5710_v44, 6  ;;  %v1693_v49 = vrot.slane %v1692_v41, 1 }
 0x102   : > { %v2416_v20 = vsel %vm5745_vm14, %v2379_v37, %v2415_v31  ;;  %v2422_v53 = vsel %vm5752_vm15, %v2380_v39, %v2421_v34  ;;  %v1706_v55 = vmax.f32 %v1704_v17, %v1705_v11  ;;  %v1712_v59 = vrot.slane %v1711_v50, 2 }
 0x103   : > { %2417 = vst [vmem:[#allocation2 + $0x8] sm:$0xf] %v2416_v20  ;;  %v1700_v56 = vrot.slane %v1699_v43, 1  ;;  %v1156_v62 = vsel %vm1043_vm2, %v5710_v44, -inf  ;;  %v1163_v0 = vsel %vm1043_vm2, %v863_v36, -inf  ;;  %v1694_v21 = vmax.f32 %v1692_v41, %v1693_v49 }
 0x104   : > { %2423 = vst [vmem:[#allocation2 + $0xc] sm:$0x1] %v2422_v53  ;;  %v1707_v45 = vrot.slane %v1706_v55, 1  ;;  %v1157_v1 = vrot.slane %v1156_v62, 4  ;;  %v1164_v47 = vrot.slane %v1163_v0, 4  ;;  %v1713_v3 = vmax.f32 %v1711_v50, %v1712_v59 }
 0x105   : > { %v1701_v2 = vmax.f32 %v1699_v43, %v1700_v56  ;;  %v1170_v5 = vsel %vm1043_vm2, %v864_v51, -inf  ;;  %v1177_v57 = vsel %vm1043_vm2, %v865_v52, -inf  ;;  %v2074_v4 = vsel %vm1940_vm3, %v1694_v21, -inf  ;;  %v2448_v43 = vld [vmem:[#allocation2 + $0x30] sm:$0xf] }
 0x106   : > { %v1708_v61 = vmax.f32 %v1706_v55, %v1707_v45  ;;  %v1158_v60 = vmax.f32 %v1156_v62, %v1157_v1  ;;  %v1165_v6 = vmax.f32 %v1163_v0, %v1164_v47  ;;  %v1714_v48 = vrot.slane %v1713_v3, 1  ;;  %v2451_v49 = vld [vmem:[#allocation2 + $0x34] sm:$0x1] }
 0x107   : > { %v2075_v44 = vmax.f32 %v5623_v18, %v2074_v4  ;;  %v2077_v58 = vsel %vm1940_vm3, %v1701_v2, -inf  ;;  %v1171_v7 = vrot.slane %v1170_v5, 4  ;;  %v1178_v27 = vrot.slane %v1177_v57, 4 }
 0x108   : > { %v2078_v8 = vmax.f32 %v5638_v38, %v2077_v58  ;;  %v2080_v12 = vsel %vm1940_vm3, %v1708_v61, -inf  ;;  %v1159_v9 = vrot.slane %v1158_v60, 2  ;;  %v1166_v14 = vrot.slane %v1165_v6, 2 }
 0x109   : > { %v1715_v15 = vmax.f32 %v1713_v3, %v1714_v48  ;;  %v2081_v16 = vmax.f32 %v5678_v25, %v2080_v12  ;;  %v2177_v19 = vpack.c.bf16 %v2075_v44, %v2075_v44  ;;  %v1172_v22 = vmax.f32 %v1170_v5, %v1171_v7 }
 0x10a   : > { %v2178_v10 = vpack.c.bf16 %v2078_v8, %v2078_v8  ;;  %v1160_v23 = vmax.f32 %v1158_v60, %v1159_v9  ;;  %v1167_v24 = vmax.f32 %v1165_v6, %v1166_v14  ;;  %v1179_v35 = vmax.f32 %v1177_v57, %v1178_v27 }
 0x10b   : > { %v2083_v18 = vsel %vm1940_vm3, %v1715_v15, -inf  ;;  %v2179_v28 = vpack.c.bf16 %v2081_v16, %v2081_v16  ;;  %v2305_v30 = vunpack.c.l.b16 %v2177_v19  ;;  %v1173_v31 = vrot.slane %v1172_v22, 2  ;;  %v647_v19 = vpop.f32.mrf.mxu0 }
 0x10c   : > { %v2084_v38 = vmax.f32 %v5682_v26, %v2083_v18  ;;  %v2306_v13 = vunpack.c.l.b16 %v2178_v10  ;;  %v1161_v17 = vrot.slane %v1160_v23, 1  ;;  %v1168_v32 = vrot.slane %v1167_v24, 1 }
 0x10d   : > { %v2307_v34 = vunpack.c.l.b16 %v2179_v28  ;;  %v2364_v25 = vsel %vm2331_vm9, %v2305_v30, %v5688_v29  ;;  %v1174_v42 = vmax.f32 %v1172_v22, %v1173_v31  ;;  %v1180_v51 = vrot.slane %v1179_v35, 2 }
 0x10e   : > { %v2180_v36 = vpack.c.bf16 %v2084_v38, %v2084_v38  ;;  %v2365_v37 = vsel %vm2333_vm10, %v2306_v13, %v2364_v25  ;;  %v1162_v39 = vmax.f32 %v1160_v23, %v1161_v17  ;;  %v1169_v41 = vmax.f32 %v1167_v24, %v1168_v32 }
 0x10f   : > { %v2366_v11 = vsel %vm2335_vm12, %v2307_v34, %v2365_v37  ;;  %v1175_v50 = vrot.slane %v1174_v42, 1  ;;  %v923_v26 = vrot.slane %v5715_v63, 2  ;;  %v1181_v56 = vmax.f32 %v1179_v35, %v1180_v51 }
 0x110   : > { %v2308_v52 = vunpack.c.l.b16 %v2180_v36  ;;  %v2389_v20 = vpack.c.b16 %v2366_v11, %v2366_v11  ;;  %v5782_v53 = vsel %vm1940_vm3, %v1162_v39, -inf  ;;  %v5785_v29 = vsel %vm1940_vm3, %v1169_v41, -inf }
 0x111   : > { %v1176_v55 = vmax.f32 %v1174_v42, %v1175_v50  ;;  %v924_v59 = vrot.slane %v5715_v63, 4  ;;  %v925_v62 = vrot.slane %v5715_v63, 6  ;;  %v1716_v45 = vsel %vm1043_vm2, %v5715_v63, -inf }
 0x112   : > { %v2390_v0 = vpack.c.b16 %v2308_v52, %v2308_v52  ;;  %v2449_v21 = vsel %vm5745_vm14, %v2389_v20, %v2448_v43  ;;  %v1723_v1 = vsel %vm1043_vm2, %v923_v26, -inf  ;;  %v1182_v47 = vrot.slane %v1181_v56, 1  ;;  %v697_v20 = vpop.f32.mrf.mxu1 }
 0x113   : > { %2450 = vst [vmem:[#allocation2 + $0x30] sm:$0xf] %v2449_v21  ;;  %v5795_v2 = vsel %vm1940_vm3, %v1176_v55, -inf  ;;  %v1717_v3 = vrot.slane %v1716_v45, 4  ;;  %v1724_v5 = vrot.slane %v1723_v1, 4  ;;  %v1730_v61 = vsel %vm1043_vm2, %v924_v59, -inf }
 0x114   : > { %v2452_v57 = vsel %vm5752_vm15, %v2390_v0, %v2451_v49  ;;  %v1737_v4 = vsel %vm1043_vm2, %v925_v62, -inf  ;;  %v929_v60 = vrot.slane %v5717_v46, 2  ;;  %v1183_v63 = vmax.f32 %v1181_v56, %v1182_v47 }
 0x115   : > { %2453 = vst [vmem:[#allocation2 + $0x34] sm:$0x1] %v2452_v57  ;;  %v1718_v6 = vmax.f32 %v1716_v45, %v1717_v3  ;;  %v1725_v48 = vmax.f32 %v1723_v1, %v1724_v5  ;;  %v1731_v44 = vrot.slane %v1730_v61, 4  ;;  %v1738_v58 = vrot.slane %v1737_v4, 4  ;;  %v702_v1 = vpop.f32.mrf.mxu3  ;;  %v5818_v5 = vld [vmem:[%s7046_s2] ss:$0 sm:$0xff] }
 0x116   : > { %v930_v7 = vrot.slane %v5717_v46, 4  ;;  %v931_v8 = vrot.slane %v5717_v46, 6  ;;  %v1772_v12 = vsel %vm1043_vm2, %v5717_v46, -inf  ;;  %v5807_v9 = vsel %vm1940_vm3, %v1183_v63, -inf }
 0x117   : > { %v1719_v14 = vrot.slane %v1718_v6, 2  ;;  %v1726_v15 = vrot.slane %v1725_v48, 2  ;;  %v1732_v16 = vmax.f32 %v1730_v61, %v1731_v44  ;;  %v1739_v22 = vmax.f32 %v1737_v4, %v1738_v58  ;;  %v650_v4 = vpop.f32.mrf.mxu0  ;;  %v5826_v58 = vld [vmem:[%s7029_s3] ss:$0 sm:$0xff] }
 0x118   : > { %v1773_v10 = vrot.slane %v1772_v12, 4  ;;  %v1779_v23 = vsel %vm1043_vm2, %v929_v60, -inf  ;;  %v1786_v24 = vsel %vm1043_vm2, %v930_v7, -inf  ;;  %v1793_v13 = vsel %vm1043_vm2, %v931_v8, -inf }
 0x119   : > { %v1720_v27 = vmax.f32 %v1718_v6, %v1719_v14  ;;  %v1727_v18 = vmax.f32 %v1725_v48, %v1726_v15  ;;  %v1733_v28 = vrot.slane %v1732_v16, 2  ;;  %v1780_v30 = vrot.slane %v1779_v23, 4 }
 0x11a   : > { %v1740_v31 = vrot.slane %v1739_v22, 2  ;;  %v1774_v38 = vmax.f32 %v1772_v12, %v1773_v10  ;;  %v1787_v46 = vrot.slane %v1786_v24, 4  ;;  %v1794_v37 = vrot.slane %v1793_v13, 4 }
 0x11b   : > { %v1721_v17 = vrot.slane %v1720_v27, 1  ;;  %v1728_v32 = vrot.slane %v1727_v18, 1  ;;  %v1734_v34 = vmax.f32 %v1732_v16, %v1733_v28  ;;  %v1781_v25 = vmax.f32 %v1779_v23, %v1780_v30 }
 0x11c   : > { %v1741_v42 = vmax.f32 %v1739_v22, %v1740_v31  ;;  %v1775_v35 = vrot.slane %v1774_v38, 2  ;;  %v1788_v36 = vmax.f32 %v1786_v24, %v1787_v46  ;;  %v1795_v52 = vmax.f32 %v1793_v13, %v1794_v37 }
 0x11d   : > { %v1722_v39 = vmax.f32 %v1720_v27, %v1721_v17  ;;  %v1729_v41 = vmax.f32 %v1727_v18, %v1728_v32  ;;  %v1735_v11 = vrot.slane %v1734_v34, 1  ;;  %v1782_v43 = vrot.slane %v1781_v25, 2 }
 0x11e   : > { %v1742_v50 = vrot.slane %v1741_v42, 1  ;;  %v1776_v51 = vmax.f32 %v1774_v38, %v1775_v35  ;;  %v1789_v26 = vrot.slane %v1788_v36, 2  ;;  %v1796_v45 = vrot.slane %v1795_v52, 2 }
 0x11f   : > { %v1736_v49 = vmax.f32 %v1734_v34, %v1735_v11  ;;  %v2085_v55 = vsel %vm1940_vm3, %v1722_v39, -inf  ;;  %v2088_v56 = vsel %vm1940_vm3, %v1729_v41, -inf  ;;  %v1783_v59 = vmax.f32 %v1781_v25, %v1782_v43 }
 0x120   : > { %v1743_v62 = vmax.f32 %v1741_v42, %v1742_v50  ;;  %v1777_v0 = vrot.slane %v1776_v51, 1  ;;  %v1790_v21 = vmax.f32 %v1788_v36, %v1789_v26  ;;  %v724_v57 = vmul.f32 %v5818_v5, %v647_v19 }
 0x121   : > { %v2091_v47 = vsel %vm1940_vm3, %v1736_v49, -inf  ;;  %v1784_v3 = vrot.slane %v1783_v59, 1  ;;  %v744_v61 = vmul.f32 %v5818_v5, %v697_v20  ;;  %v1797_v48 = vmax.f32 %v1795_v52, %v1796_v45 }
 0x122   : > { %v2094_v60 = vsel %vm1940_vm3, %v1743_v62, -inf  ;;  %v1778_v63 = vmax.f32 %v1776_v51, %v1777_v0  ;;  %v1791_v6 = vrot.slane %v1790_v21, 1  ;;  %v760_v7 = vadd.f32 %v5826_v58, %v724_v57 }
 0x123   : > { %v1785_v44 = vmax.f32 %v1783_v59, %v1784_v3  ;;  %v780_v8 = vadd.f32 %v5826_v58, %v744_v61  ;;  %v746_v12 = vmul.f32 %v5818_v5, %v702_v1  ;;  %v1798_v15 = vrot.slane %v1797_v48, 1 }
 0x124   : > { %v1792_v14 = vmax.f32 %v1790_v21, %v1791_v6  ;;  %v2086_v16 = vsel %vm1940_vm3, %v1778_v63, -inf  ;;  %v5833_v19 = vmul.f32 %v5818_v5, %v650_v4  ;;  %v792_v23 = vmax.f32 %v760_v7, 0.0 }
 0x125   : > { %v2087_v22 = vmax.f32 %v2085_v55, %v2086_v16  ;;  %v2089_v10 = vsel %vm1940_vm3, %v1785_v44, -inf  ;;  %v812_v24 = vmax.f32 %v780_v8, 0.0  ;;  %v1799_v27 = vmax.f32 %v1797_v48, %v1798_v15 }
 0x126   : > { %v2090_v18 = vmax.f32 %v2088_v56, %v2089_v10  ;;  %v2092_v28 = vsel %vm1940_vm3, %v1792_v14, -inf  ;;  %v5838_v30 = vadd.f32 %v5826_v58, %v746_v12  ;;  %v866_v46 = vrot.slane %v792_v23, 2 }
 0x127   : > { %v2093_v31 = vmax.f32 %v2091_v47, %v2092_v28  ;;  %v2181_v38 = vpack.c.bf16 %v2087_v22, %v2087_v22  ;;  %v867_v13 = vrot.slane %v792_v23, 4  ;;  %v2095_v17 = vsel %vm1940_vm3, %v1799_v27, -inf }
 0x128   : > { %v2182_v32 = vpack.c.bf16 %v2090_v18, %v2090_v18  ;;  %v868_v34 = vrot.slane %v792_v23, 6  ;;  %v1184_v25 = vsel %vm1043_vm2, %v792_v23, -inf  ;;  %v2096_v42 = vmax.f32 %v2094_v60, %v2095_v17 }
 0x129   : > { %v2183_v35 = vpack.c.bf16 %v2093_v31, %v2093_v31  ;;  %v2309_v36 = vunpack.c.l.b16 %v2181_v38  ;;  %v1185_v37 = vrot.slane %v1184_v25, 4  ;;  %v1191_v41 = vsel %vm1043_vm2, %v866_v46, -inf }
 0x12a   : > { %v2310_v39 = vunpack.c.l.b16 %v2182_v32  ;;  %v1198_v11 = vsel %vm1043_vm2, %v867_v13, -inf  ;;  %v1205_v43 = vsel %vm1043_vm2, %v868_v34, -inf  ;;  %v2184_v50 = vpack.c.bf16 %v2096_v42, %v2096_v42 }
 0x12b   : > { %v2311_v51 = vunpack.c.l.b16 %v2183_v35  ;;  %v1186_v26 = vmax.f32 %v1184_v25, %v1185_v37  ;;  %v1192_v52 = vrot.slane %v1191_v41, 4  ;;  %v1199_v49 = vrot.slane %v1198_v11, 4 }
 0x12c   : > { %v2367_v20 = vsel %vm2325_vm4, %v2310_v39, %v2309_v36  ;;  %v1206_v55 = vrot.slane %v1205_v43, 4  ;;  %v926_v56 = vrot.slane %v812_v24, 2  ;;  %v2312_v59 = vunpack.c.l.b16 %v2184_v50 }
 0x12d   : > { %v2368_v62 = vsel %vm2327_vm5, %v2311_v51, %v2367_v20  ;;  %v1187_v0 = vrot.slane %v1186_v26, 2  ;;  %v1193_v21 = vmax.f32 %v1191_v41, %v1192_v52  ;;  %v1200_v45 = vmax.f32 %v1198_v11, %v1199_v49 }
 0x12e   : > { %v1207_v1 = vmax.f32 %v1205_v43, %v1206_v55  ;;  %v927_v47 = vrot.slane %v812_v24, 4  ;;  %v928_v3 = vrot.slane %v812_v24, 6  ;;  %v5848_v57 = vsel %vm2329_vm6, %v2312_v59, %v2368_v62 }
 0x12f   : > { %v1188_v61 = vmax.f32 %v1186_v26, %v1187_v0  ;;  %v1194_v4 = vrot.slane %v1193_v21, 2  ;;  %v1744_v60 = vsel %vm1043_vm2, %v812_v24, -inf  ;;  %v1201_v63 = vrot.slane %v1200_v45, 2 }
 0x130   : > { %v1208_v6 = vrot.slane %v1207_v1, 2  ;;  %v1745_v48 = vrot.slane %v1744_v60, 4  ;;  %v1751_v44 = vsel %vm1043_vm2, %v926_v56, -inf  ;;  %v1758_v14 = vsel %vm1043_vm2, %v927_v47, -inf }
 0x131   : > { %v1189_v7 = vrot.slane %v1188_v61, 1  ;;  %v1195_v8 = vmax.f32 %v1193_v21, %v1194_v4  ;;  %v1752_v12 = vrot.slane %v1751_v44, 4  ;;  %v1202_v15 = vmax.f32 %v1200_v45, %v1201_v63 }
 0x132   : > { %v1209_v16 = vmax.f32 %v1207_v1, %v1208_v6  ;;  %v1746_v22 = vmax.f32 %v1744_v60, %v1745_v48  ;;  %v1759_v10 = vrot.slane %v1758_v14, 4  ;;  %v1765_v28 = vsel %vm1043_vm2, %v928_v3, -inf }
 0x133   : > { %v1190_v23 = vmax.f32 %v1188_v61, %v1189_v7  ;;  %v1196_v27 = vrot.slane %v1195_v8, 1  ;;  %v1753_v18 = vmax.f32 %v1751_v44, %v1752_v12  ;;  %v1203_v24 = vrot.slane %v1202_v15, 1  ;;  %v652_v44 = vpop.f32.mrf.mxu0  ;;  %v5872_v7 = vld [vmem:[#allocation2] sm:$0xf] }
 0x134   : > { %v1210_v31 = vrot.slane %v1209_v16, 1  ;;  %v1747_v38 = vrot.slane %v1746_v22, 2  ;;  %v1760_v46 = vmax.f32 %v1758_v14, %v1759_v10  ;;  %v1766_v34 = vrot.slane %v1765_v28, 4 }
 0x135   : > { %v1197_v13 = vmax.f32 %v1195_v8, %v1196_v27  ;;  %v5855_v17 = vsel %vm1940_vm3, %v1190_v23, -inf  ;;  %v1754_v32 = vrot.slane %v1753_v18, 2  ;;  %v1204_v25 = vmax.f32 %v1202_v15, %v1203_v24 }
 0x136   : > { %v1211_v42 = vmax.f32 %v1209_v16, %v1210_v31  ;;  %v1748_v35 = vmax.f32 %v1746_v22, %v1747_v38  ;;  %v1761_v36 = vrot.slane %v1760_v46, 2  ;;  %v1767_v41 = vmax.f32 %v1765_v28, %v1766_v34 }
 0x137   : > { %v5858_v37 = vsel %vm1940_vm3, %v1197_v13, -inf  ;;  %v1755_v39 = vmax.f32 %v1753_v18, %v1754_v32  ;;  %v814_v11 = vmax.f32 %v5838_v30, 0.0  ;;  %v5862_v43 = vsel %vm1940_vm3, %v1204_v25, -inf }
 0x138   : > { %v5865_v50 = vsel %vm1940_vm3, %v1211_v42, -inf  ;;  %v1749_v51 = vrot.slane %v1748_v35, 1  ;;  %v1762_v26 = vmax.f32 %v1760_v46, %v1761_v36  ;;  %v1768_v20 = vrot.slane %v1767_v41, 2 }
 0x139   : > { %v1756_v52 = vrot.slane %v1755_v39, 1  ;;  %v932_v49 = vrot.slane %v814_v11, 2  ;;  %v933_v55 = vrot.slane %v814_v11, 4  ;;  %v934_v62 = vrot.slane %v814_v11, 6 }
 0x13a   : > { %v1750_v56 = vmax.f32 %v1748_v35, %v1749_v51  ;;  %v1763_v59 = vrot.slane %v1762_v26, 1  ;;  %v1800_v0 = vsel %vm1043_vm2, %v814_v11, -inf  ;;  %v1769_v45 = vmax.f32 %v1767_v41, %v1768_v20 }
 0x13b   : > { %v1757_v21 = vmax.f32 %v1755_v39, %v1756_v52  ;;  %v1801_v30 = vrot.slane %v1800_v0, 4  ;;  %v1807_v1 = vsel %vm1043_vm2, %v932_v49, -inf  ;;  %v1814_v4 = vsel %vm1043_vm2, %v933_v55, -inf }
 0x13c   : > { %v1764_v47 = vmax.f32 %v1762_v26, %v1763_v59  ;;  %v2097_v3 = vsel %vm1940_vm3, %v1750_v56, -inf  ;;  %v1808_v61 = vrot.slane %v1807_v1, 4  ;;  %v1770_v60 = vrot.slane %v1769_v45, 1 }
 0x13d   : > { %v2100_v63 = vsel %vm1940_vm3, %v1757_v21, -inf  ;;  %v1802_v6 = vmax.f32 %v1800_v0, %v1801_v30  ;;  %v1815_v48 = vrot.slane %v1814_v4, 4  ;;  %v1821_v14 = vsel %vm1043_vm2, %v934_v62, -inf }
 0x13e   : > { %v2103_v8 = vsel %vm1940_vm3, %v1764_v47, -inf  ;;  %v1809_v12 = vmax.f32 %v1807_v1, %v1808_v61  ;;  %v761_v15 = vadd.f32 %v5826_v58, %v5833_v19  ;;  %v1771_v16 = vmax.f32 %v1769_v45, %v1770_v60 }
 0x13f   : > { %v1803_v22 = vrot.slane %v1802_v6, 2  ;;  %v1816_v10 = vmax.f32 %v1814_v4, %v1815_v48  ;;  %v1822_v23 = vrot.slane %v1821_v14, 4  ;;  %v5879_v28 = vmul.f32 %v5818_v5, %v652_v44 }
 0x140   : > { %v1810_v27 = vrot.slane %v1809_v12, 2  ;;  %v793_v18 = vmax.f32 %v761_v15, 0.0  ;;  %v2555_v24 = vunpack.c.l.b16 %v5872_v7  ;;  %v2106_v31 = vsel %vm1940_vm3, %v1771_v16, -inf }
 0x141   : > { %v1804_v38 = vmax.f32 %v1802_v6, %v1803_v22  ;;  %v1817_v46 = vrot.slane %v1816_v10, 2  ;;  %v1823_v13 = vmax.f32 %v1821_v14, %v1822_v23  ;;  %vm3059_vm1 = vcmask 523264  }
 0x142   : > { %v1811_v32 = vmax.f32 %v1809_v12, %v1810_v27  ;;  %v869_v34 = vrot.slane %v793_v18, 2  ;;  %v870_v25 = vrot.slane %v793_v18, 4  ;;  %v871_v19 = vrot.slane %v793_v18, 6 }
 0x143   : > { %v1805_v42 = vrot.slane %v1804_v38, 1  ;;  %v1818_v35 = vmax.f32 %v1816_v10, %v1817_v46  ;;  %v1824_v36 = vrot.slane %v1823_v13, 2  ;;  %v1212_v39 = vsel %vm1043_vm2, %v793_v18, -inf }
 0x144   : > { %v1812_v41 = vrot.slane %v1811_v32, 1  ;;  %v1213_v11 = vrot.slane %v1212_v39, 4  ;;  %v1219_v51 = vsel %vm1043_vm2, %v869_v34, -inf  ;;  %v1226_v26 = vsel %vm1043_vm2, %v870_v25, -inf }
 0x145   : > { %v1806_v52 = vmax.f32 %v1804_v38, %v1805_v42  ;;  %v1819_v20 = vrot.slane %v1818_v35, 1  ;;  %v1825_v49 = vmax.f32 %v1823_v13, %v1824_v36  ;;  %v1220_v55 = vrot.slane %v1219_v51, 4 }
 0x146   : > { %v1813_v56 = vmax.f32 %v1811_v32, %v1812_v41  ;;  %v1214_v59 = vmax.f32 %v1212_v39, %v1213_v11  ;;  %v1227_v62 = vrot.slane %v1226_v26, 4  ;;  %v1233_v0 = vsel %vm1043_vm2, %v871_v19, -inf }
 0x147   : > { %v1820_v21 = vmax.f32 %v1818_v35, %v1819_v20  ;;  %v1826_v45 = vrot.slane %v1825_v49, 1  ;;  %v2098_v30 = vsel %vm1940_vm3, %v1806_v52, -inf  ;;  %v1221_v1 = vmax.f32 %v1219_v51, %v1220_v55  ;;  %v5894_v51 = vld [vmem:[#allocation2 + $0x4] sm:$0x1]  ;;  %v2454_v52 = vld [vmem:[#allocation2 + $0x38] sm:$0xf] }
 0x148   : > { %v2099_v47 = vmax.f32 %v2097_v3, %v2098_v30  ;;  %v2101_v61 = vsel %vm1940_vm3, %v1813_v56, -inf  ;;  %v1215_v4 = vrot.slane %v1214_v59, 2  ;;  %v1228_v60 = vmax.f32 %v1226_v26, %v1227_v62  ;;  %v2457_v56 = vld [vmem:[#allocation2 + $0x3c] sm:$0x1] }
 0x149   : > { %v1827_v6 = vmax.f32 %v1825_v49, %v1826_v45  ;;  %v2102_v48 = vmax.f32 %v2100_v63, %v2101_v61  ;;  %v2104_v44 = vsel %vm1940_vm3, %v1820_v21, -inf  ;;  %v1222_v12 = vrot.slane %v1221_v1, 2 }
 0x14a   : > { %v2105_v14 = vmax.f32 %v2103_v8, %v2104_v44  ;;  %v2185_v15 = vpack.c.bf16 %v2099_v47, %v2099_v47  ;;  %v1216_v16 = vmax.f32 %v1214_v59, %v1215_v4  ;;  %v1229_v22 = vrot.slane %v1228_v60, 2 }
 0x14b   : > { %v2107_v10 = vsel %vm1940_vm3, %v1827_v6, -inf  ;;  %v2186_v23 = vpack.c.bf16 %v2102_v48, %v2102_v48  ;;  %v1223_v27 = vmax.f32 %v1221_v1, %v1222_v12  ;;  %v1234_v18 = vrot.slane %v1233_v0, 4 }
 0x14c   : > { %v2108_v38 = vmax.f32 %v2106_v31, %v2107_v10  ;;  %v2187_v3 = vpack.c.bf16 %v2105_v14, %v2105_v14  ;;  %v2313_v46 = vunpack.c.l.b16 %v2185_v15  ;;  %v1217_v13 = vrot.slane %v1216_v16, 1 }
 0x14d   : > { %v2314_v32 = vunpack.c.l.b16 %v2186_v23  ;;  %v1224_v34 = vrot.slane %v1223_v27, 1  ;;  %v1230_v25 = vmax.f32 %v1228_v60, %v1229_v22  ;;  %v1235_v63 = vmax.f32 %v1233_v0, %v1234_v18 }
 0x14e   : > { %v2188_v19 = vpack.c.bf16 %v2108_v38, %v2108_v38  ;;  %v2315_v42 = vunpack.c.l.b16 %v2187_v3  ;;  %v2370_v8 = vsel %vm2331_vm9, %v2313_v46, %v5848_v57  ;;  %v1218_v35 = vmax.f32 %v1216_v16, %v1217_v13  ;;  %v655_v13 = vpop.f32.mrf.mxu0 }
 0x14f   : > { %v2371_v36 = vsel %vm2333_vm10, %v2314_v32, %v2370_v8  ;;  %v1225_v39 = vmax.f32 %v1223_v27, %v1224_v34  ;;  %v1231_v41 = vrot.slane %v1230_v25, 1  ;;  %v1236_v11 = vrot.slane %v1235_v63, 2 }
 0x150   : > { %v2316_v31 = vunpack.c.l.b16 %v2188_v19  ;;  %v2372_v26 = vsel %vm2335_vm12, %v2315_v42, %v2371_v36  ;;  %v1966_v20 = vsel %vm1940_vm3, %v1218_v35, -inf  ;;  %v762_v49 = vadd.f32 %v5826_v58, %v5879_v28 }
 0x151   : > { %v2391_v55 = vpack.c.b16 %v2372_v26, %v2372_v26  ;;  %v1232_v57 = vmax.f32 %v1230_v25, %v1231_v41  ;;  %v1237_v59 = vmax.f32 %v1235_v63, %v1236_v11  ;;  %v1967_v62 = vmax.f32 %v5782_v53, %v1966_v20  ;;  %v2490_v11 = vld [vmem:[#allocation2 + $0x8] sm:$0xf] }
 0x152   : > { %v2392_v0 = vpack.c.b16 %v2316_v31, %v2316_v31  ;;  %v1969_v21 = vsel %vm1940_vm3, %v1225_v39, -inf  ;;  %v794_v45 = vmax.f32 %v762_v49, 0.0  ;;  %v2556_v30 = vunpack.c.l.b16 %v5894_v51 }
 0x153   : > { %v2455_v1 = vsel %vm5745_vm14, %v2391_v55, %v2454_v52  ;;  %v1238_v47 = vrot.slane %v1237_v59, 1  ;;  %v1970_v61 = vmax.f32 %v5785_v29, %v1969_v21  ;;  %v1972_v28 = vsel %vm1940_vm3, %v1232_v57, -inf }
 0x154   : > { %2456 = vst [vmem:[#allocation2 + $0x38] sm:$0xf] %v2455_v1  ;;  %v2458_v4 = vsel %vm5752_vm15, %v2392_v0, %v2457_v56  ;;  %v1973_v53 = vmax.f32 %v5795_v2, %v1972_v28  ;;  %v2141_v60 = vpack.c.bf16 %v1967_v62, %v1967_v62  ;;  %v872_v6 = vrot.slane %v794_v45, 2 }
 0x155   : > { %2459 = vst [vmem:[#allocation2 + $0x3c] sm:$0x1] %v2458_v4  ;;  %v1239_v48 = vmax.f32 %v1237_v59, %v1238_v47  ;;  %v2142_v44 = vpack.c.bf16 %v1970_v61, %v1970_v61  ;;  %v873_v12 = vrot.slane %v794_v45, 4  ;;  %v874_v14 = vrot.slane %v794_v45, 6  ;;  %v5924_v59 = vld [vmem:[#allocation2 + $0xc] sm:$0x1] }
 0x156   : > { %v2143_v15 = vpack.c.bf16 %v1973_v53, %v1973_v53  ;;  %v2269_v16 = vunpack.c.l.b16 %v2141_v60  ;;  %v1240_v22 = vsel %vm1043_vm2, %v794_v45, -inf  ;;  %v1247_v29 = vsel %vm1043_vm2, %v872_v6, -inf }
 0x157   : > { %v1975_v10 = vsel %vm1940_vm3, %v1239_v48, -inf  ;;  %v2270_v23 = vunpack.c.l.b16 %v2142_v44  ;;  %v1241_v27 = vrot.slane %v1240_v22, 4  ;;  %v1248_v18 = vrot.slane %v1247_v29, 4 }
 0x158   : > { %v1976_v2 = vmax.f32 %v5807_v9, %v1975_v10  ;;  %v2271_v38 = vunpack.c.l.b16 %v2143_v15  ;;  %v1254_v3 = vsel %vm1043_vm2, %v873_v12, -inf  ;;  %v1261_v46 = vsel %vm1043_vm2, %v874_v14, -inf }
 0x159   : > { %v2337_v32 = vsel %vm2325_vm4, %v2270_v23, %v2269_v16  ;;  %v1242_v34 = vmax.f32 %v1240_v22, %v1241_v27  ;;  %v1249_v25 = vmax.f32 %v1247_v29, %v1248_v18  ;;  %v1255_v63 = vrot.slane %v1254_v3, 4 }
 0x15a   : > { %v2144_v19 = vpack.c.bf16 %v1976_v2, %v1976_v2  ;;  %v2338_v42 = vsel %vm2327_vm5, %v2271_v38, %v2337_v32  ;;  %v1262_v8 = vrot.slane %v1261_v46, 4  ;;  %v2571_v9 = vpack.c.b16 %v2556_v30, %v2555_v24 }
 0x15b   : > { %v1243_v35 = vrot.slane %v1242_v34, 2  ;;  %v1250_v36 = vrot.slane %v1249_v25, 2  ;;  %v1256_v39 = vmax.f32 %v1254_v3, %v1255_v63  ;;  %v727_v41 = vmul.f32 %v5818_v5, %v655_v13 }
 0x15c   : > { %v2272_v31 = vunpack.c.l.b16 %v2144_v19  ;;  %v1263_v26 = vmax.f32 %v1261_v46, %v1262_v8  ;;  %v2580_v52 = vshrl.u32 %v2571_v9, 16  ;;  %v2582_v20 = vshll.u32 %v2571_v9, 16 }
 0x15d   : > { %v1244_v49 = vmax.f32 %v1242_v34, %v1243_v35  ;;  %v1251_v55 = vmax.f32 %v1249_v25, %v1250_v36  ;;  %v1257_v56 = vrot.slane %v1256_v39, 2  ;;  %v763_v57 = vadd.f32 %v5826_v58, %v727_v41 }
 0x15e   : > { %v2339_v7 = vsel %vm2329_vm6, %v2272_v31, %v2338_v42  ;;  %v1264_v24 = vrot.slane %v1263_v26, 2  ;;  %v2584_v62 = vrot.slane %v2582_v20, 1  ;;  %v2707_v0 = vunpack.c.l.b16 %v2490_v11 }
 0x15f   : > { %v1245_v21 = vrot.slane %v1244_v49, 1  ;;  %v1252_v45 = vrot.slane %v1251_v55, 1  ;;  %v1258_v1 = vmax.f32 %v1256_v39, %v1257_v56  ;;  %v795_v47 = vmax.f32 %v763_v57, 0.0 }
 0x160   : > { %v1265_v61 = vmax.f32 %v1263_v26, %v1264_v24  ;;  %v2585_v28 = vor.u32 %v2584_v62, %v2580_v52  ;;  %v2715_v4 = vpack.c.b16 %v2707_v0, %v2707_v0  ;;  %v2747_v53 = vunpack.c.l.b16 %v5924_v59  ;;  %v2506_v62 = vld [vmem:[#allocation2 + $0x8] sm:$0xe] }
 0x161   : > { %v1246_v60 = vmax.f32 %v1244_v49, %v1245_v21  ;;  %v1253_v6 = vmax.f32 %v1251_v55, %v1252_v45  ;;  %v1259_v48 = vrot.slane %v1258_v1, 1  ;;  %v875_v44 = vrot.slane %v795_v47, 2  ;;  %v2424_v45 = vld [vmem:[#allocation2 + $0x10] sm:$0xf] }
 0x162   : > { %v1266_v12 = vrot.slane %v1265_v61, 1  ;;  %2635 = vrot.lane.b32.xlu0 %v2585_v28, %s5370_s16  ;;  %v876_v14 = vrot.slane %v795_v47, 4  ;;  %v877_v15 = vrot.slane %v795_v47, 6  ;;  %v1268_v16 = vsel %vm1043_vm2, %v795_v47, -inf  ;;  %2723 = vrot.lane.b32.xlu1 %v2715_v4, %s5371_s17 }
 0x163   : > { %v1260_v22 = vmax.f32 %v1258_v1, %v1259_v48  ;;  %v1978_v29 = vsel %vm1940_vm3, %v1246_v60, -inf  ;;  %v1981_v10 = vsel %vm1940_vm3, %v1253_v6, -inf  ;;  %v1269_v23 = vrot.slane %v1268_v16, 4  ;;  %v2427_v1 = vld [vmem:[#allocation2 + $0x14] sm:$0x1] }
 0x164   : > { %v1267_v27 = vmax.f32 %v1265_v61, %v1266_v12  ;;  %v1979_v18 = vmax.f32 %v5855_v17, %v1978_v29  ;;  %v1982_v2 = vmax.f32 %v5858_v37, %v1981_v10  ;;  %v1275_v38 = vsel %vm1043_vm2, %v875_v44, -inf  ;;  %v657_v37 = vpop.f32.mrf.mxu0  ;;  %v2482_v44 = vld [vmem:[#allocation2] sm:$0xe]  ;;  %v5949_v12 = vld [vmem:[#allocation2 + $0x34] sm:$0x1] }
 0x165   : > { %v1984_v3 = vsel %vm1940_vm3, %v1260_v22, -inf  ;;  %v1270_v46 = vmax.f32 %v1268_v16, %v1269_v23  ;;  %v1276_v13 = vrot.slane %v1275_v38, 4  ;;  %v1282_v32 = vsel %vm1043_vm2, %v876_v14, -inf  ;;  %v2511_v22 = vld [vmem:[#allocation2 + $0x30] sm:$0xe] }
 0x166   : > { %v1985_v34 = vmax.f32 %v5862_v43, %v1984_v3  ;;  %v1987_v25 = vsel %vm1940_vm3, %v1267_v27, -inf  ;;  %v2145_v63 = vpack.c.bf16 %v1979_v18, %v1979_v18  ;;  %v2146_v19 = vpack.c.bf16 %v1982_v2, %v1982_v2  ;;  %v2475_v29 = vld [vmem:[#allocation2 + $0xc] sm:$0x1]  ;;  %v2483_v2 = vld [vmem:[#allocation2 + $0x8] sm:$0xe] }
 0x167   : > { %v1988_v42 = vmax.f32 %v5865_v50, %v1987_v25  ;;  %v1271_v8 = vrot.slane %v1270_v46, 2  ;;  %v1277_v17 = vmax.f32 %v1275_v38, %v1276_v13  ;;  %v1283_v9 = vrot.slane %v1282_v32, 4 }
 0x168   : > { %v2147_v35 = vpack.c.bf16 %v1985_v34, %v1985_v34  ;;  %v2273_v36 = vunpack.c.l.b16 %v2145_v63  ;;  %v2274_v39 = vunpack.c.l.b16 %v2146_v19  ;;  %v1289_v41 = vsel %vm1043_vm2, %v877_v15, -inf }
 0x169   : > { %v2148_v11 = vpack.c.bf16 %v1988_v42, %v1988_v42  ;;  %v1272_v31 = vmax.f32 %v1270_v46, %v1271_v8  ;;  %v1278_v26 = vrot.slane %v1277_v17, 2  ;;  %v1284_v52 = vmax.f32 %v1282_v32, %v1283_v9  ;;  %v2519_v42 = vld [vmem:[#allocation2 + $0x30] sm:$0xf]  ;;  %v2467_v9 = vld [vmem:[#allocation2 + $0x8] sm:$0xf] }
 0x16a   : > { %v2275_v43 = vunpack.c.l.b16 %v2147_v35  ;;  %v2340_v20 = vsel %vm2331_vm9, %v2273_v36, %v2339_v7  ;;  %v1290_v49 = vrot.slane %v1289_v41, 4  ;;  %v5945_v50 = vpack.c.b16 %v2747_v53, %v2707_v0 }
 0x16b   : > { %v2276_v55 = vunpack.c.l.b16 %v2148_v11  ;;  %v2341_v56 = vsel %vm2333_vm10, %v2274_v39, %v2340_v20  ;;  %v1273_v57 = vrot.slane %v1272_v31, 1  ;;  %v1279_v24 = vmax.f32 %v1277_v17, %v1278_v26 }
 0x16c   : > { %v2342_v21 = vsel %vm2335_vm12, %v2275_v43, %v2341_v56  ;;  %v1285_v47 = vrot.slane %v1284_v52, 2  ;;  %v1291_v61 = vmax.f32 %v1289_v41, %v1290_v49  ;;  %v2827_v0 = vunpack.c.l.b16 %v2506_v62  ;;  %v660_v32 = vpop.f32.mrf.mxu0 }
 0x16d   : > { %v2381_v28 = vpack.c.b16 %v2342_v21, %v2342_v21  ;;  %v2382_v4 = vpack.c.b16 %v2276_v55, %v2276_v55  ;;  %v1274_v7 = vmax.f32 %v1272_v31, %v1273_v57  ;;  %v1280_v60 = vrot.slane %v1279_v24, 1 }
 0x16e   : > { %v1286_v6 = vmax.f32 %v1284_v52, %v1285_v47  ;;  %v1292_v48 = vrot.slane %v1291_v61, 2  ;;  %v2835_v18 = vpack.c.b16 %v2747_v53, %v2827_v0  ;;  %v728_v3 = vmul.f32 %v5818_v5, %v657_v37 }
 0x16f   : > { %v2425_v14 = vsel %vm5745_vm14, %v2381_v28, %v2424_v45  ;;  %v2428_v15 = vsel %vm5752_vm15, %v2382_v4, %v2427_v1  ;;  %v1281_v16 = vmax.f32 %v1279_v24, %v1280_v60  ;;  %v5956_v27 = vsel %vm1940_vm3, %v1274_v7, -inf }
 0x170   : > { %2426 = vst [vmem:[#allocation2 + $0x10] sm:$0xf] %v2425_v14  ;;  %v1287_v10 = vrot.slane %v1286_v6, 1  ;;  %v1293_v23 = vmax.f32 %v1291_v61, %v1292_v48  ;;  %v2659_v46 = vunpack.c.l.b16 %v2482_v44  ;;  %v2752_v13 = vunpack.c.l.b16 %v5949_v12 }
 0x171   : > { %2429 = vst [vmem:[#allocation2 + $0x14] sm:$0x1] %v2428_v15  ;;  %v5961_v38 = vsel %vm1940_vm3, %v1281_v16, -inf  ;;  %v2843_v63 = vrot.slane %v2835_v18, 1  ;;  %v2832_v19 = vunpack.c.l.b16 %v2511_v22  ;;  %v764_v8 = vadd.f32 %v5826_v58, %v728_v3 }
 0x172   : > { %v1288_v34 = vmax.f32 %v1286_v6, %v1287_v10  ;;  %v1294_v25 = vrot.slane %v1293_v23, 1  ;;  %v2667_v59 = vpack.c.b16 %v2556_v30, %v2659_v46  ;;  %v2558_v53 = vunpack.c.l.b16 %v2475_v29 }
 0x173   : > { %v2660_v17 = vunpack.c.l.b16 %v2483_v2  ;;  %2851 = vrot.lane.b32.xlu0 %v2843_v63, %s5370_s16  ;;  %v2840_v36 = vpack.c.b16 %v2752_v13, %v2832_v19  ;;  %v729_v39 = vmul.f32 %v5818_v5, %v660_v32  ;;  %v796_v41 = vmax.f32 %v764_v8, 0.0 }
 0x174   : > { %v1295_v35 = vmax.f32 %v1293_v23, %v1294_v25  ;;  %v5969_v37 = vsel %vm1940_vm3, %v1288_v34, -inf  ;;  %v2675_v11 = vrot.slane %v2667_v59, 1  ;;  %v5975_v26 = vunpack.c.l.b16 %v2519_v42 }
 0x175   : > { %v2668_v31 = vpack.c.b16 %v2558_v53, %v2660_v17  ;;  %v2848_v30 = vrot.slane %v2840_v36, 1  ;;  %v765_v52 = vadd.f32 %v5826_v58, %v729_v39  ;;  %v2557_v43 = vunpack.c.l.b16 %v2467_v9 }
 0x176   : > { %v5978_v51 = vsel %vm1940_vm3, %v1295_v35, -inf  ;;  %v878_v20 = vrot.slane %v796_v41, 2  ;;  %v879_v49 = vrot.slane %v796_v41, 4  ;;  %v880_v55 = vrot.slane %v796_v41, 6  ;;  %2683 = vrot.lane.b32.xlu2 %v2675_v11, %s5372_s18 }
 0x177   : > { %v1296_v56 = vsel %vm1043_vm2, %v796_v41, -inf  ;;  %2861 = vrot.lane.b32.xlu1 %v2848_v30, %s5370_s16  ;;  %v2676_v24 = vrot.slane %v2668_v31, 1  ;;  %v797_v62 = vmax.f32 %v765_v52, 0.0  ;;  %v2887_v21 = vpack.c.b16 %v5975_v26, %v5975_v26 }
 0x178   : > { %v1297_v57 = vrot.slane %v1296_v56, 4  ;;  %v1303_v45 = vsel %vm1043_vm2, %v878_v20, -inf  ;;  %v1310_v1 = vsel %vm1043_vm2, %v879_v49, -inf  ;;  %v1317_v47 = vsel %vm1043_vm2, %v880_v55, -inf }
 0x179   : > { %v5989_v61 = vpack.c.b16 %v2558_v53, %v2557_v43  ;;  %v1304_v4 = vrot.slane %v1303_v45, 4  ;;  %v1311_v7 = vrot.slane %v1310_v1, 4  ;;  %v1318_v60 = vrot.slane %v1317_v47, 4 }
 0x17a   : > { %v1298_v28 = vmax.f32 %v1296_v56, %v1297_v57  ;;  %v881_v6 = vrot.slane %v797_v62, 2  ;;  %v882_v48 = vrot.slane %v797_v62, 4  ;;  %v883_v0 = vrot.slane %v797_v62, 6 }
 0x17b   : > { %v1324_v44 = vsel %vm1043_vm2, %v797_v62, -inf  ;;  %v1305_v15 = vmax.f32 %v1303_v45, %v1304_v4  ;;  %v1312_v16 = vmax.f32 %v1310_v1, %v1311_v7  ;;  %v1319_v22 = vmax.f32 %v1317_v47, %v1318_v60  ;;  %2685 = vrot.lane.b32.xlu0 %v2676_v24, %s5372_s18  ;;  %v2520_v1 = vld [vmem:[#allocation2 + $0x38] sm:$0xf]  ;;  %v662_v47 = vpop.f32.mrf.mxu0 }
 0x17c   : > { %v1299_v14 = vrot.slane %v1298_v28, 2  ;;  %v1325_v29 = vrot.slane %v1324_v44, 4  ;;  %v1331_v10 = vsel %vm1043_vm2, %v881_v6, -inf  ;;  %v1338_v23 = vsel %vm1043_vm2, %v882_v48, -inf }
 0x17d   : > { %v1345_v18 = vsel %vm1043_vm2, %v883_v0, -inf  ;;  %v1306_v3 = vrot.slane %v1305_v15, 2  ;;  %v1313_v46 = vrot.slane %v1312_v16, 2  ;;  %v1320_v32 = vrot.slane %v1319_v22, 2 }
 0x17e   : > { %v1300_v2 = vmax.f32 %v1298_v28, %v1299_v14  ;;  %v1326_v34 = vmax.f32 %v1324_v44, %v1325_v29  ;;  %v1332_v25 = vrot.slane %v1331_v10, 4  ;;  %v1339_v63 = vrot.slane %v1338_v23, 4  ;;  %2899 = vrot.lane.b32.xlu2 %v2887_v21, %s5372_s18  ;;  %v6000_v28 = vld [vmem:[#allocation2 + $0x3c] sm:$0x1] }
 0x17f   : > { %v1346_v19 = vrot.slane %v1345_v18, 4  ;;  %v1307_v8 = vmax.f32 %v1305_v15, %v1306_v3  ;;  %v1314_v59 = vmax.f32 %v1312_v16, %v1313_v46  ;;  %v1321_v53 = vmax.f32 %v1319_v22, %v1320_v32 }
 0x180   : > { %v1301_v42 = vrot.slane %v1300_v2, 1  ;;  %v1327_v17 = vrot.slane %v1326_v34, 2  ;;  %v1333_v9 = vmax.f32 %v1331_v10, %v1332_v25  ;;  %v1340_v35 = vmax.f32 %v1338_v23, %v1339_v63 }
 0x181   : > { %v1347_v36 = vmax.f32 %v1345_v18, %v1346_v19  ;;  %v1308_v41 = vrot.slane %v1307_v8, 1  ;;  %v1315_v11 = vrot.slane %v1314_v59, 1  ;;  %v1322_v31 = vrot.slane %v1321_v53, 1 }
 0x182   : > { %v1302_v39 = vmax.f32 %v1300_v2, %v1301_v42  ;;  %v1328_v30 = vmax.f32 %v1326_v34, %v1327_v17  ;;  %v1334_v52 = vrot.slane %v1333_v9, 2  ;;  %v1341_v43 = vrot.slane %v1340_v35, 2 }
 0x183   : > { %v1348_v20 = vrot.slane %v1347_v36, 2  ;;  %v1309_v49 = vmax.f32 %v1307_v8, %v1308_v41  ;;  %v1316_v55 = vmax.f32 %v1314_v59, %v1315_v11  ;;  %v1323_v56 = vmax.f32 %v1321_v53, %v1322_v31 }
 0x184   : > { %v5998_v57 = vsel %vm1940_vm3, %v1302_v39, -inf  ;;  %v1329_v24 = vrot.slane %v1328_v30, 1  ;;  %v1335_v62 = vmax.f32 %v1333_v9, %v1334_v52  ;;  %v1342_v21 = vmax.f32 %v1340_v35, %v1341_v43 }
 0x185   : > { %v1349_v45 = vmax.f32 %v1347_v36, %v1348_v20  ;;  %v6003_v4 = vsel %vm1940_vm3, %v1309_v49, -inf  ;;  %v6006_v7 = vsel %vm1940_vm3, %v1316_v55, -inf  ;;  %v6009_v60 = vsel %vm1940_vm3, %v1323_v56, -inf  ;;  %v6029_v49 = vld [vmem:[#allocation2 + $0x34] sm:$0x1] }
 0x186   : > { %v2587_v6 = vshrl.u32 %v5989_v61, 16  ;;  %v1330_v48 = vmax.f32 %v1328_v30, %v1329_v24  ;;  %v1336_v0 = vrot.slane %v1335_v62, 1  ;;  %v1343_v44 = vrot.slane %v1342_v21, 1 }
 0x187   : > { %v1350_v14 = vrot.slane %v1349_v45, 1  ;;  %v2589_v15 = vshll.u32 %v5989_v61, 16  ;;  %v2880_v16 = vunpack.c.l.b16 %v2520_v1  ;;  %v730_v22 = vmul.f32 %v5818_v5, %v662_v47 }
 0x188   : > { %v2920_v29 = vunpack.c.l.b16 %v6000_v28  ;;  %v1337_v10 = vmax.f32 %v1335_v62, %v1336_v0  ;;  %v1344_v23 = vmax.f32 %v1342_v21, %v1343_v44  ;;  %v1990_v2 = vsel %vm1940_vm3, %v1330_v48, -inf  ;;  %v2515_v48 = vld [vmem:[#allocation2 + $0x10] sm:$0xf] }
 0x189   : > { %v1351_v18 = vmax.f32 %v1349_v45, %v1350_v14  ;;  %v1991_v3 = vmax.f32 %v5956_v27, %v1990_v2  ;;  %v2591_v46 = vrot.slane %v2589_v15, 1  ;;  %v2888_v32 = vpack.c.b16 %v2880_v16, %v2880_v16 }
 0x18a   : > { %v766_v34 = vadd.f32 %v5826_v58, %v730_v22  ;;  %v1993_v25 = vsel %vm1940_vm3, %v1337_v10, -inf  ;;  %v1996_v61 = vsel %vm1940_vm3, %v1344_v23, -inf  ;;  %v2928_v19 = vpack.c.b16 %v2920_v29, %v2880_v16  ;;  %v2491_v16 = vld [vmem:[#allocation2 + $0x10] sm:$0xf] }
 0x18b   : > { %v1999_v63 = vsel %vm1940_vm3, %v1351_v18, -inf  ;;  %v1994_v42 = vmax.f32 %v5961_v38, %v1993_v25  ;;  %v1997_v8 = vmax.f32 %v5969_v37, %v1996_v61  ;;  %v2149_v27 = vpack.c.bf16 %v1991_v3, %v1991_v3  ;;  %2901 = vrot.lane.b32.xlu0 %v2888_v32, %s5372_s18 }
 0x18c   : > { %v2000_v59 = vmax.f32 %v5978_v51, %v1999_v63  ;;  %v2592_v53 = vor.u32 %v2591_v46, %v2587_v6  ;;  %v798_v17 = vmax.f32 %v766_v34, 0.0  ;;  %v2967_v9 = vshrl.u32 %v2928_v19, 16  ;;  %v665_v6 = vpop.f32.mrf.mxu0 }
 0x18d   : > { %v2969_v35 = vshll.u32 %v2928_v19, 16  ;;  %v2150_v36 = vpack.c.bf16 %v1994_v42, %v1994_v42  ;;  %v2151_v39 = vpack.c.bf16 %v1997_v8, %v1997_v8  ;;  %v2277_v11 = vunpack.c.l.b16 %v2149_v27  ;;  %v6050_v27 = vld [vmem:[#allocation2 + $0x14] sm:$0x1] }
 0x18e   : > { %v2152_v41 = vpack.c.bf16 %v2000_v59, %v2000_v59  ;;  %2637 = vrot.lane.b32.xlu1 %v2592_v53, %s5370_s16  ;;  %v884_v31 = vrot.slane %v798_v17, 2  ;;  %v885_v30 = vrot.slane %v798_v17, 4  ;;  %v886_v38 = vrot.slane %v798_v17, 6 }
 0x18f   : > { %v1352_v37 = vsel %vm1043_vm2, %v798_v17, -inf  ;;  %v2278_v52 = vunpack.c.l.b16 %v2150_v36  ;;  %v2279_v51 = vunpack.c.l.b16 %v2151_v39  ;;  %v2971_v62 = vrot.slane %v2969_v35, 1 }
 0x190   : > { %v2280_v43 = vunpack.c.l.b16 %v2152_v41  ;;  %v1353_v20 = vrot.slane %v1352_v37, 4  ;;  %v1359_v55 = vsel %vm1043_vm2, %v884_v31, -inf  ;;  %v1366_v56 = vsel %vm1043_vm2, %v885_v30, -inf }
 0x191   : > { %v1373_v24 = vsel %vm1043_vm2, %v886_v38, -inf  ;;  %v2343_v21 = vsel %vm2325_vm4, %v2278_v52, %v2277_v11  ;;  %v1360_v1 = vrot.slane %v1359_v55, 4  ;;  %v1367_v47 = vrot.slane %v1366_v56, 4 }
 0x192   : > { %v1354_v45 = vmax.f32 %v1352_v37, %v1353_v20  ;;  %v2344_v0 = vsel %vm2327_vm5, %v2279_v51, %v2343_v21  ;;  %v1374_v44 = vrot.slane %v1373_v24, 4  ;;  %v2972_v14 = vor.u32 %v2971_v62, %v2967_v9 }
 0x193   : > { %v2919_v15 = vunpack.c.l.b16 %v6029_v49  ;;  %v6038_v22 = vsel %vm2329_vm6, %v2280_v43, %v2344_v0  ;;  %v1361_v23 = vmax.f32 %v1359_v55, %v1360_v1  ;;  %v1368_v18 = vmax.f32 %v1366_v56, %v1367_v47 }
 0x194   : > { %v1355_v10 = vrot.slane %v1354_v45, 2  ;;  %v1375_v2 = vmax.f32 %v1373_v24, %v1374_v44  ;;  %2997 = vrot.lane.b32.xlu2 %v2972_v14, %s5371_s17  ;;  %v731_v46 = vmul.f32 %v5818_v5, %v665_v6  ;;  %v6045_v32 = vunpack.c.l.b16 %v2515_v48 }
 0x195   : > { %v2927_v3 = vpack.c.b16 %v2919_v15, %v5975_v26  ;;  %v1362_v25 = vrot.slane %v1361_v23, 2  ;;  %v1369_v61 = vrot.slane %v1368_v18, 2  ;;  %v6047_v63 = vunpack.c.l.b16 %v2491_v16 }
 0x196   : > { %v1356_v34 = vmax.f32 %v1354_v45, %v1355_v10  ;;  %v1376_v19 = vrot.slane %v1375_v2, 2  ;;  %v767_v59 = vadd.f32 %v5826_v58, %v731_v46  ;;  %v2883_v5 = vpack.c.b16 %v6045_v32, %v6045_v32 }
 0x197   : > { %v2960_v42 = vshrl.u32 %v2927_v3, 16  ;;  %v2962_v8 = vshll.u32 %v2927_v3, 16  ;;  %v1363_v17 = vmax.f32 %v1361_v23, %v1362_v25  ;;  %v1370_v9 = vmax.f32 %v1368_v18, %v1369_v61 }
 0x198   : > { %v1357_v53 = vrot.slane %v1356_v34, 1  ;;  %v1377_v26 = vmax.f32 %v1375_v2, %v1376_v19  ;;  %v799_v36 = vmax.f32 %v767_v59, 0.0  ;;  %v2716_v39 = vpack.c.b16 %v6047_v63, %v6047_v63  ;;  %v2507_v19 = vld [vmem:[#allocation2 + $0x10] sm:$0xe]  ;;  %v667_v59 = vpop.f32.mrf.mxu0 }
 0x199   : > { %v2964_v35 = vrot.slane %v2962_v8, 1  ;;  %v1364_v11 = vrot.slane %v1363_v17, 1  ;;  %v1371_v31 = vrot.slane %v1370_v9, 1  ;;  %v2748_v30 = vunpack.c.l.b16 %v6050_v27 }
 0x19a   : > { %v1358_v41 = vmax.f32 %v1356_v34, %v1357_v53  ;;  %v1378_v58 = vrot.slane %v1377_v26, 1  ;;  %v887_v37 = vrot.slane %v799_v36, 2  ;;  %v888_v52 = vrot.slane %v799_v36, 4 }
 0x19b   : > { %v2965_v38 = vor.u32 %v2964_v35, %v2960_v42  ;;  %v1365_v51 = vmax.f32 %v1363_v17, %v1364_v11  ;;  %v1372_v43 = vmax.f32 %v1370_v9, %v1371_v31  ;;  %v889_v55 = vrot.slane %v799_v36, 6  ;;  %v2433_v35 = vld [vmem:[#allocation2 + $0x1c] sm:$0x1] }
 0x19c   : > { %v2002_v20 = vsel %vm1940_vm3, %v1358_v41, -inf  ;;  %v1379_v56 = vmax.f32 %v1377_v26, %v1378_v58  ;;  %v1380_v62 = vsel %vm1043_vm2, %v799_v36, -inf  ;;  %v1387_v21 = vsel %vm1043_vm2, %v887_v37, -inf  ;;  %2725 = vrot.lane.b32.xlu2 %v2716_v39, %s5371_s17 }
 0x19d   : > { %v2003_v24 = vmax.f32 %v5998_v57, %v2002_v20  ;;  %2995 = vrot.lane.b32.xlu1 %v2965_v38, %s5371_s17  ;;  %v2005_v45 = vsel %vm1940_vm3, %v1365_v51, -inf  ;;  %v2008_v1 = vsel %vm1940_vm3, %v1372_v43, -inf  ;;  %v1381_v47 = vrot.slane %v1380_v62, 4 }
 0x19e   : > { %v1388_v6 = vrot.slane %v1387_v21, 4  ;;  %v2006_v48 = vmax.f32 %v6003_v4, %v2005_v45  ;;  %v2009_v0 = vmax.f32 %v6006_v7, %v2008_v1  ;;  %v2011_v57 = vsel %vm1940_vm3, %v1379_v56, -inf }
 0x19f   : > { %v2153_v44 = vpack.c.bf16 %v2003_v24, %v2003_v24  ;;  %v2012_v14 = vmax.f32 %v6009_v60, %v2011_v57  ;;  %v1382_v16 = vmax.f32 %v1380_v62, %v1381_v47  ;;  %v1394_v23 = vsel %vm1043_vm2, %v888_v52, -inf  ;;  %v6087_v24 = vld [vmem:[#allocation2 + $0x14] sm:$0x1]  ;;  %v2484_v62 = vld [vmem:[#allocation2 + $0x10] sm:$0xe]  ;;  %v705_v47 = vpop.f32.mrf.mxu3 }
 0x1a0   : > { %v1389_v10 = vmax.f32 %v1387_v21, %v1388_v6  ;;  %v2154_v18 = vpack.c.bf16 %v2006_v48, %v2006_v48  ;;  %v2155_v2 = vpack.c.bf16 %v2009_v0, %v2009_v0  ;;  %v1395_v46 = vrot.slane %v1394_v23, 4  ;;  %v6094_v6 = vld [vmem:[%s7029_s3] ss:$0 sm:$0xff] }
 0x1a1   : > { %v2281_v3 = vunpack.c.l.b16 %v2153_v44  ;;  %v2156_v34 = vpack.c.bf16 %v2012_v14, %v2012_v14  ;;  %v1383_v25 = vrot.slane %v1382_v16, 2  ;;  %v1401_v4 = vsel %vm1043_vm2, %v889_v55, -inf }
 0x1a2   : > { %v1390_v61 = vrot.slane %v1389_v10, 2  ;;  %v2282_v7 = vunpack.c.l.b16 %v2154_v18  ;;  %v2283_v42 = vunpack.c.l.b16 %v2155_v2  ;;  %v1396_v60 = vmax.f32 %v1394_v23, %v1395_v46  ;;  %v6104_v23 = vld [vmem:[#allocation2 + $0x10] sm:$0xf] }
 0x1a3   : > { %v2346_v8 = vsel %vm2331_vm9, %v2281_v3, %v6038_v22  ;;  %v2284_v27 = vunpack.c.l.b16 %v2156_v34  ;;  %v1384_v53 = vmax.f32 %v1382_v16, %v1383_v25  ;;  %v1402_v9 = vrot.slane %v1401_v4, 4  ;;  %v2430_v22 = vld [vmem:[#allocation2 + $0x18] sm:$0xf]  ;;  %v670_v34 = vpop.f32.mrf.mxu0 }
 0x1a4   : > { %v1391_v17 = vmax.f32 %v1389_v10, %v1390_v61  ;;  %v2347_v26 = vsel %vm2333_vm10, %v2282_v7, %v2346_v8  ;;  %v1397_v36 = vrot.slane %v1396_v60, 2  ;;  %v2828_v39 = vunpack.c.l.b16 %v2507_v19 }
 0x1a5   : > { %2891 = vrot.lane.b32.xlu1 %v2883_v5, %s5372_s18  ;;  %v6076_v41 = vpack.c.b16 %v2748_v30, %v6047_v63  ;;  %v2348_v11 = vsel %vm2335_vm12, %v2283_v42, %v2347_v26  ;;  %v2384_v31 = vpack.c.b16 %v2284_v27, %v2284_v27  ;;  %v1385_v58 = vrot.slane %v1384_v53, 1  ;;  %v6084_v63 = vld [vmem:[%s7046_s2] ss:$0 sm:$0xff]  ;;  %s5321_s2 = scalar_lea.hbm %s5320_s1, 1 }
 0x1a6   : > { %v1392_v38 = vrot.slane %v1391_v17, 1  ;;  %v2383_v37 = vpack.c.b16 %v2348_v11, %v2348_v11  ;;  %v1398_v52 = vmax.f32 %v1396_v60, %v1397_v36  ;;  %v1403_v51 = vmax.f32 %v1401_v4, %v1402_v9  ;;  %p5322_p11 = scmp.ne.s32.totalorder %s5320_s1, %s5321_s2  ;;  %p5327_p1 = scmp.lt.s32.totalorder %s5325_s26, %s5321_s2 }
 0x1a7   : > { %v2836_v43 = vpack.c.b16 %v2748_v30, %v2828_v39  ;;  %v2434_v20 = vsel %vm5752_vm15, %v2384_v31, %v2433_v35  ;;  %v1386_v55 = vmax.f32 %v1384_v53, %v1385_v58  ;;  %v732_v5 = vmul.f32 %v6084_v63, %v667_v59 }
 0x1a8   : > { %v1393_v56 = vmax.f32 %v1391_v17, %v1392_v38  ;;  %v2431_v21 = vsel %vm5745_vm14, %v2383_v37, %v2430_v22  ;;  %2435 = vst [vmem:[#allocation2 + $0x1c] sm:$0x1] %v2434_v20  ;;  %v1399_v30 = vrot.slane %v1398_v52, 1  ;;  %v1404_v45 = vrot.slane %v1403_v51, 2  ;;  %p5323_p12 = pnand %p5322_p11, %p5477_p5  ;;  %p5328_p2 = por %p5327_p1, %p5326_p0 }
 0x1a9   : > { %v2844_v1 = vrot.slane %v2836_v43, 1  ;;  %2432 = vst [vmem:[#allocation2 + $0x18] sm:$0xf] %v2431_v21  ;;  %v768_v48 = vadd.f32 %v6094_v6, %v732_v5  ;;  %v747_v0 = vmul.f32 %v6084_v63, %v705_v47  ;;  %v2560_v57 = vunpack.c.l.b16 %v6087_v24  ;;  %v707_v24 = vpop.f32.mrf.mxu3 }
 0x1aa   : > { %v2661_v44 = vunpack.c.l.b16 %v2484_v62  ;;  %v6101_v14 = vsel %vm1940_vm3, %v1386_v55, -inf  ;;  %v6106_v18 = vmax.f32 %v1398_v52, %v1399_v30  ;;  %v1405_v2 = vmax.f32 %v1403_v51, %v1404_v45  ;;  %p5324_p13 = pneg %p5323_p12 }
 0x1ab   : > { %2853 = vrot.lane.b32.xlu0 %v2844_v1, %s5370_s16  ;;  %v800_v16 = vmax.f32 %v768_v48, 0.0  ;;  %v783_v10 = vadd.f32 %v6094_v6, %v747_v0  ;;  %v6109_v3 = vsel %vm1940_vm3, %v1393_v56, -inf  ;;  %v2559_v60 = vunpack.c.l.b16 %v6104_v23 }
 0x1ac   : > { %v2669_v46 = vpack.c.b16 %v2560_v57, %v2661_v44  ;;  %v733_v17 = vmul.f32 %v6084_v63, %v670_v34  ;;  %v1406_v9 = vrot.slane %v1405_v2, 1  ;;  %vm434_vm7 = vcmask 518144   ;;  %p5329_p3 = pnand %p5328_p2, %p5324_p13 }
 0x1ad   : > { %v890_v25 = vrot.slane %v800_v16, 2  ;;  %v891_v61 = vrot.slane %v800_v16, 4  ;;  %v892_v4 = vrot.slane %v800_v16, 6  ;;  %v1408_v19 = vsel %vm1043_vm2, %v800_v16, -inf  ;;  %436 = vst.msk [vmem:[#allocation3 + $0x4] sm:$0x7] %vm434_vm7, %v5369_v54 }
 0x1ae   : > { %v1409_v7 = vrot.slane %v1408_v19, 4  ;;  %v815_v42 = vmax.f32 %v783_v10, 0.0  ;;  %v2677_v8 = vrot.slane %v2669_v46, 1  ;;  %435 = vst.msk [vmem:[#allocation3] sm:$0x7] %vm434_vm7, %v5369_v54 }
 0x1af   : > { %v1415_v59 = vsel %vm1043_vm2, %v890_v25, -inf  ;;  %v1422_v27 = vsel %vm1043_vm2, %v891_v61, -inf  ;;  %v1429_v53 = vsel %vm1043_vm2, %v892_v4, -inf  ;;  %v1407_v25 = vmax.f32 %v1405_v2, %v1406_v9  ;;  %437 = vst.msk [vmem:[#allocation3 + $0x8] sm:$0x7] %vm434_vm7, %v5369_v54 }
 0x1b0   : > { %v1410_v26 = vmax.f32 %v1408_v19, %v1409_v7  ;;  %v1416_v35 = vrot.slane %v1415_v59, 4  ;;  %v1423_v36 = vrot.slane %v1422_v27, 4  ;;  %2687 = vrot.lane.b32.xlu2 %v2677_v8, %s5372_s18  ;;  %v1430_v39 = vrot.slane %v1429_v53, 4  ;;  %438 = vst.msk [vmem:[#allocation3 + $0xc] sm:$0x7] %vm434_vm7, %v5369_v54 }
 0x1b1   : > { %v935_v11 = vrot.slane %v815_v42, 2  ;;  %v936_v31 = vrot.slane %v815_v42, 4  ;;  %v937_v22 = vrot.slane %v815_v42, 6  ;;  %v1828_v52 = vsel %vm1043_vm2, %v815_v42, -inf  ;;  %439 = vst.msk [vmem:[#allocation3 + $0x10] sm:$0x7] %vm434_vm7, %v5369_v54 }
 0x1b2   : > { %v1411_v58 = vrot.slane %v1410_v26, 2  ;;  %v1417_v38 = vmax.f32 %v1415_v59, %v1416_v35  ;;  %v1424_v37 = vmax.f32 %v1422_v27, %v1423_v36  ;;  %v1431_v51 = vmax.f32 %v1429_v53, %v1430_v39  ;;  %v6124_v27 = vld [vmem:[#allocation2 + $0x14] sm:$0x1]  ;;  %440 = vst.msk [vmem:[#allocation3 + $0x14] sm:$0x7] %vm434_vm7, %v5369_v54 }
 0x1b3   : > { %v1829_v43 = vrot.slane %v1828_v52, 4  ;;  %v1835_v20 = vsel %vm1043_vm2, %v935_v11, -inf  ;;  %v1842_v55 = vsel %vm1043_vm2, %v936_v31, -inf  ;;  %v1849_v47 = vsel %vm1043_vm2, %v937_v22, -inf }
 0x1b4   : > { %v1412_v56 = vmax.f32 %v1410_v26, %v1411_v58  ;;  %v1418_v5 = vrot.slane %v1417_v38, 2  ;;  %v1425_v62 = vrot.slane %v1424_v37, 2  ;;  %v1836_v21 = vrot.slane %v1835_v20, 4 }
 0x1b5   : > { %v1432_v30 = vrot.slane %v1431_v51, 2  ;;  %v1830_v45 = vmax.f32 %v1828_v52, %v1829_v43  ;;  %v1843_v1 = vrot.slane %v1842_v55, 4  ;;  %v1850_v34 = vrot.slane %v1849_v47, 4 }
 0x1b6   : > { %v1413_v48 = vrot.slane %v1412_v56, 1  ;;  %v1419_v0 = vmax.f32 %v1417_v38, %v1418_v5  ;;  %v1426_v44 = vmax.f32 %v1424_v37, %v1425_v62  ;;  %v1837_v16 = vmax.f32 %v1835_v20, %v1836_v21 }
 0x1b7   : > { %v1433_v10 = vmax.f32 %v1431_v51, %v1432_v30  ;;  %v1831_v23 = vrot.slane %v1830_v45, 2  ;;  %v1844_v46 = vmax.f32 %v1842_v55, %v1843_v1  ;;  %v1851_v59 = vmax.f32 %v1849_v47, %v1850_v34 }
 0x1b8   : > { %v1420_v61 = vrot.slane %v1419_v0, 1  ;;  %v1427_v4 = vrot.slane %v1426_v44, 1  ;;  %v1838_v19 = vrot.slane %v1837_v16, 2  ;;  %v1414_v53 = vmax.f32 %v1412_v56, %v1413_v48 }
 0x1b9   : > { %v1434_v7 = vrot.slane %v1433_v10, 1  ;;  %v1832_v42 = vmax.f32 %v1830_v45, %v1831_v23  ;;  %v1845_v8 = vrot.slane %v1844_v46, 2  ;;  %v2573_v36 = vpack.c.b16 %v2560_v57, %v2559_v60 }
 0x1ba   : > { %v1421_v26 = vmax.f32 %v1419_v0, %v1420_v61  ;;  %v1839_v35 = vmax.f32 %v1837_v16, %v1838_v19  ;;  %v1428_v39 = vmax.f32 %v1426_v44, %v1427_v4  ;;  %v1852_v22 = vrot.slane %v1851_v59, 2 }
 0x1bb   : > { %v1833_v11 = vrot.slane %v1832_v42, 1  ;;  %v1846_v31 = vmax.f32 %v1844_v46, %v1845_v8  ;;  %v6130_v2 = vsel %vm1940_vm3, %v6106_v18, -inf  ;;  %v6133_v9 = vsel %vm1940_vm3, %v1407_v25, -inf }
 0x1bc   : > { %v1435_v58 = vmax.f32 %v1433_v10, %v1434_v7  ;;  %v2915_v38 = vunpack.c.l.b16 %v6124_v27  ;;  %v1840_v52 = vrot.slane %v1839_v35, 1  ;;  %v1853_v43 = vmax.f32 %v1851_v59, %v1852_v22 }
 0x1bd   : > { %v1834_v37 = vmax.f32 %v1832_v42, %v1833_v11  ;;  %v1847_v51 = vrot.slane %v1846_v31, 1  ;;  %v6137_v57 = vsel %vm1940_vm3, %v1414_v53, -inf  ;;  %v2596_v60 = vshll.u32 %v2573_v36, 16 }
 0x1be   : > { %v769_v20 = vadd.f32 %v6094_v6, %v733_v17  ;;  %v748_v18 = vmul.f32 %v6084_v63, %v707_v24  ;;  %v6142_v55 = vsel %vm1940_vm3, %v1421_v26, -inf  ;;  %v6145_v56 = vsel %vm1940_vm3, %v1428_v39, -inf }
 0x1bf   : > { %v1854_v5 = vrot.slane %v1853_v43, 1  ;;  %v6150_v62 = vpack.c.b16 %v2915_v38, %v6045_v32  ;;  %v2594_v21 = vshrl.u32 %v2573_v36, 16  ;;  %v2598_v30 = vrot.slane %v2596_v60, 1 }
 0x1c0   : > { %v801_v45 = vmax.f32 %v769_v20, 0.0  ;;  %v784_v1 = vadd.f32 %v6094_v6, %v748_v18  ;;  %v6154_v17 = vsel %vm1940_vm3, %v1435_v58, -inf  ;;  %v6156_v47 = vmax.f32 %v1839_v35, %v1840_v52 }
 0x1c1   : > { %v6158_v48 = vmax.f32 %v1846_v31, %v1847_v51  ;;  %v6161_v0 = vsel %vm1940_vm3, %v1834_v37, -inf  ;;  %v2599_v44 = vor.u32 %v2598_v30, %v2594_v21  ;;  %v6163_v23 = vmax.f32 %v1853_v43, %v1854_v5 }
 0x1c2   : > { %v893_v16 = vrot.slane %v801_v45, 2  ;;  %v894_v10 = vrot.slane %v801_v45, 4  ;;  %v895_v32 = vrot.slane %v801_v45, 6  ;;  %v1436_v46 = vsel %vm1043_vm2, %v801_v45, -inf }
 0x1c3   : > { %v816_v34 = vmax.f32 %v784_v1, 0.0  ;;  %v2934_v25 = vshll.u32 %v6150_v62, 16  ;;  %2639 = vrot.lane.b32.xlu0 %v2599_v44, %s5370_s16  ;;  %v1437_v61 = vrot.slane %v1436_v46, 4  ;;  %vm3883_vm8 = vsmask.f32 2306 }
 0x1c4   : > { %v1443_v4 = vsel %vm1043_vm2, %v893_v16, -inf  ;;  %v1450_v19 = vsel %vm1043_vm2, %v894_v10, -inf  ;;  %v1457_v7 = vsel %vm1043_vm2, %v895_v32, -inf  ;;  %v672_v32 = vpop.f32.mrf.mxu0 }
 0x1c5   : > { %v1444_v42 = vrot.slane %v1443_v4, 4  ;;  %v1451_v8 = vrot.slane %v1450_v19, 4  ;;  %v1458_v59 = vrot.slane %v1457_v7, 4  ;;  %v938_v53 = vrot.slane %v816_v34, 2 }
 0x1c6   : > { %v1438_v26 = vmax.f32 %v1436_v46, %v1437_v61  ;;  %v939_v35 = vrot.slane %v816_v34, 4  ;;  %v940_v36 = vrot.slane %v816_v34, 6  ;;  %v1856_v39 = vsel %vm1043_vm2, %v816_v34, -inf  ;;  %v710_v46 = vpop.f32.mrf.mxu3 }
 0x1c7   : > { %v1445_v11 = vmax.f32 %v1443_v4, %v1444_v42  ;;  %v1452_v31 = vmax.f32 %v1450_v19, %v1451_v8  ;;  %v1459_v22 = vmax.f32 %v1457_v7, %v1458_v59  ;;  %v1857_v58 = vrot.slane %v1856_v39, 4 }
 0x1c8   : > { %v1439_v37 = vrot.slane %v1438_v26, 2  ;;  %v1863_v52 = vsel %vm1043_vm2, %v938_v53, -inf  ;;  %v1870_v51 = vsel %vm1043_vm2, %v939_v35, -inf  ;;  %v1877_v43 = vsel %vm1043_vm2, %v940_v36, -inf }
 0x1c9   : > { %v1446_v24 = vrot.slane %v1445_v11, 2  ;;  %v1453_v60 = vrot.slane %v1452_v31, 2  ;;  %v1460_v20 = vrot.slane %v1459_v22, 2  ;;  %v1858_v18 = vmax.f32 %v1856_v39, %v1857_v58 }
 0x1ca   : > { %v1440_v5 = vmax.f32 %v1438_v26, %v1439_v37  ;;  %v1864_v21 = vrot.slane %v1863_v52, 4  ;;  %v1871_v30 = vrot.slane %v1870_v51, 4  ;;  %v1878_v45 = vrot.slane %v1877_v43, 4 }
 0x1cb   : > { %v1447_v1 = vmax.f32 %v1445_v11, %v1446_v24  ;;  %v1454_v44 = vmax.f32 %v1452_v31, %v1453_v60  ;;  %v1461_v16 = vmax.f32 %v1459_v22, %v1460_v20  ;;  %v1859_v10 = vrot.slane %v1858_v18, 2 }
 0x1cc   : > { %v1441_v34 = vrot.slane %v1440_v5, 1  ;;  %v1865_v61 = vmax.f32 %v1863_v52, %v1864_v21  ;;  %v1872_v4 = vmax.f32 %v1870_v51, %v1871_v30  ;;  %v1879_v19 = vmax.f32 %v1877_v43, %v1878_v45 }
 0x1cd   : > { %v1448_v7 = vrot.slane %v1447_v1, 1  ;;  %v1455_v42 = vrot.slane %v1454_v44, 1  ;;  %v1462_v8 = vrot.slane %v1461_v16, 1  ;;  %v1860_v59 = vmax.f32 %v1858_v18, %v1859_v10 }
 0x1ce   : > { %v1442_v53 = vmax.f32 %v1440_v5, %v1441_v34  ;;  %v1866_v35 = vrot.slane %v1865_v61, 2  ;;  %v1873_v26 = vrot.slane %v1872_v4, 2  ;;  %v1880_v36 = vrot.slane %v1879_v19, 2 }
 0x1cf   : > { %v1449_v39 = vmax.f32 %v1447_v1, %v1448_v7  ;;  %v1456_v58 = vmax.f32 %v1454_v44, %v1455_v42  ;;  %v1463_v11 = vmax.f32 %v1461_v16, %v1462_v8  ;;  %v1861_v31 = vrot.slane %v1860_v59, 1  ;;  %v712_v7 = vpop.f32.mrf.mxu3 }
 0x1d0   : > { %v2014_v22 = vsel %vm1940_vm3, %v1442_v53, -inf  ;;  %v1867_v37 = vmax.f32 %v1865_v61, %v1866_v35  ;;  %v1874_v24 = vmax.f32 %v1872_v4, %v1873_v26  ;;  %v1881_v60 = vmax.f32 %v1879_v19, %v1880_v36  ;;  %v675_v19 = vpop.f32.mrf.mxu0  ;;  %v2516_v53 = vld [vmem:[#allocation2 + $0x18] sm:$0xf] }
 0x1d1   : > { %v2015_v52 = vmax.f32 %v6101_v14, %v2014_v22  ;;  %v2017_v51 = vsel %vm1940_vm3, %v1449_v39, -inf  ;;  %v2020_v43 = vsel %vm1940_vm3, %v1456_v58, -inf  ;;  %v2023_v20 = vsel %vm1940_vm3, %v1463_v11, -inf  ;;  %v5195_v14 = vld [vmem:[%s7030_s4 + $0x88] sm:$0xff] }
 0x1d2   : > { %v2018_v18 = vmax.f32 %v6109_v3, %v2017_v51  ;;  %v2021_v5 = vmax.f32 %v6130_v2, %v2020_v43  ;;  %v2024_v21 = vmax.f32 %v6133_v9, %v2023_v20  ;;  %v2936_v30 = vrot.slane %v2934_v25, 1  ;;  %3429 = vmatpush.bf16.msrb.mxu3 %v5195_v14 }
 0x1d3   : > { %v2157_v45 = vpack.c.bf16 %v2015_v52, %v2015_v52  ;;  %v1862_v1 = vmax.f32 %v1860_v59, %v1861_v31  ;;  %v1868_v44 = vrot.slane %v1867_v37, 1  ;;  %v1875_v16 = vrot.slane %v1874_v24, 1 }
 0x1d4   : > { %v6190_v10 = vsel %vm1940_vm3, %v6156_v47, -inf  ;;  %v2158_v3 = vpack.c.bf16 %v2018_v18, %v2018_v18  ;;  %v2159_v34 = vpack.c.bf16 %v2021_v5, %v2021_v5  ;;  %v2932_v2 = vshrl.u32 %v6150_v62, 16 }
 0x1d5   : > { %v6195_v9 = vsel %vm1940_vm3, %v6158_v48, -inf  ;;  %v6199_v25 = vsel %vm1940_vm3, %v6163_v23, -inf  ;;  %v2160_v61 = vpack.c.bf16 %v2024_v21, %v2024_v21  ;;  %v1882_v4 = vrot.slane %v1881_v60, 1 }
 0x1d6   : > { %v2285_v42 = vunpack.c.l.b16 %v2157_v45  ;;  %v2286_v47 = vunpack.c.l.b16 %v2158_v3  ;;  %v2287_v8 = vunpack.c.l.b16 %v2159_v34  ;;  %v2937_v59 = vor.u32 %v2936_v30, %v2932_v2 }
 0x1d7   : > { %v1869_v35 = vmax.f32 %v1867_v37, %v1868_v44  ;;  %v1876_v62 = vmax.f32 %v1874_v24, %v1875_v16  ;;  %v6202_v26 = vsel %vm1940_vm3, %v1862_v1, -inf  ;;  %v734_v48 = vmul.f32 %v6084_v63, %v672_v32 }
 0x1d8   : > { %v2349_v23 = vsel %vm2325_vm4, %v2286_v47, %v2285_v42  ;;  %2987 = vrot.lane.b32.xlu2 %v2937_v59, %s5371_s17  ;;  %v749_v36 = vmul.f32 %v6084_v63, %v710_v46  ;;  %v735_v39 = vmul.f32 %v6084_v63, %v675_v19  ;;  %v750_v58 = vmul.f32 %v6084_v63, %v712_v7 }
 0x1d9   : > { %v2350_v11 = vsel %vm2327_vm5, %v2287_v8, %v2349_v23  ;;  %v6211_v31 = vmax.f32 %v1881_v60, %v1882_v4  ;;  %v770_v22 = vadd.f32 %v6094_v6, %v734_v48  ;;  %v6214_v37 = vunpack.c.l.b16 %v2516_v53 }
 0x1da   : > { %v2288_v24 = vunpack.c.l.b16 %v2160_v61  ;;  %v785_v32 = vadd.f32 %v6094_v6, %v749_v36  ;;  %v771_v52 = vadd.f32 %v6094_v6, %v735_v39  ;;  %v786_v51 = vadd.f32 %v6094_v6, %v750_v58 }
 0x1db   : > { %v6220_v46 = vsel %vm1940_vm3, %v1869_v35, -inf  ;;  %v6223_v43 = vsel %vm1940_vm3, %v1876_v62, -inf  ;;  %v802_v20 = vmax.f32 %v770_v22, 0.0  ;;  %v2884_v60 = vpack.c.b16 %v6214_v37, %v6214_v37 }
 0x1dc   : > { %v6228_v18 = vsel %vm2329_vm6, %v2288_v24, %v2350_v11  ;;  %v817_v5 = vmax.f32 %v785_v32, 0.0  ;;  %v6230_v21 = vmax.f32 %v771_v52, 0.0  ;;  %v6232_v30 = vmax.f32 %v786_v51, 0.0 }
 0x1dd   : > { %v896_v45 = vrot.slane %v802_v20, 2  ;;  %v897_v1 = vrot.slane %v802_v20, 4  ;;  %v898_v44 = vrot.slane %v802_v20, 6  ;;  %v1464_v16 = vsel %vm1043_vm2, %v802_v20, -inf  ;;  %2893 = vrot.lane.b32.xlu1 %v2884_v60, %s5372_s18 }
 0x1de   : > { %v1465_v14 = vrot.slane %v1464_v16, 4  ;;  %v941_v3 = vrot.slane %v817_v5, 2  ;;  %v942_v34 = vrot.slane %v817_v5, 4  ;;  %v943_v2 = vrot.slane %v817_v5, 6 }
 0x1df   : > { %v1471_v61 = vsel %vm1043_vm2, %v896_v45, -inf  ;;  %v1478_v4 = vsel %vm1043_vm2, %v897_v1, -inf  ;;  %v1485_v19 = vsel %vm1043_vm2, %v898_v44, -inf  ;;  %v1884_v7 = vsel %vm1043_vm2, %v817_v5, -inf }
 0x1e0   : > { %v1466_v42 = vmax.f32 %v1464_v16, %v1465_v14  ;;  %v1472_v47 = vrot.slane %v1471_v61, 4  ;;  %v1479_v8 = vrot.slane %v1478_v4, 4  ;;  %v1486_v59 = vrot.slane %v1485_v19, 4 }
 0x1e1   : > { %v1885_v53 = vrot.slane %v1884_v7, 4  ;;  %v1891_v35 = vsel %vm1043_vm2, %v941_v3, -inf  ;;  %v1898_v62 = vsel %vm1043_vm2, %v942_v34, -inf  ;;  %v1905_v48 = vsel %vm1043_vm2, %v943_v2, -inf }
 0x1e2   : > { %v1467_v23 = vrot.slane %v1466_v42, 2  ;;  %v1473_v36 = vmax.f32 %v1471_v61, %v1472_v47  ;;  %v1480_v39 = vmax.f32 %v1478_v4, %v1479_v8  ;;  %v1487_v58 = vmax.f32 %v1485_v19, %v1486_v59 }
 0x1e3   : > { %v1886_v11 = vmax.f32 %v1884_v7, %v1885_v53  ;;  %v1892_v22 = vrot.slane %v1891_v35, 4  ;;  %v1899_v24 = vrot.slane %v1898_v62, 4  ;;  %v1906_v32 = vrot.slane %v1905_v48, 4 }
 0x1e4   : > { %v1468_v52 = vmax.f32 %v1466_v42, %v1467_v23  ;;  %v1474_v51 = vrot.slane %v1473_v36, 2  ;;  %v1481_v20 = vrot.slane %v1480_v39, 2  ;;  %v1488_v60 = vrot.slane %v1487_v58, 2  ;;  %v5194_v42 = vld [vmem:[%s7030_s4 + $0x80] sm:$0xff] }
 0x1e5   : > { %v1887_v5 = vrot.slane %v1886_v11, 2  ;;  %v1893_v45 = vmax.f32 %v1891_v35, %v1892_v22  ;;  %v1900_v1 = vmax.f32 %v1898_v62, %v1899_v24  ;;  %v1907_v44 = vmax.f32 %v1905_v48, %v1906_v32  ;;  %3430 = vmatpush.bf16.msrb.mxu3 %v5194_v42  ;;  %v2439_v42 = vld [vmem:[#allocation2 + $0x24] sm:$0x1] }
 0x1e6   : > { %v1469_v16 = vrot.slane %v1468_v52, 1  ;;  %v1475_v14 = vmax.f32 %v1473_v36, %v1474_v51  ;;  %v1482_v3 = vmax.f32 %v1480_v39, %v1481_v20  ;;  %v1489_v34 = vmax.f32 %v1487_v58, %v1488_v60 }
 0x1e7   : > { %v1888_v2 = vmax.f32 %v1886_v11, %v1887_v5  ;;  %v1894_v61 = vrot.slane %v1893_v45, 2  ;;  %v1901_v4 = vrot.slane %v1900_v1, 2  ;;  %v1908_v19 = vrot.slane %v1907_v44, 2 }
 0x1e8   : > { %v1470_v7 = vmax.f32 %v1468_v52, %v1469_v16  ;;  %v1476_v47 = vrot.slane %v1475_v14, 1  ;;  %v1483_v8 = vrot.slane %v1482_v3, 1  ;;  %v1490_v59 = vrot.slane %v1489_v34, 1 }
 0x1e9   : > { %v1889_v53 = vrot.slane %v1888_v2, 1  ;;  %v1895_v35 = vmax.f32 %v1893_v45, %v1894_v61  ;;  %v1902_v62 = vmax.f32 %v1900_v1, %v1901_v4  ;;  %v1909_v48 = vmax.f32 %v1907_v44, %v1908_v19 }
 0x1ea   : > { %v1477_v23 = vmax.f32 %v1475_v14, %v1476_v47  ;;  %v1484_v36 = vmax.f32 %v1482_v3, %v1483_v8  ;;  %v1491_v39 = vmax.f32 %v1489_v34, %v1490_v59  ;;  %v2026_v58 = vsel %vm1940_vm3, %v1470_v7, -inf }
 0x1eb   : > { %v2027_v11 = vmax.f32 %v6137_v57, %v2026_v58  ;;  %v1890_v22 = vmax.f32 %v1888_v2, %v1889_v53  ;;  %v1896_v24 = vrot.slane %v1895_v35, 1  ;;  %v1903_v32 = vrot.slane %v1902_v62, 1 }
 0x1ec   : > { %v2029_v52 = vsel %vm1940_vm3, %v1477_v23, -inf  ;;  %v2032_v51 = vsel %vm1940_vm3, %v1484_v36, -inf  ;;  %v2035_v20 = vsel %vm1940_vm3, %v1491_v39, -inf  ;;  %v1910_v60 = vrot.slane %v1909_v48, 1 }
 0x1ed   : > { %v2030_v5 = vmax.f32 %v6142_v55, %v2029_v52  ;;  %v2033_v45 = vmax.f32 %v6145_v56, %v2032_v51  ;;  %v2036_v1 = vmax.f32 %v6154_v17, %v2035_v20  ;;  %v2161_v44 = vpack.c.bf16 %v2027_v11, %v2027_v11  ;;  %v2436_v11 = vld [vmem:[#allocation2 + $0x20] sm:$0xf] }
 0x1ee   : > { %v1897_v16 = vmax.f32 %v1895_v35, %v1896_v24  ;;  %v1904_v14 = vmax.f32 %v1902_v62, %v1903_v32  ;;  %v1911_v57 = vmax.f32 %v1909_v48, %v1910_v60  ;;  %v2110_v3 = vsel %vm1940_vm3, %v1890_v22, -inf }
 0x1ef   : > { %v2162_v34 = vpack.c.bf16 %v2030_v5, %v2030_v5  ;;  %v2163_v2 = vpack.c.bf16 %v2033_v45, %v2033_v45  ;;  %v2164_v61 = vpack.c.bf16 %v2036_v1, %v2036_v1  ;;  %v2289_v4 = vunpack.c.l.b16 %v2161_v44 }
 0x1f0   : > { %v2111_v19 = vmax.f32 %v6161_v0, %v2110_v3  ;;  %v2113_v7 = vsel %vm1940_vm3, %v1897_v16, -inf  ;;  %v2116_v55 = vsel %vm1940_vm3, %v1904_v14, -inf  ;;  %v2119_v56 = vsel %vm1940_vm3, %v1911_v57, -inf }
 0x1f1   : > { %v2290_v47 = vunpack.c.l.b16 %v2162_v34  ;;  %v2291_v17 = vunpack.c.l.b16 %v2163_v2  ;;  %v2292_v8 = vunpack.c.l.b16 %v2164_v61  ;;  %v2352_v59 = vsel %vm2331_vm9, %v2289_v4, %v6228_v18 }
 0x1f2   : > { %v2114_v53 = vmax.f32 %v6190_v10, %v2113_v7  ;;  %v2117_v35 = vmax.f32 %v6195_v9, %v2116_v55  ;;  %v2120_v62 = vmax.f32 %v6199_v25, %v2119_v56  ;;  %v2189_v0 = vpack.c.bf16 %v2111_v19, %v2111_v19 }
 0x1f3   : > { %v2353_v48 = vsel %vm2333_vm10, %v2290_v47, %v2352_v59  ;;  %v2386_v23 = vpack.c.b16 %v2292_v8, %v2292_v8  ;;  %v899_v36 = vrot.slane %v6230_v21, 2  ;;  %v900_v39 = vrot.slane %v6230_v21, 4 }
 0x1f4   : > { %v2354_v58 = vsel %vm2335_vm12, %v2291_v17, %v2353_v48  ;;  %v2190_v22 = vpack.c.bf16 %v2114_v53, %v2114_v53  ;;  %v2191_v18 = vpack.c.bf16 %v2117_v35, %v2117_v35  ;;  %v2192_v24 = vpack.c.bf16 %v2120_v62, %v2120_v62 }
 0x1f5   : > { %v2385_v32 = vpack.c.b16 %v2354_v58, %v2354_v58  ;;  %v2440_v10 = vsel %vm5752_vm15, %v2386_v23, %v2439_v42  ;;  %v2317_v9 = vunpack.c.l.b16 %v2189_v0  ;;  %v901_v25 = vrot.slane %v6230_v21, 6 }
 0x1f6   : > { %v6273_v52 = vsel %vm1940_vm3, %v6211_v31, -inf  ;;  %2441 = vst [vmem:[#allocation2 + $0x24] sm:$0x1] %v2440_v10  ;;  %v2318_v51 = vunpack.c.l.b16 %v2190_v22  ;;  %v2319_v20 = vunpack.c.l.b16 %v2191_v18  ;;  %v1492_v60 = vsel %vm1043_vm2, %v6230_v21, -inf  ;;  %v2531_v10 = vld [vmem:[#allocation2 + $0x10] sm:$0xe] }
 0x1f7   : > { %v2437_v5 = vsel %vm5745_vm14, %v2385_v32, %v2436_v11  ;;  %v1493_v45 = vrot.slane %v1492_v60, 4  ;;  %v1499_v1 = vsel %vm1043_vm2, %v899_v36, -inf  ;;  %v1506_v44 = vsel %vm1043_vm2, %v900_v39, -inf  ;;  %v2508_v11 = vld [vmem:[#allocation2 + $0x18] sm:$0xe] }
 0x1f8   : > { %2438 = vst [vmem:[#allocation2 + $0x20] sm:$0xf] %v2437_v5  ;;  %v2373_v16 = vsel %vm2325_vm4, %v2318_v51, %v2317_v9  ;;  %v1500_v14 = vrot.slane %v1499_v1, 4  ;;  %v1507_v31 = vrot.slane %v1506_v44, 4  ;;  %v1513_v57 = vsel %vm1043_vm2, %v901_v25, -inf }
 0x1f9   : > { %v2320_v3 = vunpack.c.l.b16 %v2192_v24  ;;  %v1494_v34 = vmax.f32 %v1492_v60, %v1493_v45  ;;  %v1514_v2 = vrot.slane %v1513_v57, 4  ;;  %v944_v21 = vrot.slane %v6232_v30, 2  ;;  %v6292_v32 = vld [vmem:[#allocation2 + $0x1c] sm:$0x1] }
 0x1fa   : > { %v2374_v61 = vsel %vm2327_vm5, %v2319_v20, %v2373_v16  ;;  %v1501_v4 = vmax.f32 %v1499_v1, %v1500_v14  ;;  %v1508_v19 = vmax.f32 %v1506_v44, %v1507_v31  ;;  %v945_v7 = vrot.slane %v6232_v30, 4 }
 0x1fb   : > { %v1495_v55 = vrot.slane %v1494_v34, 2  ;;  %v1515_v56 = vmax.f32 %v1513_v57, %v1514_v2  ;;  %v946_v47 = vrot.slane %v6232_v30, 6  ;;  %v1912_v17 = vsel %vm1043_vm2, %v6232_v30, -inf }
 0x1fc   : > { %v1502_v8 = vrot.slane %v1501_v4, 2  ;;  %v1509_v59 = vrot.slane %v1508_v19, 2  ;;  %v1913_v42 = vrot.slane %v1912_v17, 4  ;;  %v1919_v53 = vsel %vm1043_vm2, %v944_v21, -inf }
 0x1fd   : > { %v1496_v35 = vmax.f32 %v1494_v34, %v1495_v55  ;;  %v1516_v62 = vrot.slane %v1515_v56, 2  ;;  %v1920_v0 = vrot.slane %v1919_v53, 4  ;;  %v1926_v48 = vsel %vm1043_vm2, %v945_v7, -inf }
 0x1fe   : > { %v1503_v23 = vmax.f32 %v1501_v4, %v1502_v8  ;;  %v1510_v36 = vmax.f32 %v1508_v19, %v1509_v59  ;;  %v1914_v39 = vmax.f32 %v1912_v17, %v1913_v42  ;;  %v1927_v58 = vrot.slane %v1926_v48, 4  ;;  %v677_v4 = vpop.f32.mrf.mxu0  ;;  %v6298_v19 = vld [vmem:[#allocation2 + $0x1c] sm:$0x1]  ;;  %v2532_v17 = vld [vmem:[#allocation2 + $0x18] sm:$0xe] }
 0x1ff   : > { %v1497_v22 = vrot.slane %v1496_v35, 1  ;;  %v1517_v18 = vmax.f32 %v1515_v56, %v1516_v62  ;;  %v1921_v24 = vmax.f32 %v1919_v53, %v1920_v0  ;;  %v1933_v30 = vsel %vm1043_vm2, %v946_v47, -inf }
 0x200   : > { %v1504_v9 = vrot.slane %v1503_v23, 1  ;;  %v1511_v25 = vrot.slane %v1510_v36, 1  ;;  %v1915_v51 = vrot.slane %v1914_v39, 2  ;;  %v1928_v20 = vmax.f32 %v1926_v48, %v1927_v58 }
 0x201   : > { %v1518_v60 = vrot.slane %v1517_v18, 1  ;;  %v1922_v5 = vrot.slane %v1921_v24, 2  ;;  %v1934_v45 = vrot.slane %v1933_v30, 4  ;;  %v2829_v1 = vunpack.c.l.b16 %v2508_v11 }
 0x202   : > { %v1916_v44 = vmax.f32 %v1914_v39, %v1915_v51  ;;  %v1929_v16 = vrot.slane %v1928_v20, 2  ;;  %v2749_v14 = vunpack.c.l.b16 %v6292_v32  ;;  %v3011_v31 = vunpack.c.l.b16 %v2531_v10 }
 0x203   : > { %v2375_v57 = vsel %vm2329_vm6, %v2320_v3, %v2374_v61  ;;  %v6296_v34 = vmax.f32 %v1496_v35, %v1497_v22  ;;  %v1923_v2 = vmax.f32 %v1921_v24, %v1922_v5  ;;  %v1935_v21 = vmax.f32 %v1933_v30, %v1934_v45 }
 0x204   : > { %v6300_v7 = vmax.f32 %v1503_v23, %v1504_v9  ;;  %v6302_v55 = vmax.f32 %v1510_v36, %v1511_v25  ;;  %v1917_v56 = vrot.slane %v1916_v44, 1  ;;  %v1930_v47 = vmax.f32 %v1928_v20, %v1929_v16 }
 0x205   : > { %v6304_v8 = vmax.f32 %v1517_v18, %v1518_v60  ;;  %v1924_v59 = vrot.slane %v1923_v2, 1  ;;  %v1936_v42 = vrot.slane %v1935_v21, 2  ;;  %v2837_v3 = vpack.c.b16 %v2749_v14, %v2829_v1 }
 0x206   : > { %v1918_v61 = vmax.f32 %v1916_v44, %v1917_v56  ;;  %v1931_v53 = vrot.slane %v1930_v47, 1  ;;  %v736_v35 = vmul.f32 %v6084_v63, %v677_v4  ;;  %v2916_v62 = vunpack.c.l.b16 %v6298_v19 }
 0x207   : > { %v1925_v0 = vmax.f32 %v1923_v2, %v1924_v59  ;;  %v1937_v48 = vmax.f32 %v1935_v21, %v1936_v42  ;;  %v2845_v23 = vrot.slane %v2837_v3, 1  ;;  %v3012_v36 = vunpack.c.l.b16 %v2532_v17  ;;  %v680_v42 = vpop.f32.mrf.mxu0 }
 0x208   : > { %v1932_v39 = vmax.f32 %v1930_v47, %v1931_v53  ;;  %v2122_v58 = vsel %vm1940_vm3, %v1918_v61, -inf  ;;  %v772_v11 = vadd.f32 %v6094_v6, %v736_v35  ;;  %v3019_v22 = vpack.c.b16 %v2915_v38, %v3011_v31 }
 0x209   : > { %v1938_v18 = vrot.slane %v1937_v48, 1  ;;  %v2123_v24 = vmax.f32 %v6202_v26, %v2122_v58  ;;  %v2125_v30 = vsel %vm1940_vm3, %v1925_v0, -inf  ;;  %2855 = vrot.lane.b32.xlu0 %v2845_v23, %s5370_s16  ;;  %v3020_v10 = vpack.c.b16 %v2916_v62, %v3012_v36 }
 0x20a   : > { %v2126_v9 = vmax.f32 %v6220_v46, %v2125_v30  ;;  %v2128_v25 = vsel %vm1940_vm3, %v1932_v39, -inf  ;;  %v804_v51 = vmax.f32 %v772_v11, 0.0  ;;  %v3027_v20 = vrot.slane %v3019_v22, 1  ;;  %v2463_v22 = vld [vmem:[#allocation2 + $0x44] sm:$0x1] }
 0x20b   : > { %v1939_v60 = vmax.f32 %v1937_v48, %v1938_v18  ;;  %v2129_v5 = vmax.f32 %v6223_v43, %v2128_v25  ;;  %v2193_v45 = vpack.c.bf16 %v2123_v24, %v2123_v24  ;;  %v3028_v27 = vrot.slane %v3020_v10, 1  ;;  %v2460_v48 = vld [vmem:[#allocation2 + $0x40] sm:$0xf] }
 0x20c   : > { %v2194_v38 = vpack.c.bf16 %v2126_v9, %v2126_v9  ;;  %v902_v1 = vrot.slane %v804_v51, 2  ;;  %v903_v44 = vrot.slane %v804_v51, 4  ;;  %v904_v26 = vrot.slane %v804_v51, 6 }
 0x20d   : > { %v2131_v16 = vsel %vm1940_vm3, %v1939_v60, -inf  ;;  %v2195_v31 = vpack.c.bf16 %v2129_v5, %v2129_v5  ;;  %v2321_v2 = vunpack.c.l.b16 %v2193_v45  ;;  %v1520_v21 = vsel %vm1043_vm2, %v804_v51, -inf  ;;  %v2492_v5 = vld [vmem:[#allocation2 + $0x18] sm:$0xf]  ;;  %v2477_v45 = vld [vmem:[#allocation2 + $0x1c] sm:$0x1] }
 0x20e   : > { %v2132_v46 = vmax.f32 %v6273_v52, %v2131_v16  ;;  %v2322_v4 = vunpack.c.l.b16 %v2194_v38  ;;  %v1521_v19 = vrot.slane %v1520_v21, 4  ;;  %v1527_v56 = vsel %vm1043_vm2, %v902_v1, -inf }
 0x20f   : > { %v2323_v47 = vunpack.c.l.b16 %v2195_v31  ;;  %v2376_v43 = vsel %vm2331_vm9, %v2321_v2, %v2375_v57  ;;  %v1528_v17 = vrot.slane %v1527_v56, 4  ;;  %v1534_v59 = vsel %vm1043_vm2, %v903_v44, -inf }
 0x210   : > { %v2196_v3 = vpack.c.bf16 %v2132_v46, %v2132_v46  ;;  %v2377_v61 = vsel %vm2333_vm10, %v2322_v4, %v2376_v43  ;;  %v1522_v53 = vmax.f32 %v1520_v21, %v1521_v19  ;;  %v1535_v35 = vrot.slane %v1534_v59, 4 }
 0x211   : > { %v2378_v0 = vsel %vm2335_vm12, %v2323_v47, %v2377_v61  ;;  %v1529_v52 = vmax.f32 %v1527_v56, %v1528_v17  ;;  %v1541_v23 = vsel %vm1043_vm2, %v904_v26, -inf  ;;  %v3167_v36 = vunpack.c.l.b16 %v3027_v20  ;;  %v2485_v26 = vld [vmem:[#allocation2 + $0x18] sm:$0xe]  ;;  %v682_v61 = vpop.f32.mrf.mxu0 }
 0x212   : > { %v2324_v39 = vunpack.c.l.b16 %v2196_v3  ;;  %v2393_v58 = vpack.c.b16 %v2378_v0, %v2378_v0  ;;  %v1523_v11 = vrot.slane %v1522_v53, 2  ;;  %v1536_v57 = vmax.f32 %v1534_v59, %v1535_v35  ;;  %v6339_v47 = vld [vmem:[#allocation2 + $0x18] sm:$0xf] }
 0x213   : > { %v1530_v18 = vrot.slane %v1529_v52, 2  ;;  %v1542_v24 = vrot.slane %v1541_v23, 4  ;;  %v3170_v30 = vunpack.c.l.b16 %v3028_v27  ;;  %v2924_v10 = vpack.c.b16 %v2916_v62, %v6214_v37 }
 0x214   : > { %v2394_v9 = vpack.c.b16 %v2324_v39, %v2324_v39  ;;  %v2461_v25 = vsel %vm5745_vm14, %v2393_v58, %v2460_v48  ;;  %v1524_v51 = vmax.f32 %v1522_v53, %v1523_v11  ;;  %v1537_v60 = vrot.slane %v1536_v57, 2  ;;  %v2495_v53 = vld [vmem:[#allocation2 + $0x30] sm:$0xf] }
 0x215   : > { %v6334_v20 = vsel %vm1940_vm3, %v6296_v34, -inf  ;;  %2462 = vst [vmem:[#allocation2 + $0x40] sm:$0xf] %v2461_v25  ;;  %v1531_v38 = vmax.f32 %v1529_v52, %v1530_v18  ;;  %v1543_v1 = vmax.f32 %v1541_v23, %v1542_v24  ;;  %v3227_v44 = vpack.c.b16 %v3170_v30, %v3167_v36 }
 0x216   : > { %v2464_v37 = vsel %vm5752_vm15, %v2394_v9, %v2463_v22  ;;  %v1525_v62 = vrot.slane %v1524_v51, 1  ;;  %v1538_v27 = vmax.f32 %v1536_v57, %v1537_v60  ;;  %v2941_v16 = vshll.u32 %v2924_v10, 16 }
 0x217   : > { %2465 = vst [vmem:[#allocation2 + $0x44] sm:$0x1] %v2464_v37  ;;  %v1532_v31 = vrot.slane %v1531_v38, 1  ;;  %v1544_v2 = vrot.slane %v1543_v1, 2  ;;  %4976 = vmatmul.msk.bf16.vlgmr.msrb.gmra.mxu3 %vm1940_vm3, %v3227_v44  ;;  %v2939_v21 = vshrl.u32 %v2924_v10, 16  ;;  %v2709_v46 = vunpack.c.l.b16 %v2492_v5 }
 0x218   : > { %v1539_v34 = vrot.slane %v1538_v27, 1  ;;  %v2943_v4 = vrot.slane %v2941_v16, 1  ;;  %v2562_v19 = vunpack.c.l.b16 %v2477_v45  ;;  %v2662_v56 = vunpack.c.l.b16 %v2485_v26 }
 0x219   : > { %v6343_v43 = vsel %vm1940_vm3, %v6300_v7, -inf  ;;  %v1545_v17 = vmax.f32 %v1543_v1, %v1544_v2  ;;  %v2717_v59 = vpack.c.b16 %v2709_v46, %v2709_v46  ;;  %v6347_v3 = vpack.c.b16 %v2749_v14, %v2709_v46 }
 0x21a   : > { %v1526_v35 = vmax.f32 %v1524_v51, %v1525_v62  ;;  %v1533_v0 = vmax.f32 %v1531_v38, %v1532_v31  ;;  %v2944_v48 = vor.u32 %v2943_v4, %v2939_v21  ;;  %v2670_v52 = vpack.c.b16 %v2562_v19, %v2662_v56 }
 0x21b   : > { %v1540_v23 = vmax.f32 %v1538_v27, %v1539_v34  ;;  %v1546_v36 = vrot.slane %v1545_v17, 1  ;;  %2727 = vrot.lane.b32.xlu1 %v2717_v59, %s5371_s17  ;;  %v737_v39 = vmul.f32 %v6084_v63, %v680_v42  ;;  %v2561_v7 = vunpack.c.l.b16 %v6339_v47 }
 0x21c   : > { %v6354_v58 = vsel %vm1940_vm3, %v6302_v55, -inf  ;;  %2989 = vrot.lane.b32.xlu2 %v2944_v48, %s5371_s17  ;;  %v2678_v32 = vrot.slane %v2670_v52, 1  ;;  %v738_v14 = vmul.f32 %v6084_v63, %v682_v61  ;;  %v6358_v11 = vunpack.c.l.b16 %v2495_v53 }
 0x21d   : > { %v6362_v57 = vsel %vm1940_vm3, %v6304_v8, -inf  ;;  %v1547_v22 = vmax.f32 %v1545_v17, %v1546_v36  ;;  %v773_v42 = vadd.f32 %v6094_v6, %v737_v39  ;;  %v2574_v18 = vpack.c.b16 %v2562_v19, %v2561_v7  ;;  %v6397_v39 = vpop.permute.xlu0 %2635 }
 0x21e   : > { %v6366_v24 = vsel %vm1940_vm3, %v1526_v35, -inf  ;;  %v6369_v55 = vsel %vm1940_vm3, %v1533_v0, -inf  ;;  %2689 = vrot.lane.b32.xlu0 %v2678_v32, %s5372_s18  ;;  %v774_v63 = vadd.f32 %v6094_v6, %v738_v14  ;;  %v6376_v30 = vpack.c.b16 %v2752_v13, %v6358_v11  ;;  %v6393_v0 = vpop.permute.xlu2 %2683 }
 0x21f   : > { %v6379_v8 = vsel %vm1940_vm3, %v1540_v23, -inf  ;;  %v6382_v10 = vsel %vm1940_vm3, %v1547_v22, -inf  ;;  %v805_v9 = vmax.f32 %v773_v42, 0.0  ;;  %v2603_v25 = vshll.u32 %v2574_v18, 16  ;;  %v5185_v42 = vld [vmem:[%s7030_s4 + $0x38] sm:$0xff] }
 0x220   : > { %v2601_v51 = vshrl.u32 %v2574_v18, 16  ;;  %v806_v60 = vmax.f32 %v774_v63, 0.0  ;;  %v2799_v5 = vshrl.u32 %v6376_v30, 16  ;;  %v2801_v45 = vshll.u32 %v6376_v30, 16  ;;  %3365 = vmatpush.bf16.msrb.mxu1 %v5185_v42 }
 0x221   : > { %v905_v6 = vrot.slane %v805_v9, 2  ;;  %v906_v38 = vrot.slane %v805_v9, 4  ;;  %v907_v1 = vrot.slane %v805_v9, 6  ;;  %v1548_v12 = vsel %vm1043_vm2, %v805_v9, -inf }
 0x222   : > { %v1549_v13 = vrot.slane %v1548_v12, 4  ;;  %v2605_v44 = vrot.slane %v2603_v25, 1  ;;  %v908_v26 = vrot.slane %v806_v60, 2  ;;  %v909_v37 = vrot.slane %v806_v60, 4 }
 0x223   : > { %v1555_v62 = vsel %vm1043_vm2, %v905_v6, -inf  ;;  %v1562_v27 = vsel %vm1043_vm2, %v906_v38, -inf  ;;  %v1569_v16 = vsel %vm1043_vm2, %v907_v1, -inf  ;;  %v910_v31 = vrot.slane %v806_v60, 6  ;;  %v5184_v1 = vld [vmem:[%s7030_s4 + $0x30] sm:$0xff] }
 0x224   : > { %v1550_v2 = vmax.f32 %v1548_v12, %v1549_v13  ;;  %v1556_v21 = vrot.slane %v1555_v62, 4  ;;  %v1563_v46 = vrot.slane %v1562_v27, 4  ;;  %v1570_v34 = vrot.slane %v1569_v16, 4  ;;  %3366 = vmatpush.bf16.msrb.mxu1 %v5184_v1 }
 0x225   : > { %v2606_v4 = vor.u32 %v2605_v44, %v2601_v51  ;;  %v1576_v19 = vsel %vm1043_vm2, %v806_v60, -inf  ;;  %v1583_v56 = vsel %vm1043_vm2, %v908_v26, -inf  ;;  %v1590_v17 = vsel %vm1043_vm2, %v909_v37, -inf }
 0x226   : > { %v1551_v59 = vrot.slane %v1550_v2, 2  ;;  %v1557_v61 = vmax.f32 %v1555_v62, %v1556_v21  ;;  %v1564_v53 = vmax.f32 %v1562_v27, %v1563_v46  ;;  %v1571_v35 = vmax.f32 %v1569_v16, %v1570_v34 }
 0x227   : > { %2641 = vrot.lane.b32.xlu1 %v2606_v4, %s5370_s16  ;;  %v1577_v48 = vrot.slane %v1576_v19, 4  ;;  %v1584_v52 = vrot.slane %v1583_v56, 4  ;;  %v1591_v23 = vrot.slane %v1590_v17, 4  ;;  %v1597_v36 = vsel %vm1043_vm2, %v910_v31, -inf  ;;  %v6405_v31 = vpop.permute.xlu1 %2723 }
 0x228   : > { %v1552_v7 = vmax.f32 %v1550_v2, %v1551_v59  ;;  %v1558_v32 = vrot.slane %v1557_v61, 2  ;;  %v1565_v14 = vrot.slane %v1564_v53, 2  ;;  %v1572_v22 = vrot.slane %v1571_v35, 2  ;;  %v5183_v59 = vld [vmem:[%s7030_s4 + $0x28] sm:$0xff] }
 0x229   : > { %v1578_v18 = vmax.f32 %v1576_v19, %v1577_v48  ;;  %v1585_v63 = vmax.f32 %v1583_v56, %v1584_v52  ;;  %v1592_v9 = vmax.f32 %v1590_v17, %v1591_v23  ;;  %v1598_v25 = vrot.slane %v1597_v36, 4  ;;  %3367 = vmatpush.bf16.msrb.mxu1 %v5183_v59 }
 0x22a   : > { %v1553_v51 = vrot.slane %v1552_v7, 1  ;;  %v1559_v60 = vmax.f32 %v1557_v61, %v1558_v32  ;;  %v1566_v6 = vmax.f32 %v1564_v53, %v1565_v14  ;;  %v1573_v38 = vmax.f32 %v1571_v35, %v1572_v22  ;;  %v6415_v32 = vpop.permute.xlu2 %2899  ;;  %v6417_v14 = vpop.permute.xlu0 %2851 }
 0x22b   : > { %v1579_v12 = vrot.slane %v1578_v18, 2  ;;  %v1586_v13 = vrot.slane %v1585_v63, 2  ;;  %v1593_v44 = vrot.slane %v1592_v9, 2  ;;  %v1599_v26 = vmax.f32 %v1597_v36, %v1598_v25 }
 0x22c   : > { %v1554_v37 = vmax.f32 %v1552_v7, %v1553_v51  ;;  %v1560_v62 = vrot.slane %v1559_v60, 1  ;;  %v1567_v27 = vrot.slane %v1566_v6, 1  ;;  %v1574_v16 = vrot.slane %v1573_v38, 1 }
 0x22d   : > { %v1580_v2 = vmax.f32 %v1578_v18, %v1579_v12  ;;  %v1587_v21 = vmax.f32 %v1585_v63, %v1586_v13  ;;  %v1594_v46 = vmax.f32 %v1592_v9, %v1593_v44  ;;  %v1600_v34 = vrot.slane %v1599_v26, 2  ;;  %v2517_v13 = vld [vmem:[#allocation2 + $0x20] sm:$0xf] }
 0x22e   : > { %v1561_v4 = vmax.f32 %v1559_v60, %v1560_v62  ;;  %v1568_v19 = vmax.f32 %v1566_v6, %v1567_v27  ;;  %v1575_v56 = vmax.f32 %v1573_v38, %v1574_v16  ;;  %v2038_v17 = vsel %vm1940_vm3, %v1554_v37, -inf  ;;  %v5182_v60 = vld [vmem:[%s7030_s4 + $0x20] sm:$0xff] }
 0x22f   : > { %v2039_v61 = vmax.f32 %v6334_v20, %v2038_v17  ;;  %v1581_v53 = vrot.slane %v1580_v2, 1  ;;  %v1588_v35 = vrot.slane %v1587_v21, 1  ;;  %v1595_v48 = vrot.slane %v1594_v46, 1  ;;  %3368 = vmatpush.bf16.msrb.mxu1 %v5182_v60  ;;  %v5180_v60 = vld [vmem:[%s7030_s4 + $0x10] sm:$0xff] }
 0x230   : > { %v2041_v52 = vsel %vm1940_vm3, %v1561_v4, -inf  ;;  %v2044_v23 = vsel %vm1940_vm3, %v1568_v19, -inf  ;;  %v2047_v36 = vsel %vm1940_vm3, %v1575_v56, -inf  ;;  %v1601_v7 = vmax.f32 %v1599_v26, %v1600_v34  ;;  %v2501_v26 = vld [vmem:[#allocation2 + $0x24] sm:$0x1]  ;;  %v6432_v19 = vpop.permute.xlu1 %2861  ;;  %v5181_v56 = vld [vmem:[%s7030_s4 + $0x18] sm:$0xff] }
 0x231   : > { %v2042_v22 = vmax.f32 %v6343_v43, %v2041_v52  ;;  %v2045_v42 = vmax.f32 %v6354_v58, %v2044_v23  ;;  %v2048_v20 = vmax.f32 %v6362_v57, %v2047_v36  ;;  %v2165_v18 = vpack.c.bf16 %v2039_v61, %v2039_v61  ;;  %v2509_v4 = vld [vmem:[#allocation2 + $0x20] sm:$0xe] }
 0x232   : > { %v1582_v63 = vmax.f32 %v1580_v2, %v1581_v53  ;;  %v1589_v9 = vmax.f32 %v1587_v21, %v1588_v35  ;;  %v1596_v25 = vmax.f32 %v1594_v46, %v1595_v48  ;;  %v1602_v51 = vrot.slane %v1601_v7, 1  ;;  %v2493_v23 = vld [vmem:[#allocation2 + $0x20] sm:$0xf] }
 0x233   : > { %v2166_v6 = vpack.c.bf16 %v2042_v22, %v2042_v22  ;;  %v2167_v38 = vpack.c.bf16 %v2045_v42, %v2045_v42  ;;  %v2168_v1 = vpack.c.bf16 %v2048_v20, %v2048_v20  ;;  %v2293_v12 = vunpack.c.l.b16 %v2165_v18  ;;  %v6443_v20 = vld [vmem:[#allocation2 + $0x24] sm:$0x1]  ;;  %3369 = vmatpush.bf16.msrb.mxu1 %v5181_v56 }
 0x234   : > { %v1603_v43 = vmax.f32 %v1601_v7, %v1602_v51  ;;  %v2050_v58 = vsel %vm1940_vm3, %v1582_v63, -inf  ;;  %v2053_v57 = vsel %vm1940_vm3, %v1589_v9, -inf  ;;  %v2056_v44 = vsel %vm1940_vm3, %v1596_v25, -inf  ;;  %v6447_v25 = vpop.permute.xlu2 %2997  ;;  %v2686_v51 = vpop.permute.xlu0 %2685 }
 0x235   : > { %v2294_v37 = vunpack.c.l.b16 %v2166_v6  ;;  %v2295_v62 = vunpack.c.l.b16 %v2167_v38  ;;  %v2296_v27 = vunpack.c.l.b16 %v2168_v1  ;;  %v2051_v16 = vmax.f32 %v6366_v24, %v2050_v58 }
 0x236   : > { %v2054_v2 = vmax.f32 %v6369_v55, %v2053_v57  ;;  %v2057_v21 = vmax.f32 %v6379_v8, %v2056_v44  ;;  %v2059_v46 = vsel %vm1940_vm3, %v1603_v43, -inf  ;;  %v2877_v34 = vunpack.c.l.b16 %v2517_v13  ;;  %v6439_v55 = vld [vmem:[#allocation2 + $0x20] sm:$0xf]  ;;  %v2478_v8 = vld [vmem:[#allocation2 + $0x24] sm:$0x1] }
 0x237   : > { %v2355_v17 = vsel %vm2325_vm4, %v2294_v37, %v2293_v12  ;;  %v2060_v59 = vmax.f32 %v6382_v10, %v2059_v46  ;;  %v2169_v24 = vpack.c.bf16 %v2051_v16, %v2051_v16  ;;  %v2750_v61 = vunpack.c.l.b16 %v2501_v26  ;;  %v2445_v43 = vld [vmem:[#allocation2 + $0x2c] sm:$0x1]  ;;  %v5302_v44 = vld [vmem:[#allocation2] sm:$0xf]  ;;  %v2442_v16 = vld [vmem:[#allocation2 + $0x28] sm:$0xf]  ;;  %3370 = vmatpush.bf16.msrb.mxu1 %v5180_v60 }
 0x238   : > { %v2356_v53 = vsel %vm2327_vm5, %v2295_v62, %v2355_v17  ;;  %v2170_v35 = vpack.c.bf16 %v2054_v2, %v2054_v2  ;;  %v2171_v48 = vpack.c.bf16 %v2057_v21, %v2057_v21  ;;  %v2885_v52 = vpack.c.b16 %v2877_v34, %v2877_v34  ;;  %v2486_v37 = vld [vmem:[#allocation2 + $0x20] sm:$0xe] }
 0x239   : > { %v2357_v36 = vsel %vm2329_vm6, %v2296_v27, %v2356_v53  ;;  %v2172_v7 = vpack.c.bf16 %v2060_v59, %v2060_v59  ;;  %v2297_v22 = vunpack.c.l.b16 %v2169_v24  ;;  %v2830_v42 = vunpack.c.l.b16 %v2509_v4  ;;  %v5179_v59 = vld [vmem:[%s7030_s4 + $0x8] sm:$0xff] }
 0x23a   : > { %v2298_v18 = vunpack.c.l.b16 %v2170_v35  ;;  %v2299_v10 = vunpack.c.l.b16 %v2171_v48  ;;  %2895 = vrot.lane.b32.xlu2 %v2885_v52, %s5372_s18  ;;  %v2563_v63 = vunpack.c.l.b16 %v6439_v55  ;;  %v2564_v9 = vunpack.c.l.b16 %v2478_v8  ;;  %v2638_v48 = vpop.permute.xlu1 %2637  ;;  %v2533_v52 = vld [vmem:[#allocation2 + $0x20] sm:$0xe] }
 0x23b   : > { %v2300_v6 = vunpack.c.l.b16 %v2172_v7  ;;  %v2358_v38 = vsel %vm2331_vm9, %v2297_v22, %v2357_v36  ;;  %v2838_v1 = vpack.c.b16 %v2750_v61, %v2830_v42  ;;  %v2710_v12 = vunpack.c.l.b16 %v2493_v23  ;;  %3371 = vmatpush.bf16.msrb.mxu1 %v5179_v59  ;;  %v5303_v42 = vld [vmem:[#allocation2 + $0x8] sm:$0xf]  ;;  %vm6713_vm9 = vmand %vm434_vm7, %vm3883_vm8 }
 0x23c   : > { %v2359_v13 = vsel %vm2333_vm10, %v2298_v18, %v2358_v38  ;;  %v2575_v58 = vpack.c.b16 %v2564_v9, %v2563_v63  ;;  %v2917_v57 = vunpack.c.l.b16 %v6443_v20  ;;  %v3037_v26 = vsel %vm1940_vm3, %v5302_v44, %v6397_v39  ;;  %v2726_v63 = vpop.permute.xlu2 %2725 }
 0x23d   : > { %v2360_v62 = vsel %vm2335_vm12, %v2299_v10, %v2359_v13  ;;  %v2388_v27 = vpack.c.b16 %v2300_v6, %v2300_v6  ;;  %v2846_v2 = vrot.slane %v2838_v1, 1  ;;  %v2718_v21 = vpack.c.b16 %v2710_v12, %v2710_v12 }
 0x23e   : > { %v2387_v46 = vpack.c.b16 %v2360_v62, %v2360_v62  ;;  %v2608_v4 = vshrl.u32 %v2575_v58, 16  ;;  %v2610_v56 = vshll.u32 %v2575_v58, 16  ;;  %v6458_v17 = vpack.c.b16 %v2750_v61, %v2710_v12 }
 0x23f   : > { %v2446_v39 = vsel %vm5752_vm15, %v2388_v27, %v2445_v43  ;;  %2857 = vrot.lane.b32.xlu1 %v2846_v2, %s5370_s16  ;;  %v2925_v24 = vpack.c.b16 %v2917_v57, %v2877_v34  ;;  %v2663_v8 = vunpack.c.l.b16 %v2486_v37  ;;  %v3061_v61 = vsel %vm3059_vm1, %v3037_v26, %v6393_v0  ;;  %3372 = vmatpush.bf16.msrb.mxu1 %v5178_v40 }
 0x240   : > { %v2443_v53 = vsel %vm5745_vm14, %v2387_v46, %v2442_v16  ;;  %2447 = vst [vmem:[#allocation2 + $0x2c] sm:$0x1] %v2446_v39  ;;  %v2612_v35 = vrot.slane %v2610_v56, 1  ;;  %vm3076_vm2 = vcmask 785408   ;;  %v2803_v7 = vrot.slane %v2801_v45, 1  ;;  %v5193_v56 = vld [vmem:[%s7030_s4 + $0x78] sm:$0xff] }
 0x241   : > { %2444 = vst [vmem:[#allocation2 + $0x28] sm:$0xf] %v2443_v53  ;;  %v2948_v23 = vshll.u32 %v2925_v24, 16  ;;  %v2946_v36 = vshrl.u32 %v2925_v24, 16  ;;  %v2671_v34 = vpack.c.b16 %v2564_v9, %v2663_v8  ;;  %v3078_v0 = vsel %vm3076_vm2, %v3061_v61, %v6405_v31  ;;  %v2902_v9 = vpop.permute.xlu0 %2901  ;;  %v2513_v46 = vld [vmem:[#allocation2 + $0x40] sm:$0xe]  ;;  %3394 = vmatpush.bf16.msra.mxu2 %v5193_v56 }
 0x242   : > { %v2613_v33 = vor.u32 %v2612_v35, %v2608_v4  ;;  %2729 = vrot.lane.b32.xlu2 %v2718_v21, %s5371_s17  ;;  %v3040_v20 = vsel %vm1940_vm3, %v5303_v42, %v2638_v48  ;;  %v3013_v18 = vunpack.c.l.b16 %v2533_v52  ;;  %v2804_v10 = vor.u32 %v2803_v7, %v2799_v5  ;;  %v6496_v53 = vld [vmem:[#allocation2 + $0x44] sm:$0x1]  ;;  %v5192_v48 = vld [vmem:[%s7030_s4 + $0x70] sm:$0xff]  ;;  %v2536_v7 = vld [vmem:[#allocation2 + $0x38] sm:$0xe] }
 0x243   : > { %v2950_v22 = vrot.slane %v2948_v23, 1  ;;  %v3063_v45 = vsel %vm3059_vm1, %v3040_v20, %v2686_v51  ;;  %v3165_v38 = vunpack.c.l.b16 %v3078_v0  ;;  %v2679_v13 = vrot.slane %v2671_v34, 1  ;;  %v2535_v34 = vld [vmem:[#allocation2 + $0x30] sm:$0xe] }
 0x244   : > { %2643 = vrot.lane.b32.xlu0 %v2613_v33, %s5370_s16  ;;  %v3080_v6 = vsel %vm3076_vm2, %v3063_v45, %v2726_v63  ;;  %v3110_v31 = vsel %vm1940_vm3, %v2804_v10, %v6432_v19  ;;  %v3021_v1 = vpack.c.b16 %v2917_v57, %v3013_v18  ;;  %v2834_v33 = vunpack.c.l.b16 %v2513_v46 }
 0x245   : > { %v2951_v60 = vor.u32 %v2950_v22, %v2946_v36  ;;  %v3168_v12 = vunpack.c.l.b16 %v3080_v6  ;;  %v6488_v30 = vsel %vm3059_vm1, %v3110_v31, %v2902_v9  ;;  %v2754_v22 = vunpack.c.l.b16 %v6496_v53  ;;  %3395 = vmatpush.bf16.msra.mxu2 %v5192_v48 }
 0x246   : > { %v3029_v57 = vrot.slane %v3021_v1, 1  ;;  %v3015_v45 = vunpack.c.l.b16 %v2535_v34  ;;  %v3016_v9 = vunpack.c.l.b16 %v2536_v7  ;;  %v2521_v1 = vld [vmem:[#allocation2 + $0x40] sm:$0xf]  ;;  %v5189_v7 = vld [vmem:[%s7030_s4 + $0x58] sm:$0xff] }
 0x247   : > { %2991 = vrot.lane.b32.xlu1 %v2951_v60, %s5371_s17  ;;  %v2526_v5 = vld [vmem:[#allocation2 + $0x2c] sm:$0x1]  ;;  %v3225_v26 = vpack.c.b16 %v3168_v12, %v3165_v38  ;;  %v2842_v38 = vpack.c.b16 %v2754_v22, %v2834_v33  ;;  %v6509_v12 = vld [vmem:[#allocation2 + $0x44] sm:$0x1] }
 0x248   : > { %v2502_v43 = vld [vmem:[#allocation2 + $0x2c] sm:$0x1]  ;;  %v2518_v51 = vld [vmem:[#allocation2 + $0x28] sm:$0xf]  ;;  %v2918_v27 = vunpack.c.l.b16 %v2526_v5  ;;  %v3173_v40 = vunpack.c.l.b16 %v3029_v57  ;;  %v2512_v57 = vld [vmem:[#allocation2 + $0x38] sm:$0xe] }
 0x249   : > { %v2494_v58 = vld [vmem:[#allocation2 + $0x28] sm:$0xf]  ;;  %v2878_v37 = vunpack.c.l.b16 %v2518_v51  ;;  %v2751_v2 = vunpack.c.l.b16 %v2502_v43  ;;  %3373 = vmatmul.bf16.vlgmr.msrb.gmra.mxu1 %v3225_v26  ;;  %v2479_v35 = vld [vmem:[#allocation2 + $0x2c] sm:$0x1]  ;;  %v3023_v43 = vpack.c.b16 %v2919_v15, %v3015_v45  ;;  %v3024_v51 = vpack.c.b16 %v2920_v29, %v3016_v9  ;;  %v2504_v15 = vld [vmem:[#allocation2 + $0x3c] sm:$0x1]  ;;  %v6552_v9 = vpop.permute.xlu1 %2995 }
 0x24a   : > { %v2534_v44 = vld [vmem:[#allocation2 + $0x28] sm:$0xe]  ;;  %v2711_v62 = vunpack.c.l.b16 %v2494_v58  ;;  %2691 = vrot.lane.b32.xlu2 %v2679_v13, %s5372_s18  ;;  %v2566_v0 = vunpack.c.l.b16 %v2479_v35  ;;  %v6537_v35 = vld [vmem:[#allocation2 + $0x3c] sm:$0x1] }
 0x24b   : > { %v3014_v16 = vunpack.c.l.b16 %v2534_v44  ;;  %v2510_v19 = vld [vmem:[#allocation2 + $0x28] sm:$0xe]  ;;  %v2886_v59 = vpack.c.b16 %v2878_v37, %v2878_v37  ;;  %v2926_v8 = vpack.c.b16 %v2918_v27, %v2878_v37  ;;  %v2850_v44 = vrot.slane %v2842_v38, 1  ;;  %v2480_v38 = vld [vmem:[#allocation2 + $0x34] sm:$0x1] }
 0x24c   : > { %v2831_v21 = vunpack.c.l.b16 %v2510_v19  ;;  %v6491_v4 = vld [vmem:[#allocation2 + $0x28] sm:$0xf]  ;;  %v2719_v39 = vpack.c.b16 %v2711_v62, %v2711_v62  ;;  %v6498_v61 = vpack.c.b16 %v2751_v2, %v2711_v62  ;;  %v2881_v37 = vunpack.c.l.b16 %v2521_v1 }
 0x24d   : > { %v3022_v24 = vpack.c.b16 %v2918_v27, %v3014_v16  ;;  %2897 = vrot.lane.b32.xlu0 %v2886_v59, %s5372_s18  ;;  %v2955_v23 = vshll.u32 %v2926_v8, 16  ;;  %v2565_v36 = vunpack.c.l.b16 %v6491_v4  ;;  %v2953_v20 = vshrl.u32 %v2926_v8, 16  ;;  %v2487_v63 = vld [vmem:[#allocation2 + $0x28] sm:$0xe]  ;;  %v6519_v27 = vld [vmem:[#allocation2 + $0x4c] sm:$0x1] }
 0x24e   : > { %v2839_v10 = vpack.c.b16 %v2751_v2, %v2831_v21  ;;  %v2664_v5 = vunpack.c.l.b16 %v2487_v63  ;;  %v2522_v58 = vld [vmem:[#allocation2 + $0x48] sm:$0xf]  ;;  %v2921_v62 = vunpack.c.l.b16 %v6509_v12  ;;  %v5191_v16 = vld [vmem:[%s7030_s4 + $0x68] sm:$0xff]  ;;  %v3031_v29 = vrot.slane %v3023_v43, 1  ;;  %v5190_v2 = vld [vmem:[%s7030_s4 + $0x60] sm:$0xff] }
 0x24f   : > { %v3030_v52 = vrot.slane %v3022_v24, 1  ;;  %2731 = vrot.lane.b32.xlu1 %v2719_v39, %s5371_s17  ;;  %v2957_v18 = vrot.slane %v2955_v23, 1  ;;  %v2576_v31 = vpack.c.b16 %v2566_v0, %v2565_v36  ;;  %v6525_v28 = vunpack.c.l.b16 %v2522_v58  ;;  %3396 = vmatpush.bf16.msra.mxu2 %v5191_v16  ;;  %v2496_v39 = vld [vmem:[#allocation2 + $0x38] sm:$0xf]  ;;  %v2538_v63 = vld [vmem:[#allocation2 + $0x48] sm:$0xe] }
 0x250   : > { %v2847_v13 = vrot.slane %v2839_v10, 1  ;;  %v2672_v49 = vpack.c.b16 %v2566_v0, %v2664_v5  ;;  %v3032_v19 = vrot.slane %v3024_v51, 1  ;;  %v2720_v21 = vpack.c.b16 %v6358_v11, %v6358_v11  ;;  %v6535_v8 = vld [vmem:[#allocation2 + $0x38] sm:$0xf]  ;;  %v2537_v10 = vld [vmem:[#allocation2 + $0x40] sm:$0xe] }
 0x251   : > { %v3176_v42 = vunpack.c.l.b16 %v3030_v52  ;;  %v2958_v6 = vor.u32 %v2957_v18, %v2953_v20  ;;  %v2617_v26 = vshll.u32 %v2576_v31, 16  ;;  %v2929_v56 = vpack.c.b16 %v2921_v62, %v2881_v37  ;;  %v6557_v51 = vld [vmem:[#allocation2 + $0x30] sm:$0xf]  ;;  %v5188_v58 = vld [vmem:[%s7030_s4 + $0x50] sm:$0xff]  ;;  %v5186_v12 = vld [vmem:[%s7030_s4 + $0x40] sm:$0xff] }
 0x252   : > { %v2922_v59 = vunpack.c.l.b16 %v6519_v27  ;;  %v2753_v24 = vunpack.c.l.b16 %v2504_v15  ;;  %v2680_v48 = vrot.slane %v2672_v49, 1  ;;  %v2615_v52 = vshrl.u32 %v2576_v31, 16 }
 0x253   : > { %v3230_v60 = vpack.c.b16 %v3176_v42, %v3173_v40  ;;  %2993 = vrot.lane.b32.xlu2 %v2958_v6, %s5371_s17  ;;  %v2619_v46 = vrot.slane %v2617_v26, 1  ;;  %v2833_v23 = vunpack.c.l.b16 %v2512_v57  ;;  %v3179_v11 = vunpack.c.l.b16 %v3031_v29  ;;  %3397 = vmatpush.bf16.msra.mxu2 %v5190_v2  ;;  %v2497_v40 = vld [vmem:[#allocation2 + $0x40] sm:$0xf]  ;;  %v6572_v57 = vpop.permute.xlu2 %2687 }
 0x254   : > { %v2930_v33 = vpack.c.b16 %v2922_v59, %v6525_v28  ;;  %v3182_v36 = vunpack.c.l.b16 %v3032_v19  ;;  %v6541_v34 = vunpack.c.l.b16 %v2496_v39  ;;  %v2976_v42 = vshll.u32 %v2929_v56, 16  ;;  %v5187_v2 = vld [vmem:[%s7030_s4 + $0x48] sm:$0xff] }
 0x255   : > { %4977 = vmatmul.msk.bf16.gmra.mxu3 %vm1940_vm3, %v3230_v60  ;;  %2859 = vrot.lane.b32.xlu0 %v2847_v13, %s5370_s16  ;;  %v2620_v0 = vor.u32 %v2619_v46, %v2615_v52  ;;  %v2569_v20 = vunpack.c.l.b16 %v6535_v8  ;;  %v2570_v18 = vunpack.c.l.b16 %v6537_v35  ;;  %v2841_v60 = vpack.c.b16 %v2753_v24, %v2833_v23  ;;  %v5304_v35 = vld [vmem:[#allocation2 + $0x10] sm:$0xf] }
 0x256   : > { %v6550_v45 = vpack.c.b16 %v2753_v24, %v6541_v34  ;;  %v2983_v6 = vshll.u32 %v2930_v33, 16  ;;  %v6555_v31 = vunpack.c.l.b16 %v2497_v40  ;;  %v3233_v1 = vpack.c.b16 %v3182_v36, %v3179_v11 }
 0x257   : > { %2865 = vrot.lane.b32.xlu1 %v2850_v44, %s5370_s16  ;;  %v2889_v13 = vpack.c.b16 %v2881_v37, %v2881_v37  ;;  %v2974_v5 = vshrl.u32 %v2929_v56, 16  ;;  %v3017_v43 = vunpack.c.l.b16 %v2537_v10  ;;  %3398 = vmatpush.bf16.msra.mxu2 %v5189_v7  ;;  %v2978_v44 = vrot.slane %v2976_v42, 1  ;;  %v2488_v56 = vld [vmem:[#allocation2 + $0x30] sm:$0xe] }
 0x258   : > { %v2578_v26 = vpack.c.b16 %v2570_v18, %v2569_v20  ;;  %v3018_v27 = vunpack.c.l.b16 %v2538_v63  ;;  %v6567_v16 = vpack.c.b16 %v2754_v22, %v6555_v31  ;;  %v2568_v37 = vunpack.c.l.b16 %v2480_v38 }
 0x259   : > { %v2849_v49 = vrot.slane %v2841_v60, 1  ;;  %v2981_v15 = vshrl.u32 %v2930_v33, 16  ;;  %v2985_v29 = vrot.slane %v2983_v6, 1  ;;  %v2567_v19 = vunpack.c.l.b16 %v6557_v51 }
 0x25a   : > { %v2979_v53 = vor.u32 %v2978_v44, %v2974_v5  ;;  %v2631_v22 = vshll.u32 %v2578_v26, 16  ;;  %v3026_v46 = vpack.c.b16 %v2922_v59, %v3018_v27  ;;  %v2766_v39 = vshll.u32 %v5945_v50, 16 }
 0x25b   : > { %2733 = vrot.lane.b32.xlu2 %v2720_v21, %s5371_s17  ;;  %3399 = vmatpush.bf16.msra.mxu2 %v5188_v58  ;;  %v3025_v21 = vpack.c.b16 %v2921_v62, %v3017_v43  ;;  %v2986_v24 = vor.u32 %v2985_v29, %v2981_v15  ;;  %v2773_v52 = vshll.u32 %v6076_v41, 16  ;;  %v2890_v23 = vpack.c.b16 %v6525_v28, %v6525_v28  ;;  %v2892_v62 = vpop.permute.xlu1 %2891  ;;  %v2988_v6 = vpop.permute.xlu2 %2987  ;;  %v2489_v58 = vld [vmem:[#allocation2 + $0x38] sm:$0xe] }
 0x25c   : > { %v2665_v33 = vunpack.c.l.b16 %v2488_v56  ;;  %v2629_v59 = vshrl.u32 %v2578_v26, 16  ;;  %v2633_v11 = vrot.slane %v2631_v22, 1  ;;  %v3034_v7 = vrot.slane %v3026_v46, 1  ;;  %v2854_v43 = vpop.permute.xlu0 %2853 }
 0x25d   : > { %2693 = vrot.lane.b32.xlu0 %v2680_v48, %s5372_s18  ;;  %v2577_v48 = vpack.c.b16 %v2568_v37, %v2567_v19  ;;  %v3033_v36 = vrot.slane %v3025_v21, 1  ;;  %v2768_v40 = vrot.slane %v2766_v39, 1  ;;  %v2764_v42 = vshrl.u32 %v5945_v50, 16 }
 0x25e   : > { %v2775_v20 = vrot.slane %v2773_v52, 1  ;;  %v2634_v28 = vor.u32 %v2633_v11, %v2629_v59  ;;  %v3188_v63 = vunpack.c.l.b16 %v3034_v7  ;;  %v2673_v60 = vpack.c.b16 %v2568_v37, %v2665_v33 }
 0x25f   : > { %2645 = vrot.lane.b32.xlu1 %v2620_v0, %s5370_s16  ;;  %3400 = vmatpush.bf16.msra.mxu2 %v5187_v2  ;;  %v2624_v0 = vshll.u32 %v2577_v48, 16  ;;  %v3185_v10 = vunpack.c.l.b16 %v3033_v36  ;;  %v2769_v38 = vor.u32 %v2768_v40, %v2764_v42  ;;  %v2666_v29 = vunpack.c.l.b16 %v2489_v58 }
 0x260   : > { %v2681_v27 = vrot.slane %v2673_v60, 1  ;;  %v2722_v39 = vpack.c.b16 %v6555_v31, %v6555_v31 }
 0x261   : > { %v2626_v5 = vrot.slane %v2624_v0, 1  ;;  %v3095_v50 = vsel %vm1940_vm3, %v2769_v38, %v6417_v14  ;;  %v3236_v26 = vpack.c.b16 %v3188_v63, %v3185_v10  ;;  %v2721_v14 = vpack.c.b16 %v6541_v34, %v6541_v34 }
 0x262   : > { %v3118_v15 = vsel %vm3059_vm1, %v3095_v50, %v2892_v62  ;;  %v2674_v22 = vpack.c.b16 %v2570_v18, %v2666_v29  ;;  %v2780_v10 = vshll.u32 %v6347_v3, 16 }
 0x263   : > { %2903 = vrot.lane.b32.xlu2 %v2889_v13, %s5372_s18  ;;  %3401 = vmatpush.bf16.msra.mxu2 %v5186_v12  ;;  %v2622_v13 = vshrl.u32 %v2577_v48, 16  ;;  %v3134_v2 = vsel %vm3076_vm2, %v3118_v15, %v2988_v6 }
 0x264   : > { %v3166_v46 = vunpack.c.l.b16 %v3134_v2  ;;  %v2682_v48 = vrot.slane %v2674_v22, 1  ;;  %v2640_v34 = vpop.permute.xlu0 %2639  ;;  %v2782_v60 = vrot.slane %v2780_v10, 1  ;;  %v2792_v2 = vshrl.u32 %v6498_v61, 16 }
 0x265   : > { %4978 = vmatmul.msk.bf16.gmra.mxu3 %vm1940_vm3, %v3233_v1  ;;  %2863 = vrot.lane.b32.xlu0 %v2849_v49, %s5370_s16  ;;  %v2771_v1 = vshrl.u32 %v6076_v41, 16  ;;  %v2894_v49 = vpop.permute.xlu1 %2893  ;;  %v2627_v41 = vor.u32 %v2626_v5, %v2622_v13  ;;  %v3043_v18 = vsel %vm1940_vm3, %v5304_v35, %v2640_v34  ;;  %v2785_v5 = vshrl.u32 %v6458_v17, 16 }
 0x266   : > { %v3065_v62 = vsel %vm3059_vm1, %v3043_v18, %v6572_v57  ;;  %v2787_v57 = vshll.u32 %v6458_v17, 16  ;;  %v2808_v35 = vshll.u32 %v6550_v45, 16 }
 0x267   : > { %2999 = vrot.lane.b32.xlu1 %v2979_v53, %s5371_s17  ;;  %v2776_v44 = vor.u32 %v2775_v20, %v2771_v1 }
 0x268   : > { %v2789_v38 = vrot.slane %v2787_v57, 1 }
 0x269   : > { %v3098_v37 = vsel %vm1940_vm3, %v2776_v44, %v2854_v43 }
 0x26a   : > { %v3120_v19 = vsel %vm3059_vm1, %v3098_v37, %v2894_v49  ;;  %v2790_v58 = vor.u32 %v2789_v38, %v2785_v5 }
 0x26b   : > { %3001 = vrot.lane.b32.xlu2 %v2986_v24, %s5371_s17 }
 0x26d   : > { %2905 = vrot.lane.b32.xlu0 %v2890_v23, %s5372_s18 }
 0x26f   : > { %2649 = vrot.lane.b32.xlu1 %v2634_v28, %s5370_s16 }
 0x273   : > { %2695 = vrot.lane.b32.xlu2 %v2681_v27, %s5372_s18 }
 0x275   : > { %4979 = vmatmul.msk.bf16.gmra.mxu3 %vm1940_vm3, %v3236_v26  ;;  %2647 = vrot.lane.b32.xlu0 %v2627_v41, %s5370_s16  ;;  %v2794_v26 = vshll.u32 %v6498_v61, 16 }
 0x276   : > { %v2990_v53 = vpop.permute.xlu2 %2989 }
 0x277   : > { %2735 = vrot.lane.b32.xlu1 %v2721_v14, %s5371_s17  ;;  %v3136_v21 = vsel %vm3076_vm2, %v3120_v19, %v2990_v53  ;;  %v2796_v19 = vrot.slane %v2794_v26, 1 }
 0x278   : > { %v3169_v56 = vunpack.c.l.b16 %v3136_v21 }
 0x279   : > { %v2797_v53 = vor.u32 %v2796_v19, %v2792_v2 }
 0x27a   : > { %v3226_v24 = vpack.c.b16 %v3169_v56, %v3166_v46  ;;  %v3144_v56 = vsel %vm3076_vm2, %v6488_v30, %v6447_v25 }
 0x27b   : > { %2737 = vrot.lane.b32.xlu2 %v2722_v39, %s5371_s17  ;;  %v2856_v23 = vpop.permute.xlu0 %2855 }
 0x27c   : > { %3402 = vmatmul.bf16.vlgmr.msra.gmra.mxu2 %v3226_v24 }
 0x27d   : > { %2697 = vrot.lane.b32.xlu0 %v2682_v48, %s5372_s18 }
 0x28d   : > { %v2728_v52 = vpop.permute.xlu1 %2727 }
 0x28e   : > { %v3082_v11 = vsel %vm3076_vm2, %v3065_v62, %v2728_v52  ;;  %v3181_v52 = vunpack.c.l.b16 %v3144_v56  ;;  %v2806_v62 = vshrl.u32 %v6550_v45, 16 }
 0x28f   : > { %v3171_v0 = vunpack.c.l.b16 %v3082_v11  ;;  %v2815_v11 = vshll.u32 %v6567_v16, 16 }
 0x290   : > { %v2690_v59 = vpop.permute.xlu0 %2689 }
 0x294   : > { %v2896_v33 = vpop.permute.xlu2 %2895 }
 0x299   : > { %v2642_v12 = vpop.permute.xlu1 %2641 }
 0x29a   : > { %v3046_v31 = vsel %vm1940_vm3, %v6339_v47, %v2642_v12  ;;  %v2778_v47 = vshrl.u32 %v6347_v3, 16 }
 0x29b   : > { %v3067_v36 = vsel %vm3059_vm1, %v3046_v31, %v2690_v59  ;;  %v2810_v59 = vrot.slane %v2808_v35, 1 }
 0x29c   : > { %v2730_v7 = vpop.permute.xlu2 %2729  ;;  %v2783_v13 = vor.u32 %v2782_v60, %v2778_v47 }
 0x29d   : > { %v3084_v40 = vsel %vm3076_vm2, %v3067_v36, %v2730_v7  ;;  %v2811_v7 = vor.u32 %v2810_v59, %v2806_v62 }
 0x29e   : > { %v3174_v42 = vunpack.c.l.b16 %v3084_v40  ;;  %v3101_v43 = vsel %vm1940_vm3, %v2783_v13, %v2856_v23 }
 0x29f   : > { %v3122_v50 = vsel %vm3059_vm1, %v3101_v43, %v2896_v33 }
 0x2a0   : > { %v3228_v20 = vpack.c.b16 %v3174_v42, %v3171_v0  ;;  %v2813_v42 = vshrl.u32 %v6567_v16, 16 }
 0x2a2   : > { %3378 = vmatmul.bf16.gmra.mxu1 %v3228_v20  ;;  %v2817_v20 = vrot.slane %v2815_v11, 1 }
 0x2a4   : > { %v2692_v63 = vpop.permute.xlu2 %2691  ;;  %v2818_v57 = vor.u32 %v2817_v20, %v2813_v42  ;;  %v3901_v20 = vld [vmem:[#allocation3] sm:$0x7] }
 0x2ad   : > { %v2994_v44 = vpop.permute.xlu2 %2993 }
 0x2b1   : > { %v2858_v28 = vpop.permute.xlu1 %2857 }
 0x2b2   : > { %v3104_v27 = vsel %vm1940_vm3, %v2790_v58, %v2858_v28 }
 0x2b5   : > { %v2734_v21 = vpop.permute.xlu2 %2733 }
 0x2b6   : > { %v2644_v6 = vpop.permute.xlu0 %2643 }
 0x2b7   : > { %v3049_v23 = vsel %vm1940_vm3, %v6439_v55, %v2644_v6 }
 0x2b8   : > { %v3069_v18 = vsel %vm3059_vm1, %v3049_v23, %v2692_v63 }
 0x2b9   : > { %v2992_v1 = vpop.permute.xlu1 %2991 }
 0x2ba   : > { %v3138_v49 = vsel %vm3076_vm2, %v3122_v50, %v2992_v1 }
 0x2bb   : > { %v3172_v29 = vunpack.c.l.b16 %v3138_v49 }
 0x2bd   : > { %v2904_v25 = vpop.permute.xlu2 %2903 }
 0x2bf   : > { %v2898_v15 = vpop.permute.xlu0 %2897 }
 0x2c0   : > { %v3124_v3 = vsel %vm3059_vm1, %v3104_v27, %v2898_v15 }
 0x2c1   : > { %v2732_v37 = vpop.permute.xlu1 %2731  ;;  %v3140_v41 = vsel %vm3076_vm2, %v3124_v3, %v2994_v44 }
 0x2c2   : > { %v3175_v17 = vunpack.c.l.b16 %v3140_v41  ;;  %v3086_v30 = vsel %vm3076_vm2, %v3069_v18, %v2732_v37 }
 0x2c3   : > { %v3177_v55 = vunpack.c.l.b16 %v3086_v30 }
 0x2c4   : > { %v3229_v14 = vpack.c.b16 %v3175_v17, %v3172_v29 }
 0x2c5   : > { %v3002_v10 = vpop.permute.xlu2 %3001 }
 0x2c6   : > { %3407 = vmatmul.bf16.gmra.mxu2 %v3229_v14  ;;  %v3432_v14 = vpop.f32.mrf.mxu3 }
 0x2c7   : > { %v2860_v22 = vpop.permute.xlu0 %2859 }
 0x2c8   : > { %v3107_v46 = vsel %vm1940_vm3, %v2797_v53, %v2860_v22  ;;  %v6681_v53 = vld [vmem:[%s7031_s5] ss:$0 sm:$0xff] }
 0x2c9   : > { %v3126_v39 = vsel %vm3059_vm1, %v3107_v46, %v6415_v32  ;;  %v2866_v24 = vpop.permute.xlu1 %2865 }
 0x2ca   : > { %v3142_v48 = vsel %vm3076_vm2, %v3126_v39, %v6552_v9  ;;  %v3116_v63 = vsel %vm1940_vm3, %v2818_v57, %v2866_v24 }
 0x2cb   : > { %v3178_v34 = vunpack.c.l.b16 %v3142_v48 }
 0x2cd   : > { %v3232_v61 = vpack.c.b16 %v3181_v52, %v3178_v34  ;;  %v2696_v43 = vpop.permute.xlu2 %2695 }
 0x2ce   : > { %v3434_v34 = vpop.f32.mrf.mxu3 }
 0x2cf   : > { %v2694_v33 = vpop.permute.xlu0 %2693 }
 0x2d1   : > { %v2646_v12 = vpop.permute.xlu1 %2645 }
 0x2d2   : > { %v3052_v32 = vsel %vm1940_vm3, %v6491_v4, %v2646_v12 }
 0x2d3   : > { %v3071_v9 = vsel %vm3059_vm1, %v3052_v32, %v2694_v33 }
 0x2d4   : > { %v3088_v31 = vsel %vm3076_vm2, %v3071_v9, %v2734_v21  ;;  %v6686_v21 = vld [vmem:[%s7032_s6] ss:$0 sm:$0xff] }
 0x2d5   : > { %v3180_v36 = vunpack.c.l.b16 %v3088_v31  ;;  %v2738_v3 = vpop.permute.xlu2 %2737 }
 0x2d6   : > { %3412 = vmatmul.bf16.gmra.mxu2 %v3232_v61 }
 0x2d7   : > { %v2864_v40 = vpop.permute.xlu0 %2863  ;;  %v3231_v0 = vpack.c.b16 %v3180_v36, %v3177_v55 }
 0x2d8   : > { %v3113_v4 = vsel %vm1940_vm3, %v2811_v7, %v2864_v40 }
 0x2d9   : > { %3383 = vmatmul.bf16.gmra.mxu1 %v3231_v0  ;;  %v3000_v28 = vpop.permute.xlu1 %2999  ;;  %v3130_v45 = vsel %vm3059_vm1, %v3113_v4, %v2904_v25 }
 0x2da   : > { %v3146_v60 = vsel %vm3076_vm2, %v3130_v45, %v3000_v28 }
 0x2db   : > { %v3184_v1 = vunpack.c.l.b16 %v3146_v60 }
 0x2df   : > { %v2906_v6 = vpop.permute.xlu0 %2905 }
 0x2e0   : > { %v3132_v47 = vsel %vm3059_vm1, %v3116_v63, %v2906_v6 }
 0x2e1   : > { %v3148_v38 = vsel %vm3076_vm2, %v3132_v47, %v3002_v10  ;;  %v2650_v13 = vpop.permute.xlu1 %2649  ;;  %v3938_v47 = vunpack.c.l.b16 %v3901_v20 }
 0x2e2   : > { %v3187_v16 = vunpack.c.l.b16 %v3148_v38  ;;  %v3058_v27 = vsel %vm1940_vm3, %v6535_v8, %v2650_v13  ;;  %v3374_v8 = vpop.f32.mrf.mxu1 }
 0x2e4   : > { %v3235_v5 = vpack.c.b16 %v3187_v16, %v3184_v1 }
 0x2e6   : > { %3417 = vmatmul.bf16.gmra.mxu2 %v3235_v5 }
 0x2e7   : > { %v2648_v58 = vpop.permute.xlu0 %2647 }
 0x2e8   : > { %v3055_v50 = vsel %vm1940_vm3, %v6557_v51, %v2648_v58  ;;  %vm3540_vm3 = vcmask 517120  }
 0x2e9   : > { %v3073_v44 = vsel %vm3059_vm1, %v3055_v50, %v2696_v43  ;;  %v2736_v26 = vpop.permute.xlu1 %2735 }
 0x2ea   : > { %v3090_v49 = vsel %vm3076_vm2, %v3073_v44, %v2736_v26  ;;  %v3376_v39 = vpop.f32.mrf.mxu1 }
 0x2eb   : > { %v3183_v29 = vunpack.c.l.b16 %v3090_v49 }
 0x2ef   : > { %v2698_v15 = vpop.permute.xlu0 %2697 }
 0x2f0   : > { %v3075_v37 = vsel %vm3059_vm1, %v3058_v27, %v2698_v15  ;;  %v3942_v15 = vpack.c.b16 %v3938_v47, %v3938_v47 }
 0x2f1   : > { %v3092_v41 = vsel %vm3076_vm2, %v3075_v37, %v2738_v3 }
 0x2f2   : > { %v3186_v17 = vunpack.c.l.b16 %v3092_v41 }
 0x2f4   : > { %v3234_v19 = vpack.c.b16 %v3186_v17, %v3183_v29 }
 0x2f6   : > { %3388 = vmatmul.bf16.gmra.mxu1 %v3234_v19 }
 0x2ff   : > { %v3403_v51 = vpop.f32.mrf.mxu2 }
 0x300   : > { %v3404_v2 = vadd.f32 %v3403_v51, %v3374_v8  ;;  %v3947_v8 = vshrl.u32 %v3942_v15, 16  ;;  %v3949_v51 = vshll.u32 %v3942_v15, 16 }
 0x302   : > { %v3433_v22 = vadd.f32 %v3432_v14, %v3404_v2 }
 0x304   : > { %v3456_v46 = vmul.f32 %v6681_v53, %v3433_v22 }
 0x306   : > { %v3468_v56 = vadd.f32 %v6686_v21, %v3456_v46 }
 0x307   : > { %v3405_v54 = vpop.f32.mrf.mxu2 }
 0x308   : > { %v3476_v24 = vmax.f32 %v3468_v56, 0.0  ;;  %v3406_v48 = vadd.f32 %v3405_v54, %v3376_v39  ;;  %v3951_v39 = vrot.slane %v3949_v51, 1 }
 0x30a   : > { %v3492_v52 = vrot.slane %v3476_v24, 2  ;;  %v3493_v61 = vrot.slane %v3476_v24, 4  ;;  %v3494_v23 = vrot.slane %v3476_v24, 6  ;;  %v3541_v33 = vsel %vm3540_vm3, %v3476_v24, -inf }
 0x30b   : > { %v3542_v35 = vrot.slane %v3541_v33, 4  ;;  %v3435_v18 = vadd.f32 %v3434_v34, %v3406_v48 }
 0x30c   : > { %v3548_v12 = vsel %vm3540_vm3, %v3492_v52, -inf  ;;  %v3555_v25 = vsel %vm3540_vm3, %v3493_v61, -inf  ;;  %v3562_v30 = vsel %vm3540_vm3, %v3494_v23, -inf }
 0x30d   : > { %v3543_v32 = vmax.f32 %v3541_v33, %v3542_v35  ;;  %v3549_v9 = vrot.slane %v3548_v12, 4  ;;  %v3556_v62 = vrot.slane %v3555_v25, 4  ;;  %v3563_v59 = vrot.slane %v3562_v30, 4 }
 0x30e   : > { %v3457_v31 = vmul.f32 %v6681_v53, %v3435_v18  ;;  %v3952_v33 = vor.u32 %v3951_v39, %v3947_v8 }
 0x30f   : > { %v3550_v55 = vmax.f32 %v3548_v12, %v3549_v9  ;;  %v3557_v11 = vmax.f32 %v3555_v25, %v3556_v62  ;;  %v3564_v36 = vmax.f32 %v3562_v30, %v3563_v59  ;;  %v3544_v40 = vrot.slane %v3543_v32, 2 }
 0x310   : > { %v3469_v7 = vadd.f32 %v6686_v21, %v3457_v31  ;;  %3974 = vrot.lane.b32.xlu0 %v3952_v33, %s5372_s18 }
 0x311   : > { %v3551_v0 = vrot.slane %v3550_v55, 2  ;;  %v3558_v4 = vrot.slane %v3557_v11, 2  ;;  %v3565_v28 = vrot.slane %v3564_v36, 2  ;;  %v3545_v60 = vmax.f32 %v3543_v32, %v3544_v40 }
 0x312   : > { %v3477_v42 = vmax.f32 %v3469_v7, 0.0 }
 0x313   : > { %v3552_v6 = vmax.f32 %v3550_v55, %v3551_v0  ;;  %v3559_v5 = vmax.f32 %v3557_v11, %v3558_v4  ;;  %v3566_v43 = vmax.f32 %v3564_v36, %v3565_v28  ;;  %v3546_v27 = vrot.slane %v3545_v60, 1 }
 0x314   : > { %v3495_v10 = vrot.slane %v3477_v42, 2  ;;  %v3496_v45 = vrot.slane %v3477_v42, 4  ;;  %v3497_v57 = vrot.slane %v3477_v42, 6  ;;  %v3569_v63 = vsel %vm3540_vm3, %v3477_v42, -inf }
 0x315   : > { %v3570_v38 = vrot.slane %v3569_v63, 4  ;;  %v3553_v49 = vrot.slane %v3552_v6, 1  ;;  %v3560_v17 = vrot.slane %v3559_v5, 1  ;;  %v3567_v19 = vrot.slane %v3566_v43, 1 }
 0x316   : > { %v3576_v1 = vsel %vm3540_vm3, %v3495_v10, -inf  ;;  %v3583_v16 = vsel %vm3540_vm3, %v3496_v45, -inf  ;;  %v3590_v13 = vsel %vm3540_vm3, %v3497_v57, -inf  ;;  %v3547_v56 = vmax.f32 %v3545_v60, %v3546_v27 }
 0x317   : > { %v3571_v58 = vmax.f32 %v3569_v63, %v3570_v38  ;;  %v3577_v50 = vrot.slane %v3576_v1, 4  ;;  %v3584_v44 = vrot.slane %v3583_v16, 4  ;;  %v3591_v26 = vrot.slane %v3590_v13, 4 }
 0x318   : > { %v3554_v52 = vmax.f32 %v3552_v6, %v3553_v49  ;;  %v3561_v61 = vmax.f32 %v3559_v5, %v3560_v17  ;;  %v3568_v23 = vmax.f32 %v3566_v43, %v3567_v19  ;;  %v3765_v30 = vsel %vm3059_vm1, %v3547_v56, -inf  ;;  %v3885_v5 = vld [vmem:[#allocation3 + $0x4] sm:$0x7] }
 0x319   : > { %v3572_v3 = vrot.slane %v3571_v58, 2  ;;  %v3578_v37 = vmax.f32 %v3576_v1, %v3577_v50  ;;  %v3585_v41 = vmax.f32 %v3583_v16, %v3584_v44  ;;  %v3592_v29 = vmax.f32 %v3590_v13, %v3591_v26 }
 0x31a   : > { %v3768_v31 = vsel %vm3059_vm1, %v3554_v52, -inf  ;;  %v3771_v55 = vsel %vm3059_vm1, %v3561_v61, -inf  ;;  %v3774_v36 = vsel %vm3059_vm1, %v3568_v23, -inf }
 0x31b   : > { %v3573_v14 = vmax.f32 %v3571_v58, %v3572_v3  ;;  %v3579_v2 = vrot.slane %v3578_v37, 2  ;;  %v3586_v22 = vrot.slane %v3585_v41, 2  ;;  %v3593_v46 = vrot.slane %v3592_v29, 2 }
 0x31d   : > { %v3574_v54 = vrot.slane %v3573_v14, 1  ;;  %v3580_v24 = vmax.f32 %v3578_v37, %v3579_v2  ;;  %v3587_v48 = vmax.f32 %v3585_v41, %v3586_v22  ;;  %v3594_v34 = vmax.f32 %v3592_v29, %v3593_v46  ;;  %v3437_v41 = vpop.f32.mrf.mxu3 }
 0x31f   : > { %v3575_v35 = vmax.f32 %v3573_v14, %v3574_v54  ;;  %v3581_v18 = vrot.slane %v3580_v24, 1  ;;  %v3588_v12 = vrot.slane %v3587_v48, 1  ;;  %v3595_v25 = vrot.slane %v3594_v34, 1  ;;  %v3379_v37 = vpop.f32.mrf.mxu1 }
 0x321   : > { %v3582_v32 = vmax.f32 %v3580_v24, %v3581_v18  ;;  %v3589_v9 = vmax.f32 %v3587_v48, %v3588_v12  ;;  %v3596_v62 = vmax.f32 %v3594_v34, %v3595_v25  ;;  %v3766_v59 = vsel %vm3059_vm1, %v3575_v35, -inf }
 0x322   : > { %v3767_v11 = vmax.f32 %v3765_v30, %v3766_v59 }
 0x323   : > { %v3769_v7 = vsel %vm3059_vm1, %v3582_v32, -inf  ;;  %v3772_v40 = vsel %vm3059_vm1, %v3589_v9, -inf  ;;  %v3775_v0 = vsel %vm3059_vm1, %v3596_v62, -inf }
 0x324   : > { %v3770_v42 = vmax.f32 %v3768_v31, %v3769_v7  ;;  %v3773_v20 = vmax.f32 %v3771_v55, %v3772_v40  ;;  %v3776_v4 = vmax.f32 %v3774_v36, %v3775_v0  ;;  %v3813_v28 = vpack.c.bf16 %v3767_v11, %v3767_v11 }
 0x325   : > { %v3439_v22 = vpop.f32.mrf.mxu3 }
 0x326   : > { %v3814_v10 = vpack.c.bf16 %v3770_v42, %v3770_v42  ;;  %v3815_v45 = vpack.c.bf16 %v3773_v20, %v3773_v20  ;;  %v3816_v57 = vpack.c.bf16 %v3776_v4, %v3776_v4  ;;  %v3845_v63 = vunpack.c.l.b16 %v3813_v28 }
 0x327   : > { %v3381_v14 = vpop.f32.mrf.mxu1 }
 0x328   : > { %v3846_v60 = vunpack.c.l.b16 %v3814_v10  ;;  %v3847_v6 = vunpack.c.l.b16 %v3815_v45  ;;  %v3848_v47 = vunpack.c.l.b16 %v3816_v57 }
 0x32a   : > { %v3861_v38 = vsel %vm2325_vm4, %v3846_v60, %v3845_v63 }
 0x32b   : > { %v3862_v1 = vsel %vm2327_vm5, %v3847_v6, %v3861_v38 }
 0x32c   : > { %v3863_v16 = vsel %vm2329_vm6, %v3848_v47, %v3862_v1 }
 0x32d   : > { %v3873_v43 = vpack.c.b16 %v3863_v16, %v3863_v16  ;;  %v3442_v42 = vpop.f32.mrf.mxu3 }
 0x32f   : > { %v3886_v58 = vsel %vm6713_vm9, %v3873_v43, %v3885_v5 }
 0x330   : > { %3887 = vst [vmem:[#allocation3 + $0x4] sm:$0x7] %v3886_v58 }
 0x337   : > { %v3909_v50 = vld [vmem:[#allocation3 + $0x4] sm:$0x3] }
 0x338   : > { %v3917_v44 = vld [vmem:[#allocation3 + $0x4] sm:$0x6]  ;;  %v4002_v26 = vunpack.c.l.b16 %v3909_v50 }
 0x339   : > { %v4062_v27 = vunpack.c.l.b16 %v3917_v44 }
 0x33a   : > { %v4006_v49 = vpack.c.b16 %v4002_v26, %v4002_v26 }
 0x33b   : > { %v4066_v15 = vpack.c.b16 %v4062_v27, %v4062_v27 }
 0x33c   : > { %4010 = vrot.lane.b32.xlu0 %v4006_v49, %s5372_s18 }
 0x33d   : > { %v4070_v3 = vrot.slane %v4066_v15, 1 }
 0x33f   : > { %4074 = vrot.lane.b32.xlu1 %v4070_v3, %s5372_s18 }
 0x349   : > { %v3408_v29 = vpop.f32.mrf.mxu2 }
 0x34a   : > { %v3409_v17 = vadd.f32 %v3408_v29, %v3379_v37 }
 0x34c   : > { %v3438_v19 = vadd.f32 %v3437_v41, %v3409_v17 }
 0x34e   : > { %v3458_v8 = vmul.f32 %v6681_v53, %v3438_v19 }
 0x350   : > { %v3470_v51 = vadd.f32 %v6686_v21, %v3458_v8 }
 0x351   : > { %v3410_v2 = vpop.f32.mrf.mxu2 }
 0x352   : > { %v3478_v46 = vmax.f32 %v3470_v51, 0.0  ;;  %v3411_v56 = vadd.f32 %v3410_v2, %v3381_v14 }
 0x354   : > { %v3498_v39 = vrot.slane %v3478_v46, 2  ;;  %v3499_v54 = vrot.slane %v3478_v46, 4  ;;  %v3500_v24 = vrot.slane %v3478_v46, 6  ;;  %v3597_v48 = vsel %vm3540_vm3, %v3478_v46, -inf }
 0x355   : > { %v3598_v34 = vrot.slane %v3597_v48, 4  ;;  %v3440_v52 = vadd.f32 %v3439_v22, %v3411_v56  ;;  %v3444_v56 = vpop.f32.mrf.mxu3 }
 0x356   : > { %v3604_v61 = vsel %vm3540_vm3, %v3498_v39, -inf  ;;  %v3611_v23 = vsel %vm3540_vm3, %v3499_v54, -inf  ;;  %v3618_v33 = vsel %vm3540_vm3, %v3500_v24, -inf  ;;  %v3384_v40 = vpop.f32.mrf.mxu1 }
 0x357   : > { %v3599_v35 = vmax.f32 %v3597_v48, %v3598_v34  ;;  %v3605_v18 = vrot.slane %v3604_v61, 4  ;;  %v3612_v12 = vrot.slane %v3611_v23, 4  ;;  %v3619_v25 = vrot.slane %v3618_v33, 4 }
 0x358   : > { %v3459_v30 = vmul.f32 %v6681_v53, %v3440_v52 }
 0x359   : > { %v3600_v32 = vrot.slane %v3599_v35, 2  ;;  %v3606_v9 = vmax.f32 %v3604_v61, %v3605_v18  ;;  %v3613_v62 = vmax.f32 %v3611_v23, %v3612_v12  ;;  %v3620_v59 = vmax.f32 %v3618_v33, %v3619_v25  ;;  %v3413_v0 = vpop.f32.mrf.mxu2 }
 0x35a   : > { %v3471_v31 = vadd.f32 %v6686_v21, %v3459_v30  ;;  %v3414_v38 = vadd.f32 %v3413_v0, %v3384_v40 }
 0x35b   : > { %v3601_v55 = vmax.f32 %v3599_v35, %v3600_v32  ;;  %v3607_v11 = vrot.slane %v3606_v9, 2  ;;  %v3614_v36 = vrot.slane %v3613_v62, 2  ;;  %v3621_v7 = vrot.slane %v3620_v59, 2 }
 0x35c   : > { %v3479_v20 = vmax.f32 %v3471_v31, 0.0  ;;  %v3443_v37 = vadd.f32 %v3442_v42, %v3414_v38 }
 0x35d   : > { %v3608_v4 = vmax.f32 %v3606_v9, %v3607_v11  ;;  %v3615_v28 = vmax.f32 %v3613_v62, %v3614_v36  ;;  %v3622_v10 = vmax.f32 %v3620_v59, %v3621_v7  ;;  %v3602_v6 = vrot.slane %v3601_v55, 1 }
 0x35e   : > { %v3501_v45 = vrot.slane %v3479_v20, 2  ;;  %v3502_v57 = vrot.slane %v3479_v20, 4  ;;  %v3503_v63 = vrot.slane %v3479_v20, 6  ;;  %v3625_v60 = vsel %vm3540_vm3, %v3479_v20, -inf  ;;  %v3386_v51 = vpop.f32.mrf.mxu1 }
 0x35f   : > { %v3609_v47 = vrot.slane %v3608_v4, 1  ;;  %v3626_v1 = vrot.slane %v3625_v60, 4  ;;  %v3616_v58 = vrot.slane %v3615_v28, 1  ;;  %v3623_v50 = vrot.slane %v3622_v10, 1 }
 0x360   : > { %v3632_v16 = vsel %vm3540_vm3, %v3501_v45, -inf  ;;  %v3639_v5 = vsel %vm3540_vm3, %v3502_v57, -inf  ;;  %v3646_v43 = vsel %vm3540_vm3, %v3503_v63, -inf  ;;  %v3603_v15 = vmax.f32 %v3601_v55, %v3602_v6 }
 0x361   : > { %v3627_v44 = vmax.f32 %v3625_v60, %v3626_v1  ;;  %v3633_v26 = vrot.slane %v3632_v16, 4  ;;  %v3640_v27 = vrot.slane %v3639_v5, 4  ;;  %v3647_v49 = vrot.slane %v3646_v43, 4  ;;  %v3415_v41 = vpop.f32.mrf.mxu2 }
 0x362   : > { %v3610_v3 = vmax.f32 %v3608_v4, %v3609_v47  ;;  %v3617_v14 = vmax.f32 %v3615_v28, %v3616_v58  ;;  %v3624_v2 = vmax.f32 %v3622_v10, %v3623_v50  ;;  %v3460_v22 = vmul.f32 %v6681_v53, %v3443_v37 }
 0x363   : > { %v3628_v29 = vrot.slane %v3627_v44, 2  ;;  %v3634_v17 = vmax.f32 %v3632_v16, %v3633_v26  ;;  %v3641_v19 = vmax.f32 %v3639_v5, %v3640_v27  ;;  %v3648_v8 = vmax.f32 %v3646_v43, %v3647_v49 }
 0x364   : > { %v3416_v46 = vadd.f32 %v3415_v41, %v3386_v51  ;;  %v3777_v34 = vsel %vm3059_vm1, %v3603_v15, -inf  ;;  %v3780_v52 = vsel %vm3059_vm1, %v3610_v3, -inf  ;;  %v3472_v61 = vadd.f32 %v6686_v21, %v3460_v22 }
 0x365   : > { %v3629_v39 = vmax.f32 %v3627_v44, %v3628_v29  ;;  %v3635_v54 = vrot.slane %v3634_v17, 2  ;;  %v3642_v24 = vrot.slane %v3641_v19, 2  ;;  %v3649_v48 = vrot.slane %v3648_v8, 2 }
 0x366   : > { %v3445_v23 = vadd.f32 %v3444_v56, %v3416_v46  ;;  %v3783_v25 = vsel %vm3059_vm1, %v3617_v14, -inf  ;;  %v3786_v30 = vsel %vm3059_vm1, %v3624_v2, -inf  ;;  %v3480_v32 = vmax.f32 %v3472_v61, 0.0 }
 0x367   : > { %v3630_v33 = vrot.slane %v3629_v39, 1  ;;  %v3636_v35 = vmax.f32 %v3634_v17, %v3635_v54  ;;  %v3643_v18 = vmax.f32 %v3641_v19, %v3642_v24  ;;  %v3650_v12 = vmax.f32 %v3648_v8, %v3649_v48 }
 0x368   : > { %v3461_v9 = vmul.f32 %v6681_v53, %v3445_v23  ;;  %v3504_v11 = vrot.slane %v3480_v32, 2  ;;  %v3505_v36 = vrot.slane %v3480_v32, 4  ;;  %v3506_v7 = vrot.slane %v3480_v32, 6 }
 0x369   : > { %v3631_v62 = vmax.f32 %v3629_v39, %v3630_v33  ;;  %v3637_v59 = vrot.slane %v3636_v35, 1  ;;  %v3644_v31 = vrot.slane %v3643_v18, 1  ;;  %v3651_v55 = vrot.slane %v3650_v12, 1  ;;  %v3418_v46 = vpop.f32.mrf.mxu2  ;;  %v3447_v39 = vpop.f32.mrf.mxu3  ;;  %v3888_v33 = vld [vmem:[#allocation3 + $0x8] sm:$0x7] }
 0x36a   : > { %v3653_v40 = vsel %vm3540_vm3, %v3480_v32, -inf  ;;  %v3660_v45 = vsel %vm3540_vm3, %v3504_v11, -inf  ;;  %v3667_v57 = vsel %vm3540_vm3, %v3505_v36, -inf  ;;  %v3674_v44 = vsel %vm3540_vm3, %v3506_v7, -inf }
 0x36b   : > { %v3638_v0 = vmax.f32 %v3636_v35, %v3637_v59  ;;  %v3645_v42 = vmax.f32 %v3643_v18, %v3644_v31  ;;  %v3652_v20 = vmax.f32 %v3650_v12, %v3651_v55  ;;  %v3778_v4 = vsel %vm3059_vm1, %v3631_v62, -inf }
 0x36c   : > { %v3779_v28 = vmax.f32 %v3777_v34, %v3778_v4  ;;  %v3654_v10 = vrot.slane %v3653_v40, 4  ;;  %v3661_v47 = vrot.slane %v3660_v45, 4  ;;  %v3668_v50 = vrot.slane %v3667_v57, 4 }
 0x36d   : > { %v3781_v63 = vsel %vm3059_vm1, %v3638_v0, -inf  ;;  %v3784_v60 = vsel %vm3059_vm1, %v3645_v42, -inf  ;;  %v3787_v6 = vsel %vm3059_vm1, %v3652_v20, -inf  ;;  %v3675_v41 = vrot.slane %v3674_v44, 4 }
 0x36e   : > { %v3782_v38 = vmax.f32 %v3780_v52, %v3781_v63  ;;  %v3785_v1 = vmax.f32 %v3783_v25, %v3784_v60  ;;  %v3788_v16 = vmax.f32 %v3786_v30, %v3787_v6  ;;  %v3817_v5 = vpack.c.bf16 %v3779_v28, %v3779_v28 }
 0x36f   : > { %v3655_v43 = vmax.f32 %v3653_v40, %v3654_v10  ;;  %v3662_v58 = vmax.f32 %v3660_v45, %v3661_v47  ;;  %v3669_v37 = vmax.f32 %v3667_v57, %v3668_v50  ;;  %v3473_v8 = vadd.f32 %v6686_v21, %v3461_v9 }
 0x370   : > { %v3818_v26 = vpack.c.bf16 %v3782_v38, %v3782_v38  ;;  %v3819_v27 = vpack.c.bf16 %v3785_v1, %v3785_v1  ;;  %v3820_v49 = vpack.c.bf16 %v3788_v16, %v3788_v16  ;;  %v3849_v29 = vunpack.c.l.b16 %v3817_v5 }
 0x371   : > { %v3656_v15 = vrot.slane %v3655_v43, 2  ;;  %v3663_v3 = vrot.slane %v3662_v58, 2  ;;  %v3670_v2 = vrot.slane %v3669_v37, 2  ;;  %v3676_v22 = vmax.f32 %v3674_v44, %v3675_v41  ;;  %v3420_v47 = vpop.f32.mrf.mxu2 }
 0x372   : > { %v3850_v17 = vunpack.c.l.b16 %v3818_v26  ;;  %v3851_v19 = vunpack.c.l.b16 %v3819_v27  ;;  %v3852_v54 = vunpack.c.l.b16 %v3820_v49  ;;  %v3481_v48 = vmax.f32 %v3473_v8, 0.0 }
 0x373   : > { %v3657_v51 = vmax.f32 %v3655_v43, %v3656_v15  ;;  %v3664_v14 = vmax.f32 %v3662_v58, %v3663_v3  ;;  %v3389_v56 = vpop.f32.mrf.mxu1  ;;  %v3671_v61 = vmax.f32 %v3669_v37, %v3670_v2  ;;  %v3677_v35 = vrot.slane %v3676_v22, 2  ;;  %v3449_v43 = vpop.f32.mrf.mxu3 }
 0x374   : > { %v3864_v24 = vsel %vm2325_vm4, %v3850_v17, %v3849_v29  ;;  %v3507_v18 = vrot.slane %v3481_v48, 2  ;;  %v3508_v12 = vrot.slane %v3481_v48, 4  ;;  %v3419_v9 = vadd.f32 %v3418_v46, %v3389_v56 }
 0x375   : > { %v3865_v34 = vsel %vm2327_vm5, %v3851_v19, %v3864_v24  ;;  %v3658_v52 = vrot.slane %v3657_v51, 1  ;;  %v3665_v30 = vrot.slane %v3664_v14, 1  ;;  %v3672_v32 = vrot.slane %v3671_v61, 1 }
 0x376   : > { %v3866_v23 = vsel %vm2329_vm6, %v3852_v54, %v3865_v34  ;;  %v3678_v62 = vmax.f32 %v3676_v22, %v3677_v35  ;;  %v3509_v59 = vrot.slane %v3481_v48, 6  ;;  %v3681_v31 = vsel %vm3540_vm3, %v3481_v48, -inf }
 0x377   : > { %v3874_v25 = vpack.c.b16 %v3866_v23, %v3866_v23  ;;  %v3688_v55 = vsel %vm3540_vm3, %v3507_v18, -inf  ;;  %v3659_v36 = vmax.f32 %v3657_v51, %v3658_v52  ;;  %v3682_v40 = vrot.slane %v3681_v31, 4 }
 0x378   : > { %v3679_v7 = vrot.slane %v3678_v62, 1  ;;  %v3689_v0 = vrot.slane %v3688_v55, 4  ;;  %v3695_v42 = vsel %vm3540_vm3, %v3508_v12, -inf  ;;  %v3666_v20 = vmax.f32 %v3664_v14, %v3665_v30 }
 0x379   : > { %v3889_v11 = vsel %vm6713_vm9, %v3874_v25, %v3888_v33  ;;  %v3696_v4 = vrot.slane %v3695_v42, 4  ;;  %v3702_v28 = vsel %vm3540_vm3, %v3509_v59, -inf  ;;  %v3448_v10 = vadd.f32 %v3447_v39, %v3419_v9 }
 0x37a   : > { %3890 = vst [vmem:[#allocation3 + $0x8] sm:$0x7] %v3889_v11  ;;  %v3673_v57 = vmax.f32 %v3671_v61, %v3672_v32  ;;  %v3683_v63 = vmax.f32 %v3681_v31, %v3682_v40  ;;  %v3690_v60 = vmax.f32 %v3688_v55, %v3689_v0  ;;  %v3703_v6 = vrot.slane %v3702_v28, 4 }
 0x37b   : > { %v3391_v45 = vpop.f32.mrf.mxu1  ;;  %v3680_v38 = vmax.f32 %v3678_v62, %v3679_v7  ;;  %v3697_v1 = vmax.f32 %v3695_v42, %v3696_v4  ;;  %v3462_v16 = vmul.f32 %v6681_v53, %v3448_v10  ;;  %v3789_v26 = vsel %vm3059_vm1, %v3659_v36, -inf }
 0x37c   : > { %v3421_v5 = vadd.f32 %v3420_v47, %v3391_v45  ;;  %v3684_v58 = vrot.slane %v3683_v63, 2  ;;  %v3691_v50 = vrot.slane %v3690_v60, 2  ;;  %v3704_v44 = vmax.f32 %v3702_v28, %v3703_v6 }
 0x37d   : > { %v3698_v27 = vrot.slane %v3697_v1, 2  ;;  %v3474_v49 = vadd.f32 %v6686_v21, %v3462_v16  ;;  %v3792_v3 = vsel %vm3059_vm1, %v3666_v20, -inf  ;;  %v3795_v17 = vsel %vm3059_vm1, %v3673_v57, -inf }
 0x37e   : > { %v3450_v15 = vadd.f32 %v3449_v43, %v3421_v5  ;;  %v3685_v37 = vmax.f32 %v3683_v63, %v3684_v58  ;;  %v3692_v41 = vmax.f32 %v3690_v60, %v3691_v50  ;;  %v3705_v29 = vrot.slane %v3704_v44, 2 }
 0x37f   : > { %v3798_v19 = vsel %vm3059_vm1, %v3680_v38, -inf  ;;  %v3699_v8 = vmax.f32 %v3697_v1, %v3698_v27  ;;  %v3482_v51 = vmax.f32 %v3474_v49, 0.0  ;;  %v3891_v27 = vld [vmem:[#allocation3 + $0xc] sm:$0x7] }
 0x380   : > { %v3686_v14 = vrot.slane %v3685_v37, 1  ;;  %v3693_v2 = vrot.slane %v3692_v41, 1  ;;  %v3706_v22 = vmax.f32 %v3704_v44, %v3705_v29  ;;  %v3463_v46 = vmul.f32 %v6681_v53, %v3450_v15  ;;  %v3929_v44 = vld [vmem:[#allocation3 + $0x14] sm:$0x7] }
 0x381   : > { %v3700_v56 = vrot.slane %v3699_v8, 1  ;;  %v3510_v39 = vrot.slane %v3482_v51, 2  ;;  %v3511_v54 = vrot.slane %v3482_v51, 4  ;;  %v3512_v24 = vrot.slane %v3482_v51, 6 }
 0x382   : > { %v3687_v48 = vmax.f32 %v3685_v37, %v3686_v14  ;;  %v3694_v34 = vmax.f32 %v3692_v41, %v3693_v2  ;;  %v3707_v52 = vrot.slane %v3706_v22, 1  ;;  %v3709_v61 = vsel %vm3540_vm3, %v3482_v51, -inf  ;;  %v3910_v2 = vld [vmem:[#allocation3 + $0x8] sm:$0x3] }
 0x383   : > { %v3701_v23 = vmax.f32 %v3699_v8, %v3700_v56  ;;  %v3710_v33 = vrot.slane %v3709_v61, 4  ;;  %v3716_v35 = vsel %vm3540_vm3, %v3510_v39, -inf  ;;  %v3723_v18 = vsel %vm3540_vm3, %v3511_v54, -inf }
 0x384   : > { %v3708_v12 = vmax.f32 %v3706_v22, %v3707_v52  ;;  %v3790_v25 = vsel %vm3059_vm1, %v3687_v48, -inf  ;;  %v3793_v53 = vsel %vm3059_vm1, %v3694_v34, -inf  ;;  %v3717_v30 = vrot.slane %v3716_v35, 4 }
 0x385   : > { %v3791_v32 = vmax.f32 %v3789_v26, %v3790_v25  ;;  %v3794_v9 = vmax.f32 %v3792_v3, %v3793_v53  ;;  %v3796_v62 = vsel %vm3059_vm1, %v3701_v23, -inf  ;;  %v3711_v59 = vmax.f32 %v3709_v61, %v3710_v33 }
 0x386   : > { %v3797_v31 = vmax.f32 %v3795_v17, %v3796_v62  ;;  %v3799_v55 = vsel %vm3059_vm1, %v3708_v12, -inf  ;;  %v3718_v11 = vmax.f32 %v3716_v35, %v3717_v30  ;;  %v3724_v36 = vrot.slane %v3723_v18, 4  ;;  %v3918_v35 = vld [vmem:[#allocation3 + $0x8] sm:$0x6] }
 0x387   : > { %v3800_v7 = vmax.f32 %v3798_v19, %v3799_v55  ;;  %v3821_v40 = vpack.c.bf16 %v3791_v32, %v3791_v32  ;;  %v3822_v0 = vpack.c.bf16 %v3794_v9, %v3794_v9  ;;  %v3712_v42 = vrot.slane %v3711_v59, 2 }
 0x388   : > { %v3823_v20 = vpack.c.bf16 %v3797_v31, %v3797_v31  ;;  %v3719_v4 = vrot.slane %v3718_v11, 2  ;;  %v3725_v28 = vmax.f32 %v3723_v18, %v3724_v36  ;;  %v3730_v10 = vsel %vm3540_vm3, %v3512_v24, -inf  ;;  %v3926_v36 = vld [vmem:[#allocation3 + $0x8] sm:$0x7] }
 0x389   : > { %v3824_v45 = vpack.c.bf16 %v3800_v7, %v3800_v7  ;;  %v3853_v57 = vunpack.c.l.b16 %v3821_v40  ;;  %v3854_v63 = vunpack.c.l.b16 %v3822_v0  ;;  %v3713_v6 = vmax.f32 %v3711_v59, %v3712_v42 }
 0x38a   : > { %v3855_v60 = vunpack.c.l.b16 %v3823_v20  ;;  %v3720_v47 = vmax.f32 %v3718_v11, %v3719_v4  ;;  %v3731_v38 = vrot.slane %v3730_v10, 4  ;;  %v3475_v5 = vadd.f32 %v6686_v21, %v3463_v46 }
 0x38b   : > { %v3856_v1 = vunpack.c.l.b16 %v3824_v45  ;;  %v3867_v16 = vsel %vm2325_vm4, %v3854_v63, %v3853_v57  ;;  %v3726_v58 = vrot.slane %v3725_v28, 2  ;;  %v3714_v3 = vrot.slane %v3713_v6, 1 }
 0x38c   : > { %v3868_v43 = vsel %vm2327_vm5, %v3855_v60, %v3867_v16  ;;  %v3732_v50 = vmax.f32 %v3730_v10, %v3731_v38  ;;  %v3483_v49 = vmax.f32 %v3475_v5, 0.0  ;;  %v3721_v37 = vrot.slane %v3720_v47, 1 }
 0x38d   : > { %v3869_v26 = vsel %vm2329_vm6, %v3856_v1, %v3868_v43  ;;  %v4089_v8 = vunpack.c.l.b16 %v3929_v44  ;;  %v3727_v51 = vmax.f32 %v3725_v28, %v3726_v58  ;;  %v3715_v54 = vmax.f32 %v3713_v6, %v3714_v3 }
 0x38e   : > { %v3875_v15 = vpack.c.b16 %v3869_v26, %v3869_v26  ;;  %v3733_v41 = vrot.slane %v3732_v50, 2  ;;  %v3513_v29 = vrot.slane %v3483_v49, 2  ;;  %v3514_v17 = vrot.slane %v3483_v49, 4 }
 0x38f   : > { %v3515_v19 = vrot.slane %v3483_v49, 6  ;;  %v3737_v22 = vsel %vm3540_vm3, %v3483_v49, -inf  ;;  %v3722_v24 = vmax.f32 %v3720_v47, %v3721_v37  ;;  %v4093_v23 = vpack.c.b16 %v4089_v8, %v4089_v8 }
 0x390   : > { %v3892_v21 = vsel %vm6713_vm9, %v3875_v15, %v3891_v27  ;;  %v3734_v14 = vmax.f32 %v3732_v50, %v3733_v41  ;;  %v3744_v46 = vsel %vm3540_vm3, %v3513_v29, -inf  ;;  %v3751_v56 = vsel %vm3540_vm3, %v3514_v17, -inf }
 0x391   : > { %3893 = vst [vmem:[#allocation3 + $0xc] sm:$0x7] %v3892_v21  ;;  %v3758_v39 = vsel %vm3540_vm3, %v3515_v19, -inf  ;;  %v3738_v48 = vrot.slane %v3737_v22, 4  ;;  %v3745_v34 = vrot.slane %v3744_v46, 4  ;;  %v3752_v52 = vrot.slane %v3751_v56, 4 }
 0x392   : > { %v3759_v61 = vrot.slane %v3758_v39, 4  ;;  %v4003_v33 = vunpack.c.l.b16 %v3910_v2  ;;  %v3728_v18 = vrot.slane %v3727_v51, 1  ;;  %v3735_v12 = vrot.slane %v3734_v14, 1 }
 0x393   : > { %v3739_v25 = vmax.f32 %v3737_v22, %v3738_v48  ;;  %v3746_v53 = vmax.f32 %v3744_v46, %v3745_v34  ;;  %v3753_v30 = vmax.f32 %v3751_v56, %v3752_v52  ;;  %v4116_v9 = vshrl.u32 %v4093_v23, 16 }
 0x394   : > { %v3760_v32 = vmax.f32 %v3758_v39, %v3759_v61  ;;  %v4118_v62 = vshll.u32 %v4093_v23, 16  ;;  %v4007_v55 = vpack.c.b16 %v4003_v33, %v4003_v33  ;;  %v4063_v11 = vunpack.c.l.b16 %v3918_v35 }
 0x395   : > { %v3740_v59 = vrot.slane %v3739_v25, 2  ;;  %v3747_v31 = vrot.slane %v3746_v53, 2  ;;  %v3801_v7 = vsel %vm3059_vm1, %v3715_v54, -inf  ;;  %v3754_v40 = vrot.slane %v3753_v30, 2 }
 0x396   : > { %v3761_v0 = vrot.slane %v3760_v32, 2  ;;  %v4120_v42 = vrot.slane %v4118_v62, 1  ;;  %v3729_v20 = vmax.f32 %v3727_v51, %v3728_v18  ;;  %v3736_v4 = vmax.f32 %v3734_v14, %v3735_v12  ;;  %4012 = vrot.lane.b32.xlu1 %v4007_v55, %s5372_s18 }
 0x397   : > { %v3741_v28 = vmax.f32 %v3739_v25, %v3740_v59  ;;  %v3748_v10 = vmax.f32 %v3746_v53, %v3747_v31  ;;  %v3755_v63 = vmax.f32 %v3753_v30, %v3754_v40  ;;  %v4086_v47 = vunpack.c.l.b16 %v3926_v36  ;;  %v3903_v30 = vld [vmem:[#allocation3 + $0x8] sm:$0x7]  ;;  %v3894_v59 = vld [vmem:[#allocation3 + $0x10] sm:$0x7] }
 0x398   : > { %v3919_v45 = vld [vmem:[#allocation3 + $0xc] sm:$0x6]  ;;  %v3762_v60 = vmax.f32 %v3760_v32, %v3761_v0  ;;  %v4121_v6 = vor.u32 %v4120_v42, %v4116_v9  ;;  %v4067_v16 = vpack.c.b16 %v4063_v11, %v4063_v11  ;;  %v3804_v43 = vsel %vm3059_vm1, %v3722_v24, -inf }
 0x399   : > { %v3927_v57 = vld [vmem:[#allocation3 + $0xc] sm:$0x7]  ;;  %v3742_v38 = vrot.slane %v3741_v28, 1  ;;  %v3749_v1 = vrot.slane %v3748_v10, 1  ;;  %v4064_v5 = vunpack.c.l.b16 %v3919_v45  ;;  %v3756_v58 = vrot.slane %v3755_v63, 1 }
 0x39a   : > { %v3763_v50 = vrot.slane %v3762_v60, 1  ;;  %4128 = vrot.lane.b32.xlu2 %v4121_v6, %s5372_s18  ;;  %v4087_v44 = vunpack.c.l.b16 %v3927_v57  ;;  %v3807_v26 = vsel %vm3059_vm1, %v3729_v20, -inf  ;;  %v3810_v27 = vsel %vm3059_vm1, %v3736_v4, -inf  ;;  %v3911_v0 = vld [vmem:[#allocation3 + $0xc] sm:$0x3] }
 0x39b   : > { %v3743_v49 = vmax.f32 %v3741_v28, %v3742_v38  ;;  %v3750_v15 = vmax.f32 %v3748_v10, %v3749_v1  ;;  %v3757_v3 = vmax.f32 %v3755_v63, %v3756_v58  ;;  %v4090_v41 = vpack.c.b16 %v4086_v47, %v4086_v47  ;;  %v3904_v42 = vld [vmem:[#allocation3 + $0xc] sm:$0x7] }
 0x39c   : > { %v3764_v37 = vmax.f32 %v3762_v60, %v3763_v50  ;;  %v4068_v29 = vpack.c.b16 %v4064_v5, %v4064_v5  ;;  %v4071_v8 = vrot.slane %v4067_v16, 1  ;;  %v4091_v21 = vpack.c.b16 %v4087_v44, %v4087_v44  ;;  %v3902_v16 = vld [vmem:[#allocation3 + $0x4] sm:$0x7] }
 0x39d   : > { %v3802_v17 = vsel %vm3059_vm1, %v3743_v49, -inf  ;;  %v3805_v19 = vsel %vm3059_vm1, %v3750_v15, -inf  ;;  %v3808_v2 = vsel %vm3059_vm1, %v3757_v3, -inf  ;;  %v4097_v48 = vshll.u32 %v4090_v41, 16 }
 0x39e   : > { %v3803_v51 = vmax.f32 %v3801_v7, %v3802_v17  ;;  %v3806_v14 = vmax.f32 %v3804_v43, %v3805_v19  ;;  %v3811_v22 = vsel %vm3059_vm1, %v3764_v37, -inf  ;;  %v3809_v46 = vmax.f32 %v3807_v26, %v3808_v2 }
 0x39f   : > { %v3812_v56 = vmax.f32 %v3810_v27, %v3811_v22  ;;  %v4072_v39 = vrot.slane %v4068_v29, 1  ;;  %v4104_v34 = vshll.u32 %v4091_v21, 16  ;;  %v4099_v53 = vrot.slane %v4097_v48, 1  ;;  %v3930_v22 = vld [vmem:[#allocation3 + $0x8] sm:$0x6] }
 0x3a0   : > { %v3825_v54 = vpack.c.bf16 %v3803_v51, %v3803_v51  ;;  %v3826_v24 = vpack.c.bf16 %v3806_v14, %v3806_v14  ;;  %v3827_v52 = vpack.c.bf16 %v3809_v46, %v3809_v46  ;;  %v4102_v9 = vshrl.u32 %v4091_v21, 16 }
 0x3a1   : > { %v3828_v61 = vpack.c.bf16 %v3812_v56, %v3812_v56  ;;  %4078 = vrot.lane.b32.xlu0 %v4072_v39, %s5372_s18  ;;  %v4106_v18 = vrot.slane %v4104_v34, 1  ;;  %v4095_v31 = vshrl.u32 %v4090_v41, 16  ;;  %v3940_v36 = vunpack.c.l.b16 %v3903_v30  ;;  %v5219_v30 = vld [vmem:[%s7033_s7 + $0xb8] sm:$0xff] }
 0x3a2   : > { %v3857_v23 = vunpack.c.l.b16 %v3825_v54  ;;  %v3858_v33 = vunpack.c.l.b16 %v3826_v24  ;;  %4076 = vrot.lane.b32.xlu2 %v4071_v8, %s5372_s18  ;;  %v3859_v35 = vunpack.c.l.b16 %v3827_v52  ;;  %v4004_v4 = vunpack.c.l.b16 %v3911_v0  ;;  %v3931_v54 = vld [vmem:[#allocation3 + $0xc] sm:$0x6]  ;;  %v3913_v52 = vld [vmem:[#allocation3 + $0x4] sm:$0x7]  ;;  %4590 = vmatpush.bf16.msrb.mxu2 %v5219_v30  ;;  %v5201_v0 = vld [vmem:[%s7033_s7 + $0x28] sm:$0xff] }
 0x3a3   : > { %v3860_v12 = vunpack.c.l.b16 %v3828_v61  ;;  %v4107_v11 = vor.u32 %v4106_v18, %v4102_v9  ;;  %v4100_v7 = vor.u32 %v4099_v53, %v4095_v31  ;;  %v3944_v20 = vpack.c.b16 %v3940_v36, %v3940_v36  ;;  %v5211_v53 = vld [vmem:[%s7033_s7 + $0x78] sm:$0xff]  ;;  %v5210_v9 = vld [vmem:[%s7033_s7 + $0x70] sm:$0xff]  ;;  %v3914_v30 = vld [vmem:[#allocation3 + $0x8] sm:$0x7] }
 0x3a4   : > { %v3870_v25 = vsel %vm2325_vm4, %v3858_v33, %v3857_v23  ;;  %v3941_v28 = vunpack.c.l.b16 %v3904_v42  ;;  %v4008_v45 = vpack.c.b16 %v4004_v4, %v4004_v4  ;;  %v3939_v49 = vunpack.c.l.b16 %v3902_v16  ;;  %v3905_v23 = vld [vmem:[#allocation3] sm:$0x6]  ;;  %v3975_v33 = vpop.permute.xlu0 %3974  ;;  %4576 = vmatpush.bf16.msra.mxu1 %v5211_v53  ;;  %v5208_v16 = vld [vmem:[%s7033_s7 + $0x60] sm:$0xff] }
 0x3a5   : > { %v3871_v32 = vsel %vm2327_vm5, %v3859_v35, %v3870_v25  ;;  %v3963_v10 = vshll.u32 %v3944_v20, 16  ;;  %v3961_v44 = vshrl.u32 %v3944_v20, 16  ;;  %v4134_v46 = vunpack.c.l.b16 %v3930_v22  ;;  %v5203_v25 = vld [vmem:[%s7033_s7 + $0x38] sm:$0xff]  ;;  %v5196_v22 = vld [vmem:[%s7033_s7] sm:$0xff] }
 0x3a6   : > { %v3872_v62 = vsel %vm2329_vm6, %v3860_v12, %v3871_v32  ;;  %v3945_v57 = vpack.c.b16 %v3941_v28, %v3941_v28  ;;  %v3943_v29 = vpack.c.b16 %v3939_v49, %v3939_v49  ;;  %v4135_v24 = vunpack.c.l.b16 %v3931_v54  ;;  %4562 = vmatpush.bf16.msra.mxu3 %v5203_v25  ;;  %v5202_v32 = vld [vmem:[%s7033_s7 + $0x30] sm:$0xff]  ;;  %v3915_v54 = vld [vmem:[#allocation3 + $0xc] sm:$0x7] }
 0x3a7   : > { %v3876_v55 = vpack.c.b16 %v3872_v62, %v3872_v62  ;;  %v3965_v1 = vrot.slane %v3963_v10, 1  ;;  %v4138_v56 = vpack.c.b16 %v4134_v46, %v4134_v46  ;;  %v4022_v61 = vunpack.c.l.b16 %v3913_v52  ;;  %v5206_v46 = vld [vmem:[%s7033_s7 + $0x50] sm:$0xff]  ;;  %v5205_v52 = vld [vmem:[%s7033_s7 + $0x48] sm:$0xff]  ;;  %v5204_v53 = vld [vmem:[%s7033_s7 + $0x40] sm:$0xff] }
 0x3a8   : > { %v3970_v58 = vshll.u32 %v3945_v57, 16  ;;  %v3968_v37 = vshrl.u32 %v3945_v57, 16  ;;  %v3956_v21 = vshll.u32 %v3943_v29, 16  ;;  %v3954_v14 = vshrl.u32 %v3943_v29, 16  ;;  %4577 = vmatpush.bf16.msra.mxu1 %v5210_v9 }
 0x3a9   : > { %v3895_v40 = vsel %vm6713_vm9, %v3876_v55, %v3894_v59  ;;  %4124 = vrot.lane.b32.xlu0 %v4107_v11, %s5372_s18  ;;  %v3966_v15 = vor.u32 %v3965_v1, %v3961_v44  ;;  %v4142_v39 = vrot.slane %v4138_v56, 1  ;;  %v4139_v48 = vpack.c.b16 %v4135_v24, %v4135_v24  ;;  %v3933_v55 = vld [vmem:[#allocation3 + $0x14] sm:$0x6] }
 0x3aa   : > { %3896 = vst [vmem:[#allocation3 + $0x10] sm:$0x7] %v3895_v40  ;;  %4122 = vrot.lane.b32.xlu2 %v4100_v7, %s5372_s18  ;;  %v3972_v3 = vrot.slane %v3970_v58, 1  ;;  %v3958_v51 = vrot.slane %v3956_v21, 1  ;;  %v3986_v18 = vunpack.c.l.b16 %v3905_v23  ;;  %v4026_v12 = vpack.c.b16 %v4022_v61, %v4022_v61  ;;  %4563 = vmatpush.bf16.msra.mxu3 %v5202_v32  ;;  %v5217_v1 = vld [vmem:[%s7033_s7 + $0xa8] sm:$0xff] }
 0x3ab   : > { %4325 = vst [vmem:[#allocation1 + $0x20] ss:$4 sm:$0xff] %v4142_v39  ;;  %v4143_v34 = vrot.slane %v4139_v48, 1  ;;  %v4137_v36 = vunpack.c.l.b16 %v3933_v55  ;;  %vm4220_vm4 = vcmask 1045508   ;;  %vm4224_vm5 = vcmask 1043456   ;;  %v5197_v21 = vld [vmem:[%s7033_s7 + $0x8] sm:$0xff] }
 0x3ac   : > { %v3973_v17 = vor.u32 %v3972_v3, %v3968_v37  ;;  %v3959_v2 = vor.u32 %v3958_v51, %v3954_v14  ;;  %v3990_v59 = vpack.c.b16 %v3986_v18, %v3986_v18  ;;  %v4033_v31 = vshll.u32 %v4026_v12, 16  ;;  %v5227_v39 = vld [vmem:[%s7033_s7 + $0xf8] sm:$0xff]  ;;  %v5214_v48 = vld [vmem:[%s7033_s7 + $0x90] sm:$0xff]  ;;  %v5213_v18 = vld [vmem:[%s7033_s7 + $0x88] sm:$0xff] }
 0x3ad   : > { %4328 = vst [vmem:[#allocation1 + $0x21] ss:$4 sm:$0xff] %v4143_v34  ;;  %v4141_v42 = vpack.c.b16 %v4137_v36, %v4137_v36  ;;  %v4031_v57 = vshrl.u32 %v4026_v12, 16  ;;  %v5226_v34 = vld [vmem:[%s7033_s7 + $0xf0] sm:$0xff]  ;;  %v4024_v61 = vunpack.c.l.b16 %v3915_v54  ;;  %v5225_v12 = vld [vmem:[%s7033_s7 + $0xe8] sm:$0xff]  ;;  %v5224_v55 = vld [vmem:[%s7033_s7 + $0xe0] sm:$0xff] }
 0x3ae   : > { %v3994_v20 = vrot.slane %v3990_v59, 1  ;;  %v4035_v4 = vrot.slane %v4033_v31, 1  ;;  %v4011_v10 = vpop.permute.xlu0 %4010  ;;  %4564 = vmatpush.bf16.msra.mxu3 %v5201_v0  ;;  %v3907_v59 = vld [vmem:[#allocation3 + $0x8] sm:$0x6]  ;;  %vm4740_vm6 = vcmask 811008  }
 0x3af   : > { %v4028_v9 = vpack.c.b16 %v4024_v61, %v4024_v61  ;;  %v5212_v31 = vld [vmem:[%s7033_s7 + $0x80] sm:$0xff]  ;;  %v3988_v0 = vunpack.c.l.b16 %v3907_v59 }
 0x3b1   : > { %v3912_v63 = vld [vmem:[#allocation3 + $0x10] sm:$0x3] }
 0x3b2   : > { %v3920_v60 = vld [vmem:[#allocation3 + $0x10] sm:$0x6]  ;;  %4014 = vrot.lane.b32.xlu2 %v4008_v45, %s5372_s18  ;;  %v4005_v13 = vunpack.c.l.b16 %v3912_v63  ;;  %v4145_v45 = vrot.slane %v4141_v42, 1  ;;  %v5218_v63 = vld [vmem:[%s7033_s7 + $0xb0] sm:$0xff]  ;;  %v4047_v42 = vshll.u32 %v4028_v9, 16 }
 0x3b3   : > { %v3928_v6 = vld [vmem:[#allocation3 + $0x10] sm:$0x7]  ;;  %v4065_v47 = vunpack.c.l.b16 %v3920_v60  ;;  %4591 = vmatpush.bf16.msrb.mxu2 %v5218_v63  ;;  %v3906_v63 = vld [vmem:[#allocation3 + $0x4] sm:$0x6] }
 0x3b4   : > { %v4088_v38 = vunpack.c.l.b16 %v3928_v6  ;;  %v4009_v5 = vpack.c.b16 %v4005_v13, %v4005_v13  ;;  %v3932_v62 = vld [vmem:[#allocation3 + $0x10] sm:$0x6]  ;;  %v4075_v6 = vpop.permute.xlu1 %4074  ;;  %v5200_v13 = vld [vmem:[%s7033_s7 + $0x20] sm:$0xff]  ;;  %4334 = vst [vmem:[#allocation1 + $0x23] ss:$4 sm:$0xff] %v4145_v45  ;;  %v5223_v45 = vld [vmem:[%s7033_s7 + $0xd8] sm:$0xff] }
 0x3b5   : > { %v4069_v43 = vpack.c.b16 %v4065_v47, %v4065_v47  ;;  %v4136_v11 = vunpack.c.l.b16 %v3932_v62  ;;  %v5209_v60 = vld [vmem:[%s7033_s7 + $0x68] sm:$0xff]  ;;  %v4160_v47 = vsel %vm3059_vm1, %v3994_v20, %v4011_v10  ;;  %4565 = vmatpush.bf16.msra.mxu3 %v5200_v13 }
 0x3b6   : > { %v4092_v50 = vpack.c.b16 %v4088_v38, %v4088_v38  ;;  %4016 = vrot.lane.b32.xlu0 %v4009_v5, %s5372_s18  ;;  %v4036_v38 = vor.u32 %v4035_v4, %v4031_v57  ;;  %4578 = vmatpush.bf16.msra.mxu1 %v5209_v60  ;;  %v3897_v5 = vld [vmem:[#allocation3] sm:$0x3]  ;;  %v4206_v58 = vrot.slane %v4160_v47, 6  ;;  %v3916_v14 = vld [vmem:[#allocation3 + $0x10] sm:$0x7] }
 0x3b7   : > { %v4073_v26 = vrot.slane %v4069_v43, 1  ;;  %v4140_v7 = vpack.c.b16 %v4136_v11, %v4136_v11  ;;  %4592 = vmatpush.bf16.msrb.mxu2 %v5217_v1  ;;  %v4025_v56 = vunpack.c.l.b16 %v3916_v14  ;;  %v4023_v11 = vunpack.c.l.b16 %v3914_v30  ;;  %v3925_v13 = vld [vmem:[#allocation3 + $0x14] sm:$0x3]  ;;  %v5220_v30 = vld [vmem:[%s7033_s7 + $0xc0] sm:$0xff] }
 0x3b8   : > { %v4111_v27 = vshll.u32 %v4092_v50, 16  ;;  %v4109_v19 = vshrl.u32 %v4092_v50, 16  ;;  %v4172_v43 = vsel %vm3059_vm1, %v4036_v38, %v4075_v6  ;;  %v3922_v50 = vld [vmem:[#allocation3 + $0x8] sm:$0x3]  ;;  %v5230_v6 = vld [vmem:[%s7033_s7 + $0x110] sm:$0xff]  ;;  %v3992_v38 = vpack.c.b16 %v3988_v0, %v3988_v0 }
 0x3b9   : > { %4080 = vrot.lane.b32.xlu1 %v4073_v26, %s5372_s18  ;;  %v4144_v28 = vrot.slane %v4140_v7, 1  ;;  %v5199_v26 = vld [vmem:[%s7033_s7 + $0x18] sm:$0xff]  ;;  %v4029_v24 = vpack.c.b16 %v4025_v56, %v4025_v56  ;;  %v4027_v57 = vpack.c.b16 %v4023_v11, %v4023_v11  ;;  %v4049_v1 = vrot.slane %v4047_v42, 1  ;;  %v5228_v56 = vld [vmem:[%s7033_s7 + $0x100] sm:$0xff] }
 0x3ba   : > { %3978 = vrot.lane.b32.xlu2 %v3966_v15, %s5372_s18  ;;  %v4113_v41 = vrot.slane %v4111_v27, 1  ;;  %v4148_v27 = vsel %vm3059_vm1, %v3897_v5, %v3975_v33  ;;  %4579 = vmatpush.bf16.msra.mxu1 %v5208_v16  ;;  %v4207_v15 = vrot.slane %v4172_v43, 4  ;;  %v3908_v33 = vld [vmem:[#allocation3 + $0xc] sm:$0x6]  ;;  %v3987_v43 = vunpack.c.l.b16 %v3906_v63 }
 0x3bb   : > { %4331 = vst [vmem:[#allocation1 + $0x22] ss:$4 sm:$0xff] %v4144_v28  ;;  %v4219_v37 = vsel %vm622_vm0, %v4148_v27, %v4206_v58  ;;  %4566 = vmatpush.bf16.msra.mxu3 %v5199_v26  ;;  %v4054_v25 = vshll.u32 %v4029_v24, 16  ;;  %v3989_v62 = vunpack.c.l.b16 %v3908_v33  ;;  %v4052_v4 = vshrl.u32 %v4029_v24, 16  ;;  %v5231_v28 = vld [vmem:[%s7033_s7 + $0x118] sm:$0xff]  ;;  %v5222_v58 = vld [vmem:[%s7033_s7 + $0xd0] sm:$0xff] }
 0x3bc   : > { %v4114_v8 = vor.u32 %v4113_v41, %v4109_v19  ;;  %v5198_v19 = vld [vmem:[%s7033_s7 + $0x10] sm:$0xff]  ;;  %v4045_v26 = vshrl.u32 %v4028_v9, 16  ;;  %v3923_v33 = vld [vmem:[#allocation3 + $0xc] sm:$0x3] }
 0x3bd   : > { %v4056_v36 = vrot.slane %v4054_v25, 1  ;;  %v3993_v20 = vpack.c.b16 %v3989_v62, %v3989_v62 }
 0x3be   : > { %3980 = vrot.lane.b32.xlu0 %v3973_v17, %s5372_s18  ;;  %v5216_v17 = vld [vmem:[%s7033_s7 + $0xa0] sm:$0xff] }
 0x3bf   : > { %4593 = vmatpush.bf16.msrb.mxu2 %v5216_v17  ;;  %4567 = vmatpush.bf16.msra.mxu3 %v5198_v19  ;;  %v4057_v60 = vor.u32 %v4056_v36, %v4052_v4  ;;  %v3997_v16 = vrot.slane %v3993_v20, 1  ;;  %v3898_v4 = vld [vmem:[#allocation3 + $0x4] sm:$0x3] }
 0x3c1   : > { %4126 = vrot.lane.b32.xlu1 %v4114_v8, %s5372_s18  ;;  %v5207_v8 = vld [vmem:[%s7033_s7 + $0x58] sm:$0xff] }
 0x3c2   : > { %4580 = vmatpush.bf16.msra.mxu1 %v5207_v8  ;;  %v3900_v8 = vld [vmem:[#allocation3 + $0xc] sm:$0x3] }
 0x3c3   : > { %4568 = vmatpush.bf16.msra.mxu3 %v5197_v21 }
 0x3c6   : > { %4581 = vmatpush.bf16.msra.mxu1 %v5206_v46 }
 0x3c7   : > { %4569 = vmatpush.bf16.msra.mxu3 %v5196_v22 }
 0x3c9   : > { %3976 = vrot.lane.b32.xlu1 %v3959_v2, %s5372_s18  ;;  %v5215_v2 = vld [vmem:[%s7033_s7 + $0x98] sm:$0xff]  ;;  %s4743_s18 = scalar_lea.sflag [#allocation5], %s404_s0 }
 0x3ca   : > { %4594 = vmatpush.bf16.msrb.mxu2 %v5215_v2  ;;  %4582 = vmatpush.bf16.msra.mxu1 %v5205_v52  ;;  %v4038_v52 = vshrl.u32 %v4027_v57, 16 }
 0x3cb   : > { %4604 = vmatpush.bf16.msrb.mxu3 %v5227_v39  ;;  %v3899_v39 = vld [vmem:[#allocation3 + $0x8] sm:$0x3] }
 0x3ce   : > { %4595 = vmatpush.bf16.msrb.mxu2 %v5214_v48  ;;  %4583 = vmatpush.bf16.msra.mxu1 %v5204_v53  ;;  %v3924_v48 = vld [vmem:[#allocation3 + $0x10] sm:$0x3] }
 0x3cf   : > { %4605 = vmatpush.bf16.msrb.mxu3 %v5226_v34 }
 0x3d2   : > { %4596 = vmatpush.bf16.msrb.mxu2 %v5213_v18  ;;  %4622 = vmatpush.bf16.msrb.mxu1 %v5231_v28 }
 0x3d3   : > { %4606 = vmatpush.bf16.msrb.mxu3 %v5225_v12 }
 0x3d6   : > { %4597 = vmatpush.bf16.msrb.mxu2 %v5212_v31  ;;  %4623 = vmatpush.bf16.msrb.mxu1 %v5230_v6  ;;  %v4339_v6 = vld.sshfl [vmem:[#allocation1 + $0x20] sm:$0xff pattern:$0x73625140] }
 0x3d7   : > { %4607 = vmatpush.bf16.msrb.mxu3 %v5224_v55 }
 0x3db   : > { %4608 = vmatpush.bf16.msrb.mxu3 %v5223_v45 }
 0x3df   : > { %4609 = vmatpush.bf16.msrb.mxu3 %v5222_v58  ;;  %v5237_v58 = vld [vmem:[%s7036_s10 + $0x28] sm:$0xff] }
 0x3f4   : > { %v6809_v35 = vpop.permute.xlu2 %4128 }
 0x3fc   : > { %v6826_v40 = vpop.permute.xlu2 %4076 }
 0x404   : > { %v4123_v44 = vpop.permute.xlu2 %4122 }
 0x405   : > { %v4184_v49 = vsel %vm3059_vm1, %v3922_v50, %v4123_v44  ;;  %v4193_v50 = vsel %vm3059_vm1, %v3925_v13, %v6809_v35  ;;  %v4040_v44 = vshll.u32 %v4027_v57, 16  ;;  %v5221_v35 = vld [vmem:[%s7033_s7 + $0xc8] sm:$0xff]  ;;  %v5239_v13 = vld [vmem:[%s7036_s10 + $0x38] sm:$0xff] }
 0x406   : > { %v4208_v3 = vrot.slane %v4184_v49, 2  ;;  %v5229_v49 = vld [vmem:[%s7033_s7 + $0x108] sm:$0xff]  ;;  %4610 = vmatpush.bf16.msrb.mxu3 %v5221_v35  ;;  %4727 = vmatpush.bf16.msra.mxu2 %v5239_v13 }
 0x407   : > { %v4042_v14 = vrot.slane %v4040_v44, 1  ;;  %4624 = vmatpush.bf16.msrb.mxu1 %v5229_v49 }
 0x408   : > { %v4223_v41 = vsel %vm4220_vm4, %v4207_v15, %v4208_v3  ;;  %v6902_v32 = vpop.permute.xlu1 %4012  ;;  %v3996_v3 = vrot.slane %v3992_v38, 1 }
 0x409   : > { %v4225_v29 = vsel %vm4224_vm5, %v4219_v37, %v4223_v41  ;;  %v4050_v37 = vor.u32 %v4049_v1, %v4045_v26  ;;  %v4217_v41 = vrot.slane %v4193_v50, 2  ;;  %v4043_v9 = vor.u32 %v4042_v14, %v4038_v52  ;;  %v5236_v26 = vld [vmem:[%s7036_s10 + $0x20] sm:$0xff] }
 0x40a   : > { %4316 = vst [vmem:[#allocation1] ss:$4 sm:$0xff] %v4225_v29  ;;  %v3991_v29 = vpack.c.b16 %v3987_v43, %v3987_v43  ;;  %4611 = vmatpush.bf16.msrb.mxu3 %v5220_v30 }
 0x40b   : > { %4625 = vmatpush.bf16.msrb.mxu1 %v5228_v56  ;;  %v4175_v11 = vsel %vm3059_vm1, %v4043_v9, %v6826_v40 }
 0x40c   : > { %v4015_v7 = vpop.permute.xlu2 %4014  ;;  %v3995_v62 = vrot.slane %v3991_v29, 1  ;;  %v4210_v42 = vrot.slane %v4175_v11, 4  ;;  %v5294_v29 = vld [vmem:[%s7034_s8] ss:$0 sm:$0xff] }
 0x40d   : > { %v4166_v2 = vsel %vm3059_vm1, %v3996_v3, %v4015_v7 }
 0x40e   : > { %v4212_v12 = vrot.slane %v4166_v2, 6  ;;  %v4163_v36 = vsel %vm3059_vm1, %v3995_v62, %v6902_v32  ;;  %v5295_v2 = vld [vmem:[%s7035_s9] ss:$0 sm:$0xff] }
 0x40f   : > { %v4209_v20 = vrot.slane %v4163_v36, 6 }
 0x413   : > { %v6868_v51 = vpop.permute.xlu0 %4078 }
 0x414   : > { %v3979_v17 = vpop.permute.xlu2 %3978  ;;  %v4178_v22 = vsel %vm3059_vm1, %v4050_v37, %v6868_v51  ;;  %v5235_v37 = vld [vmem:[%s7036_s10 + $0x18] sm:$0xff] }
 0x415   : > { %v4154_v61 = vsel %vm3059_vm1, %v3899_v39, %v3979_v17  ;;  %v4213_v25 = vrot.slane %v4178_v22, 4  ;;  %v5373_v17 = vmov 16.0  }
 0x416   : > { %v4233_v31 = vsel %vm622_vm0, %v4154_v61, %v4212_v12  ;;  %5296 = vrcp.f32 %v5373_v17  ;;  %v5232_v61 = vld [vmem:[%s7036_s10] sm:$0xff] }
 0x41b   : > { %v6891_v23 = vpop.permute.xlu0 %4124 }
 0x41c   : > { %v4187_v59 = vsel %vm3059_vm1, %v3923_v33, %v6891_v23  ;;  %v5297_v56 = vpop.eup %5296 }
 0x41d   : > { %v4211_v0 = vrot.slane %v4187_v59, 2 }
 0x428   : > { %v4017_v10 = vpop.permute.xlu0 %4016 }
 0x429   : > { %v4169_v27 = vsel %vm3059_vm1, %v3997_v16, %v4017_v10  ;;  %v4230_v10 = vsel %vm4220_vm4, %v4210_v42, %v4211_v0  ;;  %v4678_v0 = vld [vmem:[%s7037_s11] sm:$0x1] }
 0x42a   : > { %v4215_v19 = vrot.slane %v4169_v27, 6 }
 0x42b   : > { %v4081_v47 = vpop.permute.xlu1 %4080 }
 0x42c   : > { %v4181_v5 = vsel %vm3059_vm1, %v4057_v60, %v4081_v47 }
 0x42d   : > { %v4216_v15 = vrot.slane %v4181_v5, 4  ;;  %v5238_v5 = vld [vmem:[%s7036_s10 + $0x30] sm:$0xff] }
 0x42e   : > { %4728 = vmatpush.bf16.msra.mxu2 %v5238_v5 }
 0x42f   : > { %v4242_v54 = vsel %vm4220_vm4, %v4216_v15, %v4217_v41 }
 0x430   : > { %v3981_v21 = vpop.permute.xlu0 %3980 }
 0x431   : > { %v4157_v46 = vsel %vm3059_vm1, %v3900_v8, %v3981_v21  ;;  %v5234_v21 = vld [vmem:[%s7036_s10 + $0x10] sm:$0xff] }
 0x432   : > { %v4239_v24 = vsel %vm622_vm0, %v4157_v46, %v4215_v19  ;;  %4729 = vmatpush.bf16.msra.mxu2 %v5237_v58 }
 0x433   : > { %v4127_v34 = vpop.permute.xlu1 %4126  ;;  %v4243_v51 = vsel %vm4224_vm5, %v4239_v24, %v4242_v54  ;;  %v5233_v54 = vld [vmem:[%s7036_s10 + $0x8] sm:$0xff] }
 0x434   : > { %v4190_v18 = vsel %vm3059_vm1, %v3924_v48, %v4127_v34  ;;  %4322 = vst [vmem:[#allocation1 + $0x3] ss:$4 sm:$0xff] %v4243_v51  ;;  %v4654_v34 = vmul.f32 16.0, %v5297_v56 }
 0x435   : > { %v4214_v53 = vrot.slane %v4190_v18, 2 }
 0x436   : > { %4730 = vmatpush.bf16.msra.mxu2 %v5236_v26  ;;  %v4655_v18 = vsub.f32 1.0, %v4654_v34 }
 0x437   : > { %v4236_v55 = vsel %vm4220_vm4, %v4213_v25, %v4214_v53 }
 0x438   : > { %v4237_v7 = vsel %vm4224_vm5, %v4233_v31, %v4236_v55  ;;  %v4656_v53 = vmul.f32 %v5297_v56, %v4655_v18 }
 0x439   : > { %4320 = vst [vmem:[#allocation1 + $0x2] ss:$4 sm:$0xff] %v4237_v7 }
 0x43a   : > { %4731 = vmatpush.bf16.msra.mxu2 %v5235_v37  ;;  %v4657_v62 = vadd.f32 %v5297_v56, %v4656_v53 }
 0x43b   : > { %v3977_v23 = vpop.permute.xlu1 %3976 }
 0x43c   : > { %v4151_v28 = vsel %vm3059_vm1, %v3898_v4, %v3977_v23 }
 0x43d   : > { %v4227_v45 = vsel %vm622_vm0, %v4151_v28, %v4209_v20  ;;  %vm4658_vm0 = vweird.f32 %v5297_v56 }
 0x43e   : > { %v4231_v40 = vsel %vm4224_vm5, %v4227_v45, %v4230_v10  ;;  %4732 = vmatpush.bf16.msra.mxu2 %v5234_v21  ;;  %v4659_v55 = vsel %vm4658_vm0, %v5297_v56, %v4657_v62 }
 0x43f   : > { %4318 = vst [vmem:[#allocation1 + $0x1] ss:$4 sm:$0xff] %v4231_v40 }
 0x442   : > { %4733 = vmatpush.bf16.msra.mxu2 %v5233_v54 }
 0x446   : > { %v4335_v57 = vld.sshfl [vmem:[#allocation1] sm:$0xff pattern:$0x73625140]  ;;  %v4336_v32 = vld.sshfl [vmem:[#allocation1 + $0x8] sm:$0xff pattern:$0x73625140]  ;;  %4734 = vmatpush.bf16.msra.mxu2 %v5232_v61 }
 0x447   : > { %4570 = vmatmul.bf16.vlgmr.msra.gmra.mxu3 %v4335_v57  ;;  %4584 = vmatmul.bf16.vlgmr.msra.gmra.mxu1 %v4336_v32  ;;  %v4337_v63 = vld.sshfl [vmem:[#allocation1 + $0x10] sm:$0xff pattern:$0x73625140]  ;;  %v4338_v60 = vld.sshfl [vmem:[#allocation1 + $0x18] sm:$0xff pattern:$0x73625140] }
 0x448   : > { %4598 = vmatmul.bf16.vlgmr.msrb.gmra.mxu2 %v4337_v63 }
 0x457   : > { %4612 = vmatmul.bf16.vlgmr.msrb.gmra.mxu3 %v4338_v60  ;;  %5124 = vmatmul.msk.bf16.vlgmr.msrb.gmra.mxu1 %vm3059_vm1, %v4339_v6 }
 0x4c4   : > { %v4585_v47 = vpop.f32.mrf.mxu1 }
 0x4ca   : > { %v4571_v38 = vpop.f32.mrf.mxu3 }
 0x4cb   : > { %v4586_v43 = vadd.f32 %v4585_v47, %v4571_v38  ;;  %v4599_v50 = vpop.f32.mrf.mxu2 }
 0x4cc   : > { %v4587_v1 = vpop.f32.mrf.mxu1 }
 0x4cd   : > { %v4600_v44 = vadd.f32 %v4599_v50, %v4586_v43 }
 0x4d2   : > { %v4573_v16 = vpop.f32.mrf.mxu3 }
 0x4d3   : > { %v4588_v3 = vadd.f32 %v4587_v1, %v4573_v16  ;;  %v4601_v19 = vpop.f32.mrf.mxu2 }
 0x4d4   : > { %v4627_v27 = vpop.f32.mrf.mxu1 }
 0x4d5   : > { %v4602_v8 = vadd.f32 %v4601_v19, %v4588_v3 }
 0x4da   : > { %v4613_v49 = vpop.f32.mrf.mxu3 }
 0x4db   : > { %v4614_v15 = vadd.f32 %v4613_v49, %v4600_v44 }
 0x4dc   : > { %v4629_v46 = vpop.f32.mrf.mxu1 }
 0x4dd   : > { %v4628_v41 = vadd.f32 %v4627_v27, %v4614_v15 }
 0x4df   : > { %v4636_v14 = vmul.f32 %v5294_v29, %v4628_v41 }
 0x4e1   : > { %v4642_v24 = vadd.f32 %v5295_v2, %v4636_v14 }
 0x4e2   : > { %v4615_v35 = vpop.f32.mrf.mxu3 }
 0x4e3   : > { %v4616_v22 = vadd.f32 %v4615_v35, %v4602_v8  ;;  %v4644_v33 = vmax.f32 %v4642_v24, 0.0 }
 0x4e5   : > { %v4630_v39 = vadd.f32 %v4629_v46, %v4616_v22 }
 0x4e7   : > { %v4637_v48 = vmul.f32 %v5294_v29, %v4630_v39 }
 0x4e9   : > { %v4643_v52 = vadd.f32 %v5295_v2, %v4637_v48 }
 0x4eb   : > { %v4645_v51 = vmax.f32 %v4643_v52, 0.0 }
 0x4ed   : > { %v4646_v12 = vadd.f32 %v4645_v51, %v4644_v33 }
 0x4ef   : > { %v4647_v25 = vrot.slane %v4646_v12, 4 }
 0x4f1   : > { %v4648_v30 = vadd.f32 %v4647_v25, %v4646_v12 }
 0x4f3   : > { %v4649_v9 = vrot.slane %v4648_v30, 2 }
 0x4f5   : > { %v4650_v59 = vadd.f32 %v4649_v9, %v4648_v30 }
 0x4f7   : > { %v4651_v31 = vrot.slane %v4650_v59, 1 }
 0x4f9   : > { %v4652_v11 = vadd.f32 %v4651_v31, %v4650_v59 }
 0x4fb   : > { %v4660_v36 = vmul.f32 %v4659_v55, %v4652_v11 }
 0x4fd   : > { %v4661_v7 = vpack.c.bf16 %v4660_v36, %v4660_v36 }
 0x4ff   : > { %4735 = vmatmul.bf16.vlgmr.msra.gmra.mxu2 %v4661_v7 }
 0x582   : > { %v4736_v42 = vpop.f32.mrf.mxu2 }
 0x583   : > { %v4737_v20 = vadd.f32 %v4736_v42, %v4678_v0 }
 0x585   : > { %4741 = vst.msk [vmem:[%s405_s29] sm:$0x1] %vm4740_vm6, %v4737_v20 }
 0x586   : > { %5332 = shalt.err (!%p5329_p3)
}
 0x587   : > { %5246 = dma.vmem_to_hbm [thread:$0]  (%p5477_p5), %s4754_s15, 16, %s4756_s19, %s4743_s18  }
 0x58a   : > { %v4738_v4 = vpop.f32.mrf.mxu2 }
 0x58b PF: > { %p5252_p4 = scmp.ge.s32.totalorder %s5367_s24, 2  ;;  %s4767_s0 = sand.u32 1, %s5355_s21  }
 0x58c   : > { %s4768_s17 = scalar_lea.sflag [#allocation5], %s4767_s0 }
 0x58d   : > { %p5249_p7 = pnand %p5252_p4, %p5481_p6 }
 0x58f   : > { %p5250_p8 = pneg %p5249_p7 }
 0x591   : > { %5350 = dma.done.wait (%p5250_p8), %s4768_s17, 16  }
 0x592   : > { %5352 = vsyncadd (%p5250_p8), %s4768_s17, 4294967280  ;;  %p22_p9 = scmp.ge.s32.totalorder %s5464_s27, 4   ;;  %s7053_s21 = smov %s5359_s22 }
 0x593   : > { %s7054_s22 = smov %s5363_s23  ;;  %s7055_s23 = smov %s5475_s30 }
 0x594   : > { %s7056_s24 = smov %s5464_s27  ;;  %24 = sbr.rel (!%p22_p9) target bundleno = 7 (0x7), region = 114 }
 0x599   :  { %4773 = vsyncpa [#allocation5], 1 }
 0x59a   :  { %4775 = vsyncpa [#allocation5 + $0x1], 1 }

</bundles_post_ra>
